<compile_context>
chip_gen: v6e
topology: v6e:2x2x1
jax: 0.10.0
libtpu: 0.0.40
codegen_flags: <defaults>
</compile_context>

<pallas_src>
import jax
import jax.numpy as jnp
import numpy as np
from jax import lax
from jax.experimental import pallas as pl
from jax.experimental.pallas import tpu as pltpu


# ----------------------------- fused Pallas kernel ---------------------------

def fused_encoder_kernel(x_ref, len_ref, pw_ref, pb_ref,
                         cw_ref, cb_ref, bns_ref, bnh_ref,
                         wih_ref, bih_ref, whhf_ref, whhb_ref,
                         fwf_ref, fwb_ref, fb_ref,
                         o_ref, outf_ref, outb_ref):
    # x_ref: (T*B, F) time-major flat (row = t*B + b); o_ref: (T*B, D) time-major.
    f32 = jnp.float32
    TB, D = o_ref.shape
    B = len_ref.shape[0]
    T = TB // B

    # ---- 1) projection: Linear fasttext_dim -> lstm_dim -----------------------
    h = jnp.dot(x_ref[...], pw_ref[...], preferred_element_type=f32) + pb_ref[...]

    # ---- 2) 3x (Conv1d k=3 pad=1 over time -> BN(eval) -> ReLU) ----------------
    # Conv as ONE K=3D matmul per layer: x_win = [x[t-1] | x[t] | x[t+1]].
    # In time-major flat layout the time-neighbours of row r are rows r -/+ B,
    # with zero padding at t==0 / t==T-1 (first/last B rows).
    zpad = jnp.zeros((B, D), f32)
    for l in range(3):
        x_prev = jnp.concatenate([zpad, h[:TB - B, :]], axis=0)   # x[t-1], zero-padded
        x_next = jnp.concatenate([h[B:, :], zpad], axis=0)        # x[t+1], zero-padded
        x_win = jnp.concatenate([x_prev, h, x_next], axis=1)      # (TB, 3D)
        y = jnp.dot(x_win, cw_ref[l], preferred_element_type=f32) + cb_ref[l]
        y = y * bns_ref[l] + bnh_ref[l]                           # BatchNorm1d (eval)
        h = jnp.maximum(y, 0.0)                                   # ReLU
        # TODO(synk): dropout after ReLU is eval-mode identity; no stochastic mask emitted.

    # ---- 3) BiLSTM --------------------------------------------------------------
    # Hoist the input-side matmul out of the recurrence: one matmul computes
    # x@Wih + b for all T steps and BOTH directions (columns [0:4D] fwd, [4D:8D] bwd).
    gi = jnp.dot(h, wih_ref[...], preferred_element_type=f32) + bih_ref[...]   # (TB, 8D)
    whh_f = whhf_ref[...]
    whh_b = whhb_ref[...]
    lens = len_ref[...]                                           # (B, 1) int32

    def cell(g, c):
        # PyTorch gate order: i, f, g, o
        ig = jax.nn.sigmoid(g[:, 0:D])
        fg = jax.nn.sigmoid(g[:, D:2 * D])
        gg = jnp.tanh(g[:, 2 * D:3 * D])
        og = jax.nn.sigmoid(g[:, 3 * D:4 * D])
        c_new = fg * c + ig * gg
        return og * jnp.tanh(c_new), c_new

    zero = jnp.zeros((B, D), f32)
    hf, cf, hb, cb = zero, zero, zero, zero
    # Fully unrolled (T is small & static); forward and reverse directions are
    # interleaved so each step carries two independent dependency chains.
    for i in range(T):
        tf = i
        tb = T - 1 - i
        g_f = gi[tf * B:(tf + 1) * B, 0:4 * D] + jnp.dot(hf, whh_f,
                                                         preferred_element_type=f32)
        g_b = gi[tb * B:(tb + 1) * B, 4 * D:8 * D] + jnp.dot(hb, whh_b,
                                                             preferred_element_type=f32)
        hf_new, cf_new = cell(g_f, cf)
        hb_new, cb_new = cell(g_b, cb)
        mf = tf < lens                                            # packed-sequence masking
        mb = tb < lens
        outf_ref[tf * B:(tf + 1) * B, :] = jnp.where(mf, hf_new, 0.0)
        outb_ref[tb * B:(tb + 1) * B, :] = jnp.where(mb, hb_new, 0.0)
        hf = jnp.where(mf, hf_new, hf)
        cf = jnp.where(mf, cf_new, cf)
        hb = jnp.where(mb, hb_new, hb)
        cb = jnp.where(mb, cb_new, cb)

    # ---- 4) final fc: 2*lstm_dim -> lstm_dim, split matmuls (no 2D-wide concat) --
    of = outf_ref[...]
    ob = outb_ref[...]
    o_ref[...] = (jnp.dot(of, fwf_ref[...], preferred_element_type=f32)
                  + jnp.dot(ob, fwb_ref[...], preferred_element_type=f32)
                  + fb_ref[...])


# ----------------------------- model wrapper ---------------------------------

@jax.jit
def token_encoder_forward(emb, lengths, kp):
    B, T, F_dim = emb.shape
    D = kp['proj_w'].shape[1]
    TB = T * B

    # Tiny one-time I/O layout ops (3 KB in / 2 KB out); everything between them
    # runs inside a single fused Pallas kernel with VMEM-resident activations.
    emb_tm = jnp.transpose(emb, (1, 0, 2)).reshape(TB, F_dim)     # time-major flat
    lens2d = lengths.astype(jnp.int32).reshape(B, 1)

    vmem = pl.BlockSpec(memory_space=pltpu.MemorySpace.VMEM)
    out_tm = pl.pallas_call(
        fused_encoder_kernel,
        out_shape=jax.ShapeDtypeStruct((TB, D), jnp.float32),
        in_specs=[vmem] * 15,
        out_specs=vmem,
        scratch_shapes=[pltpu.VMEM((TB, D), jnp.float32),         # fwd LSTM outputs
                        pltpu.VMEM((TB, D), jnp.float32)],        # bwd LSTM outputs
    )(emb_tm, lens2d,
      kp['proj_w'], kp['proj_b'],
      kp['conv_w'], kp['conv_b'], kp['bn_scale'], kp['bn_shift'],
      kp['wih_fb'], kp['b_fb'], kp['whh_f'], kp['whh_b'],
      kp['fc_w_f'], kp['fc_w_b'], kp['fc_b'])

    return jnp.transpose(out_tm.reshape(T, B, D), (1, 0, 2))      # (B, T, D)


# ----------------------------- parameters ------------------------------------

def init_params(key, fasttext_dim, lstm_dim):
    D = lstm_dim
    ks = jax.random.split(key, 16)

    def rnd(k, shape, s=0.2):
        return (s * jax.random.normal(k, shape)).astype(jnp.float32)

    p = {}
    p['proj_w'] = rnd(ks[0], (fasttext_dim, D))
    p['proj_b'] = rnd(ks[1], (D,))
    eps = 1e-5
    for idx, l in enumerate((1, 2, 3)):
        kw, kb, kg, kbe, km, kv = jax.random.split(ks[2 + idx], 6)
        w = rnd(kw, (D, D, 3))                                # PyTorch Conv1d layout (out, in, k)
        p[f'conv{l}_wt'] = jnp.transpose(w, (2, 1, 0))        # (k, in, out) for matmuls
        p[f'conv{l}_b'] = rnd(kb, (D,))
        gamma = (1.0 + 0.1 * jax.random.normal(kg, (D,))).astype(jnp.float32)
        beta = (0.1 * jax.random.normal(kbe, (D,))).astype(jnp.float32)
        mean = (0.1 * jax.random.normal(km, (D,))).astype(jnp.float32)
        var = (1.0 + 0.1 * jax.random.uniform(kv, (D,))).astype(jnp.float32)
        scale = gamma / jnp.sqrt(var + eps)
        p[f'bn{l}_scale'] = scale
        p[f'bn{l}_shift'] = beta - mean * scale
    # BiLSTM weights, PyTorch gate order (i, f, g, o)
    for d, base in (('f', 5), ('b', 9)):
        wih = rnd(ks[base], (4 * D, D))
        whh = rnd(ks[base + 1], (4 * D, D))
        bih = rnd(ks[base + 2], (4 * D,))
        bhh = rnd(ks[base + 3], (4 * D,))
        p[f'wih_{d}'] = wih.T
        p[f'whh_{d}'] = whh.T
        p[f'b_{d}'] = bih + bhh
    fc_w = rnd(ks[13], (D, 2 * D))                            # PyTorch Linear layout (out, in)
    p['fc_w'] = fc_w.T
    p['fc_b'] = rnd(ks[14], (D,))
    return p


def pack_params(p):
    """Repack parameters into the fused-kernel layout (done once, host side)."""
    D = p['proj_w'].shape[1]
    return {
        'proj_w': p['proj_w'],
        'proj_b': p['proj_b'].reshape(1, D),
        # conv weight (k, in, out) flattened to (3*in, out) so the conv is one
        # matmul against the [x_prev | x | x_next] window.
        'conv_w': jnp.stack([p[f'conv{l}_wt'].reshape(3 * D, D) for l in (1, 2, 3)]),
        'conv_b': jnp.stack([p[f'conv{l}_b'].reshape(1, D) for l in (1, 2, 3)]),
        'bn_scale': jnp.stack([p[f'bn{l}_scale'].reshape(1, D) for l in (1, 2, 3)]),
        'bn_shift': jnp.stack([p[f'bn{l}_shift'].reshape(1, D) for l in (1, 2, 3)]),
        # both directions' input projections batched into one (D, 8D) matmul
        'wih_fb': jnp.concatenate([p['wih_f'], p['wih_b']], axis=1),
        'b_fb': jnp.concatenate([p['b_f'], p['b_b']]).reshape(1, 8 * D),
        'whh_f': p['whh_f'],
        'whh_b': p['whh_b'],
        # fc split so no (T*B, 2D) concat is needed
        'fc_w_f': p['fc_w'][:D, :],
        'fc_w_b': p['fc_w'][D:, :],
        'fc_b': p['fc_b'].reshape(1, D),
    }


# ----------------------------- pure-JAX reference ----------------------------

def reference_forward(emb, lengths, p):
    B, T, _ = emb.shape
    D = p['proj_w'].shape[1]
    h = emb @ p['proj_w'] + p['proj_b']
    for l in (1, 2, 3):
        w = p[f'conv{l}_wt']
        hp = jnp.pad(h, ((0, 0), (1, 1), (0, 0)))
        y = hp[:, :-2] @ w[0] + hp[:, 1:-1] @ w[1] + hp[:, 2:] @ w[2] + p[f'conv{l}_b']
        y = y * p[f'bn{l}_scale'] + p[f'bn{l}_shift']
        h = jnp.maximum(y, 0.0)
    x_tbd = jnp.transpose(h, (1, 0, 2))
    lens = lengths.astype(jnp.int32)

    def run_dir(wih, whh, b, reverse):
        def step(carry, inp):
            hh, cc = carry
            xt, t = inp
            g = xt @ wih + hh @ whh + b
            ig = jax.nn.sigmoid(g[:, :D]); fg = jax.nn.sigmoid(g[:, D:2 * D])
            gg = jnp.tanh(g[:, 2 * D:3 * D]); og = jax.nn.sigmoid(g[:, 3 * D:])
            c_new = fg * cc + ig * gg
            h_new = og * jnp.tanh(c_new)
            mask = (t < lens)[:, None]
            return ((jnp.where(mask, h_new, hh), jnp.where(mask, c_new, cc)),
                    jnp.where(mask, h_new, 0.0))
        ts = jnp.arange(T)
        xs = (x_tbd[::-1], ts[::-1]) if reverse else (x_tbd, ts)
        init = (jnp.zeros((B, D), jnp.float32), jnp.zeros((B, D), jnp.float32))
        _, outs = lax.scan(step, init, xs)
        return outs[::-1] if reverse else outs

    of = run_dir(p['wih_f'], p['whh_f'], p['b_f'], False)
    ob = run_dir(p['wih_b'], p['whh_b'], p['b_b'], True)
    y = jnp.transpose(jnp.concatenate([of, ob], axis=-1), (1, 0, 2))
    return y @ p['fc_w'] + p['fc_b']


# ----------------------------- main -------------------------------------------

if __name__ == "__main__":
    B, T, F_dim, D = 2, 8, 48, 32
    key = jax.random.PRNGKey(0)
    k_in, k_par = jax.random.split(key)
    emb = (0.5 * jax.random.normal(k_in, (B, T, F_dim))).astype(jnp.float32)
    lengths = jnp.array([8, 5], dtype=jnp.int32)   # max length == T
    params = init_params(k_par, F_dim, D)
    kparams = pack_params(params)

    out = token_encoder_forward(emb, lengths, kparams)
    out = jax.block_until_ready(out)

    ref = reference_forward(emb, lengths, params)
    np.testing.assert_allclose(np.asarray(out), np.asarray(ref), rtol=1e-2, atol=1e-2)
    assert out.shape == (B, T, D)
    print("KERNEL_OK")
</pallas_src>

<mosaic_0001>
module attributes {stable_mosaic.version = 11 : i64} {
  func.func @fused_encoder_kernel(%arg0: memref<16x48xf32, #tpu.memory_space<vmem>>, %arg1: memref<2x1xi32, #tpu.memory_space<vmem>>, %arg2: memref<48x32xf32, #tpu.memory_space<vmem>>, %arg3: memref<1x32xf32, #tpu.memory_space<vmem>>, %arg4: memref<3x96x32xf32, #tpu.memory_space<vmem>>, %arg5: memref<3x1x32xf32, #tpu.memory_space<vmem>>, %arg6: memref<3x1x32xf32, #tpu.memory_space<vmem>>, %arg7: memref<3x1x32xf32, #tpu.memory_space<vmem>>, %arg8: memref<32x256xf32, #tpu.memory_space<vmem>>, %arg9: memref<1x256xf32, #tpu.memory_space<vmem>>, %arg10: memref<32x128xf32, #tpu.memory_space<vmem>>, %arg11: memref<32x128xf32, #tpu.memory_space<vmem>>, %arg12: memref<32x32xf32, #tpu.memory_space<vmem>>, %arg13: memref<32x32xf32, #tpu.memory_space<vmem>>, %arg14: memref<1x32xf32, #tpu.memory_space<vmem>>, %arg15: memref<16x32xf32, #tpu.memory_space<vmem>>, %arg16: memref<16x32xf32, #tpu.memory_space<vmem>>, %arg17: memref<16x32xf32, #tpu.memory_space<vmem>>) attributes {dimension_semantics = [], scalar_prefetch = 0 : i64, scratch_operands = 2 : i64, tpu.core_type = #tpu.core_type<tc>} {
    %c0 = arith.constant 0 : index
    %c0_0 = arith.constant 0 : index
    %0 = vector.load %arg0[%c0, %c0_0] : memref<16x48xf32, #tpu.memory_space<vmem>>, vector<16x48xf32>
    %c0_1 = arith.constant 0 : index
    %c0_2 = arith.constant 0 : index
    %1 = vector.load %arg2[%c0_1, %c0_2] : memref<48x32xf32, #tpu.memory_space<vmem>>, vector<48x32xf32>
    %cst = arith.constant dense<0.000000e+00> : vector<16x32xf32>
    %2 = tpu.matmul %0, %1, %cst {dimension_numbers = #tpu.dot_dimension_numbers<[1], [0], [0], [1], [0, 0, 1, 1], [], []>} : vector<16x48xf32>, vector<48x32xf32>, vector<16x32xf32> -> vector<16x32xf32>
    %c0_3 = arith.constant 0 : index
    %c0_4 = arith.constant 0 : index
    %3 = vector.load %arg3[%c0_3, %c0_4] : memref<1x32xf32, #tpu.memory_space<vmem>>, vector<1x32xf32>
    %4 = vector.broadcast %3 : vector<1x32xf32> to vector<16x32xf32>
    %5 = arith.addf %2, %4 : vector<16x32xf32>
    %cst_5 = arith.constant 0.000000e+00 : f32
    %6 = vector.broadcast %cst_5 : f32 to vector<2x32xf32>
    %7 = vector.extract_strided_slice %5 {offsets = [0, 0], sizes = [14, 32], strides = [1, 1]} : vector<16x32xf32> to vector<14x32xf32>
    %8 = tpu.concatenate %6, %7 in 0 : vector<2x32xf32>, vector<14x32xf32> -> vector<16x32xf32>
    %9 = vector.extract_strided_slice %5 {offsets = [2, 0], sizes = [14, 32], strides = [1, 1]} : vector<16x32xf32> to vector<14x32xf32>
    %10 = tpu.concatenate %9, %6 in 0 : vector<14x32xf32>, vector<2x32xf32> -> vector<16x32xf32>
    %11 = tpu.concatenate %8, %5, %10 in 1 : vector<16x32xf32>, vector<16x32xf32>, vector<16x32xf32> -> vector<16x96xf32>
    %c0_6 = arith.constant 0 : index
    %c0_7 = arith.constant 0 : index
    %c0_8 = arith.constant 0 : index
    %12 = vector.load %arg4[%c0_6, %c0_7, %c0_8] : memref<3x96x32xf32, #tpu.memory_space<vmem>>, vector<1x96x32xf32>
    %13 = vector.shape_cast %12 : vector<1x96x32xf32> to vector<96x32xf32>
    %cst_9 = arith.constant dense<0.000000e+00> : vector<16x32xf32>
    %14 = tpu.matmul %11, %13, %cst_9 {dimension_numbers = #tpu.dot_dimension_numbers<[1], [0], [0], [1], [0, 0, 1, 1], [], []>} : vector<16x96xf32>, vector<96x32xf32>, vector<16x32xf32> -> vector<16x32xf32>
    %c0_10 = arith.constant 0 : index
    %c0_11 = arith.constant 0 : index
    %c0_12 = arith.constant 0 : index
    %15 = vector.load %arg5[%c0_10, %c0_11, %c0_12] : memref<3x1x32xf32, #tpu.memory_space<vmem>>, vector<1x1x32xf32>
    %16 = vector.shape_cast %15 : vector<1x1x32xf32> to vector<1x32xf32>
    %17 = vector.broadcast %16 : vector<1x32xf32> to vector<16x32xf32>
    %18 = arith.addf %14, %17 : vector<16x32xf32>
    %c0_13 = arith.constant 0 : index
    %c0_14 = arith.constant 0 : index
    %c0_15 = arith.constant 0 : index
    %19 = vector.load %arg6[%c0_13, %c0_14, %c0_15] : memref<3x1x32xf32, #tpu.memory_space<vmem>>, vector<1x1x32xf32>
    %20 = vector.shape_cast %19 : vector<1x1x32xf32> to vector<1x32xf32>
    %21 = vector.broadcast %20 : vector<1x32xf32> to vector<16x32xf32>
    %22 = arith.mulf %18, %21 : vector<16x32xf32>
    %c0_16 = arith.constant 0 : index
    %c0_17 = arith.constant 0 : index
    %c0_18 = arith.constant 0 : index
    %23 = vector.load %arg7[%c0_16, %c0_17, %c0_18] : memref<3x1x32xf32, #tpu.memory_space<vmem>>, vector<1x1x32xf32>
    %24 = vector.shape_cast %23 : vector<1x1x32xf32> to vector<1x32xf32>
    %25 = vector.broadcast %24 : vector<1x32xf32> to vector<16x32xf32>
    %26 = arith.addf %22, %25 : vector<16x32xf32>
    %cst_19 = arith.constant 0.000000e+00 : f32
    %27 = vector.broadcast %cst_19 : f32 to vector<16x32xf32>
    %28 = arith.maximumf %26, %27 : vector<16x32xf32>
    %29 = vector.extract_strided_slice %28 {offsets = [0, 0], sizes = [14, 32], strides = [1, 1]} : vector<16x32xf32> to vector<14x32xf32>
    %30 = tpu.concatenate %6, %29 in 0 : vector<2x32xf32>, vector<14x32xf32> -> vector<16x32xf32>
    %31 = vector.extract_strided_slice %28 {offsets = [2, 0], sizes = [14, 32], strides = [1, 1]} : vector<16x32xf32> to vector<14x32xf32>
    %32 = tpu.concatenate %31, %6 in 0 : vector<14x32xf32>, vector<2x32xf32> -> vector<16x32xf32>
    %33 = tpu.concatenate %30, %28, %32 in 1 : vector<16x32xf32>, vector<16x32xf32>, vector<16x32xf32> -> vector<16x96xf32>
    %c1 = arith.constant 1 : index
    %c0_20 = arith.constant 0 : index
    %c0_21 = arith.constant 0 : index
    %34 = vector.load %arg4[%c1, %c0_20, %c0_21] : memref<3x96x32xf32, #tpu.memory_space<vmem>>, vector<1x96x32xf32>
    %35 = vector.shape_cast %34 : vector<1x96x32xf32> to vector<96x32xf32>
    %cst_22 = arith.constant dense<0.000000e+00> : vector<16x32xf32>
    %36 = tpu.matmul %33, %35, %cst_22 {dimension_numbers = #tpu.dot_dimension_numbers<[1], [0], [0], [1], [0, 0, 1, 1], [], []>} : vector<16x96xf32>, vector<96x32xf32>, vector<16x32xf32> -> vector<16x32xf32>
    %c1_23 = arith.constant 1 : index
    %c0_24 = arith.constant 0 : index
    %c0_25 = arith.constant 0 : index
    %37 = vector.load %arg5[%c1_23, %c0_24, %c0_25] : memref<3x1x32xf32, #tpu.memory_space<vmem>>, vector<1x1x32xf32>
    %38 = vector.shape_cast %37 : vector<1x1x32xf32> to vector<1x32xf32>
    %39 = vector.broadcast %38 : vector<1x32xf32> to vector<16x32xf32>
    %40 = arith.addf %36, %39 : vector<16x32xf32>
    %c1_26 = arith.constant 1 : index
    %c0_27 = arith.constant 0 : index
    %c0_28 = arith.constant 0 : index
    %41 = vector.load %arg6[%c1_26, %c0_27, %c0_28] : memref<3x1x32xf32, #tpu.memory_space<vmem>>, vector<1x1x32xf32>
    %42 = vector.shape_cast %41 : vector<1x1x32xf32> to vector<1x32xf32>
    %43 = vector.broadcast %42 : vector<1x32xf32> to vector<16x32xf32>
    %44 = arith.mulf %40, %43 : vector<16x32xf32>
    %c1_29 = arith.constant 1 : index
    %c0_30 = arith.constant 0 : index
    %c0_31 = arith.constant 0 : index
    %45 = vector.load %arg7[%c1_29, %c0_30, %c0_31] : memref<3x1x32xf32, #tpu.memory_space<vmem>>, vector<1x1x32xf32>
    %46 = vector.shape_cast %45 : vector<1x1x32xf32> to vector<1x32xf32>
    %47 = vector.broadcast %46 : vector<1x32xf32> to vector<16x32xf32>
    %48 = arith.addf %44, %47 : vector<16x32xf32>
    %cst_32 = arith.constant 0.000000e+00 : f32
    %49 = vector.broadcast %cst_32 : f32 to vector<16x32xf32>
    %50 = arith.maximumf %48, %49 : vector<16x32xf32>
    %51 = vector.extract_strided_slice %50 {offsets = [0, 0], sizes = [14, 32], strides = [1, 1]} : vector<16x32xf32> to vector<14x32xf32>
    %52 = tpu.concatenate %6, %51 in 0 : vector<2x32xf32>, vector<14x32xf32> -> vector<16x32xf32>
    %53 = vector.extract_strided_slice %50 {offsets = [2, 0], sizes = [14, 32], strides = [1, 1]} : vector<16x32xf32> to vector<14x32xf32>
    %54 = tpu.concatenate %53, %6 in 0 : vector<14x32xf32>, vector<2x32xf32> -> vector<16x32xf32>
    %55 = tpu.concatenate %52, %50, %54 in 1 : vector<16x32xf32>, vector<16x32xf32>, vector<16x32xf32> -> vector<16x96xf32>
    %c2 = arith.constant 2 : index
    %c0_33 = arith.constant 0 : index
    %c0_34 = arith.constant 0 : index
    %56 = vector.load %arg4[%c2, %c0_33, %c0_34] : memref<3x96x32xf32, #tpu.memory_space<vmem>>, vector<1x96x32xf32>
    %57 = vector.shape_cast %56 : vector<1x96x32xf32> to vector<96x32xf32>
    %cst_35 = arith.constant dense<0.000000e+00> : vector<16x32xf32>
    %58 = tpu.matmul %55, %57, %cst_35 {dimension_numbers = #tpu.dot_dimension_numbers<[1], [0], [0], [1], [0, 0, 1, 1], [], []>} : vector<16x96xf32>, vector<96x32xf32>, vector<16x32xf32> -> vector<16x32xf32>
    %c2_36 = arith.constant 2 : index
    %c0_37 = arith.constant 0 : index
    %c0_38 = arith.constant 0 : index
    %59 = vector.load %arg5[%c2_36, %c0_37, %c0_38] : memref<3x1x32xf32, #tpu.memory_space<vmem>>, vector<1x1x32xf32>
    %60 = vector.shape_cast %59 : vector<1x1x32xf32> to vector<1x32xf32>
    %61 = vector.broadcast %60 : vector<1x32xf32> to vector<16x32xf32>
    %62 = arith.addf %58, %61 : vector<16x32xf32>
    %c2_39 = arith.constant 2 : index
    %c0_40 = arith.constant 0 : index
    %c0_41 = arith.constant 0 : index
    %63 = vector.load %arg6[%c2_39, %c0_40, %c0_41] : memref<3x1x32xf32, #tpu.memory_space<vmem>>, vector<1x1x32xf32>
    %64 = vector.shape_cast %63 : vector<1x1x32xf32> to vector<1x32xf32>
    %65 = vector.broadcast %64 : vector<1x32xf32> to vector<16x32xf32>
    %66 = arith.mulf %62, %65 : vector<16x32xf32>
    %c2_42 = arith.constant 2 : index
    %c0_43 = arith.constant 0 : index
    %c0_44 = arith.constant 0 : index
    %67 = vector.load %arg7[%c2_42, %c0_43, %c0_44] : memref<3x1x32xf32, #tpu.memory_space<vmem>>, vector<1x1x32xf32>
    %68 = vector.shape_cast %67 : vector<1x1x32xf32> to vector<1x32xf32>
    %69 = vector.broadcast %68 : vector<1x32xf32> to vector<16x32xf32>
    %70 = arith.addf %66, %69 : vector<16x32xf32>
    %cst_45 = arith.constant 0.000000e+00 : f32
    %71 = vector.broadcast %cst_45 : f32 to vector<16x32xf32>
    %72 = arith.maximumf %70, %71 : vector<16x32xf32>
    %c0_46 = arith.constant 0 : index
    %c0_47 = arith.constant 0 : index
    %73 = vector.load %arg8[%c0_46, %c0_47] : memref<32x256xf32, #tpu.memory_space<vmem>>, vector<32x256xf32>
    %cst_48 = arith.constant dense<0.000000e+00> : vector<16x256xf32>
    %74 = tpu.matmul %72, %73, %cst_48 {dimension_numbers = #tpu.dot_dimension_numbers<[1], [0], [0], [1], [0, 0, 1, 1], [], []>} : vector<16x32xf32>, vector<32x256xf32>, vector<16x256xf32> -> vector<16x256xf32>
    %c0_49 = arith.constant 0 : index
    %c0_50 = arith.constant 0 : index
    %75 = vector.load %arg9[%c0_49, %c0_50] : memref<1x256xf32, #tpu.memory_space<vmem>>, vector<1x256xf32>
    %76 = vector.broadcast %75 : vector<1x256xf32> to vector<16x256xf32>
    %77 = arith.addf %74, %76 : vector<16x256xf32>
    %c0_51 = arith.constant 0 : index
    %c0_52 = arith.constant 0 : index
    %78 = vector.load %arg10[%c0_51, %c0_52] : memref<32x128xf32, #tpu.memory_space<vmem>>, vector<32x128xf32>
    %c0_53 = arith.constant 0 : index
    %c0_54 = arith.constant 0 : index
    %79 = vector.load %arg11[%c0_53, %c0_54] : memref<32x128xf32, #tpu.memory_space<vmem>>, vector<32x128xf32>
    %c0_55 = arith.constant 0 : index
    %c0_56 = arith.constant 0 : index
    %80 = vector.load %arg1[%c0_55, %c0_56] : memref<2x1xi32, #tpu.memory_space<vmem>>, vector<2x1xi32>
    %cst_57 = arith.constant 0.000000e+00 : f32
    %81 = vector.broadcast %cst_57 : f32 to vector<2x32xf32>
    %82 = vector.extract_strided_slice %77 {offsets = [0, 0], sizes = [2, 128], strides = [1, 1]} : vector<16x256xf32> to vector<2x128xf32>
    %cst_58 = arith.constant dense<0.000000e+00> : vector<2x128xf32>
    %83 = tpu.matmul %81, %78, %cst_58 {dimension_numbers = #tpu.dot_dimension_numbers<[1], [0], [0], [1], [0, 0, 1, 1], [], []>} : vector<2x32xf32>, vector<32x128xf32>, vector<2x128xf32> -> vector<2x128xf32>
    %84 = arith.addf %82, %83 : vector<2x128xf32>
    %85 = vector.extract_strided_slice %77 {offsets = [14, 128], sizes = [2, 128], strides = [1, 1]} : vector<16x256xf32> to vector<2x128xf32>
    %cst_59 = arith.constant dense<0.000000e+00> : vector<2x128xf32>
    %86 = tpu.matmul %81, %79, %cst_59 {dimension_numbers = #tpu.dot_dimension_numbers<[1], [0], [0], [1], [0, 0, 1, 1], [], []>} : vector<2x32xf32>, vector<32x128xf32>, vector<2x128xf32> -> vector<2x128xf32>
    %87 = arith.addf %85, %86 : vector<2x128xf32>
    %88 = vector.extract_strided_slice %84 {offsets = [0, 0], sizes = [2, 32], strides = [1, 1]} : vector<2x128xf32> to vector<2x32xf32>
    %89 = arith.negf %88 : vector<2x32xf32>
    %90 = math.exp %89 : vector<2x32xf32>
    %cst_60 = arith.constant 1.000000e+00 : f32
    %91 = vector.broadcast %cst_60 : f32 to vector<2x32xf32>
    %92 = arith.addf %91, %90 : vector<2x32xf32>
    %93 = arith.divf %91, %92 : vector<2x32xf32>
    %94 = vector.extract_strided_slice %84 {offsets = [0, 32], sizes = [2, 32], strides = [1, 1]} : vector<2x128xf32> to vector<2x32xf32>
    %95 = arith.negf %94 : vector<2x32xf32>
    %96 = math.exp %95 : vector<2x32xf32>
    %cst_61 = arith.constant 1.000000e+00 : f32
    %97 = vector.broadcast %cst_61 : f32 to vector<2x32xf32>
    %98 = arith.addf %97, %96 : vector<2x32xf32>
    %99 = arith.divf %97, %98 : vector<2x32xf32>
    %100 = vector.extract_strided_slice %84 {offsets = [0, 64], sizes = [2, 32], strides = [1, 1]} : vector<2x128xf32> to vector<2x32xf32>
    %101 = math.tanh %100 : vector<2x32xf32>
    %102 = vector.extract_strided_slice %84 {offsets = [0, 96], sizes = [2, 32], strides = [1, 1]} : vector<2x128xf32> to vector<2x32xf32>
    %103 = arith.negf %102 : vector<2x32xf32>
    %104 = math.exp %103 : vector<2x32xf32>
    %cst_62 = arith.constant 1.000000e+00 : f32
    %105 = vector.broadcast %cst_62 : f32 to vector<2x32xf32>
    %106 = arith.addf %105, %104 : vector<2x32xf32>
    %107 = arith.divf %105, %106 : vector<2x32xf32>
    %108 = arith.mulf %99, %81 : vector<2x32xf32>
    %109 = arith.mulf %93, %101 : vector<2x32xf32>
    %110 = arith.addf %108, %109 : vector<2x32xf32>
    %111 = math.tanh %110 : vector<2x32xf32>
    %112 = arith.mulf %107, %111 : vector<2x32xf32>
    %113 = vector.extract_strided_slice %87 {offsets = [0, 0], sizes = [2, 32], strides = [1, 1]} : vector<2x128xf32> to vector<2x32xf32>
    %114 = arith.negf %113 : vector<2x32xf32>
    %115 = math.exp %114 : vector<2x32xf32>
    %cst_63 = arith.constant 1.000000e+00 : f32
    %116 = vector.broadcast %cst_63 : f32 to vector<2x32xf32>
    %117 = arith.addf %116, %115 : vector<2x32xf32>
    %118 = arith.divf %116, %117 : vector<2x32xf32>
    %119 = vector.extract_strided_slice %87 {offsets = [0, 32], sizes = [2, 32], strides = [1, 1]} : vector<2x128xf32> to vector<2x32xf32>
    %120 = arith.negf %119 : vector<2x32xf32>
    %121 = math.exp %120 : vector<2x32xf32>
    %cst_64 = arith.constant 1.000000e+00 : f32
    %122 = vector.broadcast %cst_64 : f32 to vector<2x32xf32>
    %123 = arith.addf %122, %121 : vector<2x32xf32>
    %124 = arith.divf %122, %123 : vector<2x32xf32>
    %125 = vector.extract_strided_slice %87 {offsets = [0, 64], sizes = [2, 32], strides = [1, 1]} : vector<2x128xf32> to vector<2x32xf32>
    %126 = math.tanh %125 : vector<2x32xf32>
    %127 = vector.extract_strided_slice %87 {offsets = [0, 96], sizes = [2, 32], strides = [1, 1]} : vector<2x128xf32> to vector<2x32xf32>
    %128 = arith.negf %127 : vector<2x32xf32>
    %129 = math.exp %128 : vector<2x32xf32>
    %cst_65 = arith.constant 1.000000e+00 : f32
    %130 = vector.broadcast %cst_65 : f32 to vector<2x32xf32>
    %131 = arith.addf %130, %129 : vector<2x32xf32>
    %132 = arith.divf %130, %131 : vector<2x32xf32>
    %133 = arith.mulf %124, %81 : vector<2x32xf32>
    %134 = arith.mulf %118, %126 : vector<2x32xf32>
    %135 = arith.addf %133, %134 : vector<2x32xf32>
    %136 = math.tanh %135 : vector<2x32xf32>
    %137 = arith.mulf %132, %136 : vector<2x32xf32>
    %c0_i32 = arith.constant 0 : i32
    %138 = vector.broadcast %c0_i32 : i32 to vector<2x1xi32>
    %139 = arith.cmpi sgt, %80, %138 : vector<2x1xi32>
    %c7_i32 = arith.constant 7 : i32
    %140 = vector.broadcast %c7_i32 : i32 to vector<2x1xi32>
    %141 = arith.cmpi sgt, %80, %140 : vector<2x1xi32>
    %cst_66 = arith.constant 0.000000e+00 : f32
    %142 = vector.shape_cast %139 : vector<2x1xi1> to vector<2x1xi1>
    %143 = vector.broadcast %142 : vector<2x1xi1> to vector<2x32xi1>
    %144 = vector.broadcast %cst_66 : f32 to vector<2x32xf32>
    %145 = arith.select %143, %112, %144 : vector<2x32xi1>, vector<2x32xf32>
    %c0_67 = arith.constant 0 : index
    %c0_68 = arith.constant 0 : index
    %146 = vector.load %arg16[%c0_67, %c0_68] : memref<16x32xf32, #tpu.memory_space<vmem>>, vector<2x32xf32>
    tpu.vector_store %arg16[%c0_67, %c0_68], %145 {strides = array<i32>} : memref<16x32xf32, #tpu.memory_space<vmem>>, vector<2x32xf32>,
    %cst_69 = arith.constant 0.000000e+00 : f32
    %147 = vector.shape_cast %141 : vector<2x1xi1> to vector<2x1xi1>
    %148 = vector.broadcast %147 : vector<2x1xi1> to vector<2x32xi1>
    %149 = vector.broadcast %cst_69 : f32 to vector<2x32xf32>
    %150 = arith.select %148, %137, %149 : vector<2x32xi1>, vector<2x32xf32>
    %c14 = arith.constant 14 : index
    %c0_70 = arith.constant 0 : index
    %151 = vector.load %arg17[%c14, %c0_70] : memref<16x32xf32, #tpu.memory_space<vmem>>, vector<2x32xf32>
    tpu.vector_store %arg17[%c14, %c0_70], %150 {strides = array<i32>} : memref<16x32xf32, #tpu.memory_space<vmem>>, vector<2x32xf32>,
    %152 = vector.shape_cast %139 : vector<2x1xi1> to vector<2x1xi1>
    %153 = vector.broadcast %152 : vector<2x1xi1> to vector<2x32xi1>
    %154 = arith.select %153, %112, %81 : vector<2x32xi1>, vector<2x32xf32>
    %155 = vector.shape_cast %139 : vector<2x1xi1> to vector<2x1xi1>
    %156 = vector.broadcast %155 : vector<2x1xi1> to vector<2x32xi1>
    %157 = arith.select %156, %110, %81 : vector<2x32xi1>, vector<2x32xf32>
    %158 = vector.shape_cast %141 : vector<2x1xi1> to vector<2x1xi1>
    %159 = vector.broadcast %158 : vector<2x1xi1> to vector<2x32xi1>
    %160 = arith.select %159, %137, %81 : vector<2x32xi1>, vector<2x32xf32>
    %161 = vector.shape_cast %141 : vector<2x1xi1> to vector<2x1xi1>
    %162 = vector.broadcast %161 : vector<2x1xi1> to vector<2x32xi1>
    %163 = arith.select %162, %135, %81 : vector<2x32xi1>, vector<2x32xf32>
    %164 = vector.extract_strided_slice %77 {offsets = [2, 0], sizes = [2, 128], strides = [1, 1]} : vector<16x256xf32> to vector<2x128xf32>
    %cst_71 = arith.constant dense<0.000000e+00> : vector<2x128xf32>
    %165 = tpu.matmul %154, %78, %cst_71 {dimension_numbers = #tpu.dot_dimension_numbers<[1], [0], [0], [1], [0, 0, 1, 1], [], []>} : vector<2x32xf32>, vector<32x128xf32>, vector<2x128xf32> -> vector<2x128xf32>
    %166 = arith.addf %164, %165 : vector<2x128xf32>
    %167 = vector.extract_strided_slice %77 {offsets = [12, 128], sizes = [2, 128], strides = [1, 1]} : vector<16x256xf32> to vector<2x128xf32>
    %cst_72 = arith.constant dense<0.000000e+00> : vector<2x128xf32>
    %168 = tpu.matmul %160, %79, %cst_72 {dimension_numbers = #tpu.dot_dimension_numbers<[1], [0], [0], [1], [0, 0, 1, 1], [], []>} : vector<2x32xf32>, vector<32x128xf32>, vector<2x128xf32> -> vector<2x128xf32>
    %169 = arith.addf %167, %168 : vector<2x128xf32>
    %170 = vector.extract_strided_slice %166 {offsets = [0, 0], sizes = [2, 32], strides = [1, 1]} : vector<2x128xf32> to vector<2x32xf32>
    %171 = arith.negf %170 : vector<2x32xf32>
    %172 = math.exp %171 : vector<2x32xf32>
    %cst_73 = arith.constant 1.000000e+00 : f32
    %173 = vector.broadcast %cst_73 : f32 to vector<2x32xf32>
    %174 = arith.addf %173, %172 : vector<2x32xf32>
    %175 = arith.divf %173, %174 : vector<2x32xf32>
    %176 = vector.extract_strided_slice %166 {offsets = [0, 32], sizes = [2, 32], strides = [1, 1]} : vector<2x128xf32> to vector<2x32xf32>
    %177 = arith.negf %176 : vector<2x32xf32>
    %178 = math.exp %177 : vector<2x32xf32>
    %cst_74 = arith.constant 1.000000e+00 : f32
    %179 = vector.broadcast %cst_74 : f32 to vector<2x32xf32>
    %180 = arith.addf %179, %178 : vector<2x32xf32>
    %181 = arith.divf %179, %180 : vector<2x32xf32>
    %182 = vector.extract_strided_slice %166 {offsets = [0, 64], sizes = [2, 32], strides = [1, 1]} : vector<2x128xf32> to vector<2x32xf32>
    %183 = math.tanh %182 : vector<2x32xf32>
    %184 = vector.extract_strided_slice %166 {offsets = [0, 96], sizes = [2, 32], strides = [1, 1]} : vector<2x128xf32> to vector<2x32xf32>
    %185 = arith.negf %184 : vector<2x32xf32>
    %186 = math.exp %185 : vector<2x32xf32>
    %cst_75 = arith.constant 1.000000e+00 : f32
    %187 = vector.broadcast %cst_75 : f32 to vector<2x32xf32>
    %188 = arith.addf %187, %186 : vector<2x32xf32>
    %189 = arith.divf %187, %188 : vector<2x32xf32>
    %190 = arith.mulf %181, %157 : vector<2x32xf32>
    %191 = arith.mulf %175, %183 : vector<2x32xf32>
    %192 = arith.addf %190, %191 : vector<2x32xf32>
    %193 = math.tanh %192 : vector<2x32xf32>
    %194 = arith.mulf %189, %193 : vector<2x32xf32>
    %195 = vector.extract_strided_slice %169 {offsets = [0, 0], sizes = [2, 32], strides = [1, 1]} : vector<2x128xf32> to vector<2x32xf32>
    %196 = arith.negf %195 : vector<2x32xf32>
    %197 = math.exp %196 : vector<2x32xf32>
    %cst_76 = arith.constant 1.000000e+00 : f32
    %198 = vector.broadcast %cst_76 : f32 to vector<2x32xf32>
    %199 = arith.addf %198, %197 : vector<2x32xf32>
    %200 = arith.divf %198, %199 : vector<2x32xf32>
    %201 = vector.extract_strided_slice %169 {offsets = [0, 32], sizes = [2, 32], strides = [1, 1]} : vector<2x128xf32> to vector<2x32xf32>
    %202 = arith.negf %201 : vector<2x32xf32>
    %203 = math.exp %202 : vector<2x32xf32>
    %cst_77 = arith.constant 1.000000e+00 : f32
    %204 = vector.broadcast %cst_77 : f32 to vector<2x32xf32>
    %205 = arith.addf %204, %203 : vector<2x32xf32>
    %206 = arith.divf %204, %205 : vector<2x32xf32>
    %207 = vector.extract_strided_slice %169 {offsets = [0, 64], sizes = [2, 32], strides = [1, 1]} : vector<2x128xf32> to vector<2x32xf32>
    %208 = math.tanh %207 : vector<2x32xf32>
    %209 = vector.extract_strided_slice %169 {offsets = [0, 96], sizes = [2, 32], strides = [1, 1]} : vector<2x128xf32> to vector<2x32xf32>
    %210 = arith.negf %209 : vector<2x32xf32>
    %211 = math.exp %210 : vector<2x32xf32>
    %cst_78 = arith.constant 1.000000e+00 : f32
    %212 = vector.broadcast %cst_78 : f32 to vector<2x32xf32>
    %213 = arith.addf %212, %211 : vector<2x32xf32>
    %214 = arith.divf %212, %213 : vector<2x32xf32>
    %215 = arith.mulf %206, %163 : vector<2x32xf32>
    %216 = arith.mulf %200, %208 : vector<2x32xf32>
    %217 = arith.addf %215, %216 : vector<2x32xf32>
    %218 = math.tanh %217 : vector<2x32xf32>
    %219 = arith.mulf %214, %218 : vector<2x32xf32>
    %c1_i32 = arith.constant 1 : i32
    %220 = vector.broadcast %c1_i32 : i32 to vector<2x1xi32>
    %221 = arith.cmpi sgt, %80, %220 : vector<2x1xi32>
    %c6_i32 = arith.constant 6 : i32
    %222 = vector.broadcast %c6_i32 : i32 to vector<2x1xi32>
    %223 = arith.cmpi sgt, %80, %222 : vector<2x1xi32>
    %cst_79 = arith.constant 0.000000e+00 : f32
    %224 = vector.shape_cast %221 : vector<2x1xi1> to vector<2x1xi1>
    %225 = vector.broadcast %224 : vector<2x1xi1> to vector<2x32xi1>
    %226 = vector.broadcast %cst_79 : f32 to vector<2x32xf32>
    %227 = arith.select %225, %194, %226 : vector<2x32xi1>, vector<2x32xf32>
    %c2_80 = arith.constant 2 : index
    %c0_81 = arith.constant 0 : index
    %228 = vector.load %arg16[%c2_80, %c0_81] : memref<16x32xf32, #tpu.memory_space<vmem>>, vector<2x32xf32>
    tpu.vector_store %arg16[%c2_80, %c0_81], %227 {strides = array<i32>} : memref<16x32xf32, #tpu.memory_space<vmem>>, vector<2x32xf32>,
    %cst_82 = arith.constant 0.000000e+00 : f32
    %229 = vector.shape_cast %223 : vector<2x1xi1> to vector<2x1xi1>
    %230 = vector.broadcast %229 : vector<2x1xi1> to vector<2x32xi1>
    %231 = vector.broadcast %cst_82 : f32 to vector<2x32xf32>
    %232 = arith.select %230, %219, %231 : vector<2x32xi1>, vector<2x32xf32>
    %c12 = arith.constant 12 : index
    %c0_83 = arith.constant 0 : index
    %233 = vector.load %arg17[%c12, %c0_83] : memref<16x32xf32, #tpu.memory_space<vmem>>, vector<2x32xf32>
    tpu.vector_store %arg17[%c12, %c0_83], %232 {strides = array<i32>} : memref<16x32xf32, #tpu.memory_space<vmem>>, vector<2x32xf32>,
    %234 = vector.shape_cast %221 : vector<2x1xi1> to vector<2x1xi1>
    %235 = vector.broadcast %234 : vector<2x1xi1> to vector<2x32xi1>
    %236 = arith.select %235, %194, %154 : vector<2x32xi1>, vector<2x32xf32>
    %237 = vector.shape_cast %221 : vector<2x1xi1> to vector<2x1xi1>
    %238 = vector.broadcast %237 : vector<2x1xi1> to vector<2x32xi1>
    %239 = arith.select %238, %192, %157 : vector<2x32xi1>, vector<2x32xf32>
    %240 = vector.shape_cast %223 : vector<2x1xi1> to vector<2x1xi1>
    %241 = vector.broadcast %240 : vector<2x1xi1> to vector<2x32xi1>
    %242 = arith.select %241, %219, %160 : vector<2x32xi1>, vector<2x32xf32>
    %243 = vector.shape_cast %223 : vector<2x1xi1> to vector<2x1xi1>
    %244 = vector.broadcast %243 : vector<2x1xi1> to vector<2x32xi1>
    %245 = arith.select %244, %217, %163 : vector<2x32xi1>, vector<2x32xf32>
    %246 = vector.extract_strided_slice %77 {offsets = [4, 0], sizes = [2, 128], strides = [1, 1]} : vector<16x256xf32> to vector<2x128xf32>
    %cst_84 = arith.constant dense<0.000000e+00> : vector<2x128xf32>
    %247 = tpu.matmul %236, %78, %cst_84 {dimension_numbers = #tpu.dot_dimension_numbers<[1], [0], [0], [1], [0, 0, 1, 1], [], []>} : vector<2x32xf32>, vector<32x128xf32>, vector<2x128xf32> -> vector<2x128xf32>
    %248 = arith.addf %246, %247 : vector<2x128xf32>
    %249 = vector.extract_strided_slice %77 {offsets = [10, 128], sizes = [2, 128], strides = [1, 1]} : vector<16x256xf32> to vector<2x128xf32>
    %cst_85 = arith.constant dense<0.000000e+00> : vector<2x128xf32>
    %250 = tpu.matmul %242, %79, %cst_85 {dimension_numbers = #tpu.dot_dimension_numbers<[1], [0], [0], [1], [0, 0, 1, 1], [], []>} : vector<2x32xf32>, vector<32x128xf32>, vector<2x128xf32> -> vector<2x128xf32>
    %251 = arith.addf %249, %250 : vector<2x128xf32>
    %252 = vector.extract_strided_slice %248 {offsets = [0, 0], sizes = [2, 32], strides = [1, 1]} : vector<2x128xf32> to vector<2x32xf32>
    %253 = arith.negf %252 : vector<2x32xf32>
    %254 = math.exp %253 : vector<2x32xf32>
    %cst_86 = arith.constant 1.000000e+00 : f32
    %255 = vector.broadcast %cst_86 : f32 to vector<2x32xf32>
    %256 = arith.addf %255, %254 : vector<2x32xf32>
    %257 = arith.divf %255, %256 : vector<2x32xf32>
    %258 = vector.extract_strided_slice %248 {offsets = [0, 32], sizes = [2, 32], strides = [1, 1]} : vector<2x128xf32> to vector<2x32xf32>
    %259 = arith.negf %258 : vector<2x32xf32>
    %260 = math.exp %259 : vector<2x32xf32>
    %cst_87 = arith.constant 1.000000e+00 : f32
    %261 = vector.broadcast %cst_87 : f32 to vector<2x32xf32>
    %262 = arith.addf %261, %260 : vector<2x32xf32>
    %263 = arith.divf %261, %262 : vector<2x32xf32>
    %264 = vector.extract_strided_slice %248 {offsets = [0, 64], sizes = [2, 32], strides = [1, 1]} : vector<2x128xf32> to vector<2x32xf32>
    %265 = math.tanh %264 : vector<2x32xf32>
    %266 = vector.extract_strided_slice %248 {offsets = [0, 96], sizes = [2, 32], strides = [1, 1]} : vector<2x128xf32> to vector<2x32xf32>
    %267 = arith.negf %266 : vector<2x32xf32>
    %268 = math.exp %267 : vector<2x32xf32>
    %cst_88 = arith.constant 1.000000e+00 : f32
    %269 = vector.broadcast %cst_88 : f32 to vector<2x32xf32>
    %270 = arith.addf %269, %268 : vector<2x32xf32>
    %271 = arith.divf %269, %270 : vector<2x32xf32>
    %272 = arith.mulf %263, %239 : vector<2x32xf32>
    %273 = arith.mulf %257, %265 : vector<2x32xf32>
    %274 = arith.addf %272, %273 : vector<2x32xf32>
    %275 = math.tanh %274 : vector<2x32xf32>
    %276 = arith.mulf %271, %275 : vector<2x32xf32>
    %277 = vector.extract_strided_slice %251 {offsets = [0, 0], sizes = [2, 32], strides = [1, 1]} : vector<2x128xf32> to vector<2x32xf32>
    %278 = arith.negf %277 : vector<2x32xf32>
    %279 = math.exp %278 : vector<2x32xf32>
    %cst_89 = arith.constant 1.000000e+00 : f32
    %280 = vector.broadcast %cst_89 : f32 to vector<2x32xf32>
    %281 = arith.addf %280, %279 : vector<2x32xf32>
    %282 = arith.divf %280, %281 : vector<2x32xf32>
    %283 = vector.extract_strided_slice %251 {offsets = [0, 32], sizes = [2, 32], strides = [1, 1]} : vector<2x128xf32> to vector<2x32xf32>
    %284 = arith.negf %283 : vector<2x32xf32>
    %285 = math.exp %284 : vector<2x32xf32>
    %cst_90 = arith.constant 1.000000e+00 : f32
    %286 = vector.broadcast %cst_90 : f32 to vector<2x32xf32>
    %287 = arith.addf %286, %285 : vector<2x32xf32>
    %288 = arith.divf %286, %287 : vector<2x32xf32>
    %289 = vector.extract_strided_slice %251 {offsets = [0, 64], sizes = [2, 32], strides = [1, 1]} : vector<2x128xf32> to vector<2x32xf32>
    %290 = math.tanh %289 : vector<2x32xf32>
    %291 = vector.extract_strided_slice %251 {offsets = [0, 96], sizes = [2, 32], strides = [1, 1]} : vector<2x128xf32> to vector<2x32xf32>
    %292 = arith.negf %291 : vector<2x32xf32>
    %293 = math.exp %292 : vector<2x32xf32>
    %cst_91 = arith.constant 1.000000e+00 : f32
    %294 = vector.broadcast %cst_91 : f32 to vector<2x32xf32>
    %295 = arith.addf %294, %293 : vector<2x32xf32>
    %296 = arith.divf %294, %295 : vector<2x32xf32>
    %297 = arith.mulf %288, %245 : vector<2x32xf32>
    %298 = arith.mulf %282, %290 : vector<2x32xf32>
    %299 = arith.addf %297, %298 : vector<2x32xf32>
    %300 = math.tanh %299 : vector<2x32xf32>
    %301 = arith.mulf %296, %300 : vector<2x32xf32>
    %c2_i32 = arith.constant 2 : i32
    %302 = vector.broadcast %c2_i32 : i32 to vector<2x1xi32>
    %303 = arith.cmpi sgt, %80, %302 : vector<2x1xi32>
    %c5_i32 = arith.constant 5 : i32
    %304 = vector.broadcast %c5_i32 : i32 to vector<2x1xi32>
    %305 = arith.cmpi sgt, %80, %304 : vector<2x1xi32>
    %cst_92 = arith.constant 0.000000e+00 : f32
    %306 = vector.shape_cast %303 : vector<2x1xi1> to vector<2x1xi1>
    %307 = vector.broadcast %306 : vector<2x1xi1> to vector<2x32xi1>
    %308 = vector.broadcast %cst_92 : f32 to vector<2x32xf32>
    %309 = arith.select %307, %276, %308 : vector<2x32xi1>, vector<2x32xf32>
    %c4 = arith.constant 4 : index
    %c0_93 = arith.constant 0 : index
    %310 = vector.load %arg16[%c4, %c0_93] : memref<16x32xf32, #tpu.memory_space<vmem>>, vector<2x32xf32>
    tpu.vector_store %arg16[%c4, %c0_93], %309 {strides = array<i32>} : memref<16x32xf32, #tpu.memory_space<vmem>>, vector<2x32xf32>,
    %cst_94 = arith.constant 0.000000e+00 : f32
    %311 = vector.shape_cast %305 : vector<2x1xi1> to vector<2x1xi1>
    %312 = vector.broadcast %311 : vector<2x1xi1> to vector<2x32xi1>
    %313 = vector.broadcast %cst_94 : f32 to vector<2x32xf32>
    %314 = arith.select %312, %301, %313 : vector<2x32xi1>, vector<2x32xf32>
    %c10 = arith.constant 10 : index
    %c0_95 = arith.constant 0 : index
    %315 = vector.load %arg17[%c10, %c0_95] : memref<16x32xf32, #tpu.memory_space<vmem>>, vector<2x32xf32>
    tpu.vector_store %arg17[%c10, %c0_95], %314 {strides = array<i32>} : memref<16x32xf32, #tpu.memory_space<vmem>>, vector<2x32xf32>,
    %316 = vector.shape_cast %303 : vector<2x1xi1> to vector<2x1xi1>
    %317 = vector.broadcast %316 : vector<2x1xi1> to vector<2x32xi1>
    %318 = arith.select %317, %276, %236 : vector<2x32xi1>, vector<2x32xf32>
    %319 = vector.shape_cast %303 : vector<2x1xi1> to vector<2x1xi1>
    %320 = vector.broadcast %319 : vector<2x1xi1> to vector<2x32xi1>
    %321 = arith.select %320, %274, %239 : vector<2x32xi1>, vector<2x32xf32>
    %322 = vector.shape_cast %305 : vector<2x1xi1> to vector<2x1xi1>
    %323 = vector.broadcast %322 : vector<2x1xi1> to vector<2x32xi1>
    %324 = arith.select %323, %301, %242 : vector<2x32xi1>, vector<2x32xf32>
    %325 = vector.shape_cast %305 : vector<2x1xi1> to vector<2x1xi1>
    %326 = vector.broadcast %325 : vector<2x1xi1> to vector<2x32xi1>
    %327 = arith.select %326, %299, %245 : vector<2x32xi1>, vector<2x32xf32>
    %328 = vector.extract_strided_slice %77 {offsets = [6, 0], sizes = [2, 128], strides = [1, 1]} : vector<16x256xf32> to vector<2x128xf32>
    %cst_96 = arith.constant dense<0.000000e+00> : vector<2x128xf32>
    %329 = tpu.matmul %318, %78, %cst_96 {dimension_numbers = #tpu.dot_dimension_numbers<[1], [0], [0], [1], [0, 0, 1, 1], [], []>} : vector<2x32xf32>, vector<32x128xf32>, vector<2x128xf32> -> vector<2x128xf32>
    %330 = arith.addf %328, %329 : vector<2x128xf32>
    %331 = vector.extract_strided_slice %77 {offsets = [8, 128], sizes = [2, 128], strides = [1, 1]} : vector<16x256xf32> to vector<2x128xf32>
    %cst_97 = arith.constant dense<0.000000e+00> : vector<2x128xf32>
    %332 = tpu.matmul %324, %79, %cst_97 {dimension_numbers = #tpu.dot_dimension_numbers<[1], [0], [0], [1], [0, 0, 1, 1], [], []>} : vector<2x32xf32>, vector<32x128xf32>, vector<2x128xf32> -> vector<2x128xf32>
    %333 = arith.addf %331, %332 : vector<2x128xf32>
    %334 = vector.extract_strided_slice %330 {offsets = [0, 0], sizes = [2, 32], strides = [1, 1]} : vector<2x128xf32> to vector<2x32xf32>
    %335 = arith.negf %334 : vector<2x32xf32>
    %336 = math.exp %335 : vector<2x32xf32>
    %cst_98 = arith.constant 1.000000e+00 : f32
    %337 = vector.broadcast %cst_98 : f32 to vector<2x32xf32>
    %338 = arith.addf %337, %336 : vector<2x32xf32>
    %339 = arith.divf %337, %338 : vector<2x32xf32>
    %340 = vector.extract_strided_slice %330 {offsets = [0, 32], sizes = [2, 32], strides = [1, 1]} : vector<2x128xf32> to vector<2x32xf32>
    %341 = arith.negf %340 : vector<2x32xf32>
    %342 = math.exp %341 : vector<2x32xf32>
    %cst_99 = arith.constant 1.000000e+00 : f32
    %343 = vector.broadcast %cst_99 : f32 to vector<2x32xf32>
    %344 = arith.addf %343, %342 : vector<2x32xf32>
    %345 = arith.divf %343, %344 : vector<2x32xf32>
    %346 = vector.extract_strided_slice %330 {offsets = [0, 64], sizes = [2, 32], strides = [1, 1]} : vector<2x128xf32> to vector<2x32xf32>
    %347 = math.tanh %346 : vector<2x32xf32>
    %348 = vector.extract_strided_slice %330 {offsets = [0, 96], sizes = [2, 32], strides = [1, 1]} : vector<2x128xf32> to vector<2x32xf32>
    %349 = arith.negf %348 : vector<2x32xf32>
    %350 = math.exp %349 : vector<2x32xf32>
    %cst_100 = arith.constant 1.000000e+00 : f32
    %351 = vector.broadcast %cst_100 : f32 to vector<2x32xf32>
    %352 = arith.addf %351, %350 : vector<2x32xf32>
    %353 = arith.divf %351, %352 : vector<2x32xf32>
    %354 = arith.mulf %345, %321 : vector<2x32xf32>
    %355 = arith.mulf %339, %347 : vector<2x32xf32>
    %356 = arith.addf %354, %355 : vector<2x32xf32>
    %357 = math.tanh %356 : vector<2x32xf32>
    %358 = arith.mulf %353, %357 : vector<2x32xf32>
    %359 = vector.extract_strided_slice %333 {offsets = [0, 0], sizes = [2, 32], strides = [1, 1]} : vector<2x128xf32> to vector<2x32xf32>
    %360 = arith.negf %359 : vector<2x32xf32>
    %361 = math.exp %360 : vector<2x32xf32>
    %cst_101 = arith.constant 1.000000e+00 : f32
    %362 = vector.broadcast %cst_101 : f32 to vector<2x32xf32>
    %363 = arith.addf %362, %361 : vector<2x32xf32>
    %364 = arith.divf %362, %363 : vector<2x32xf32>
    %365 = vector.extract_strided_slice %333 {offsets = [0, 32], sizes = [2, 32], strides = [1, 1]} : vector<2x128xf32> to vector<2x32xf32>
    %366 = arith.negf %365 : vector<2x32xf32>
    %367 = math.exp %366 : vector<2x32xf32>
    %cst_102 = arith.constant 1.000000e+00 : f32
    %368 = vector.broadcast %cst_102 : f32 to vector<2x32xf32>
    %369 = arith.addf %368, %367 : vector<2x32xf32>
    %370 = arith.divf %368, %369 : vector<2x32xf32>
    %371 = vector.extract_strided_slice %333 {offsets = [0, 64], sizes = [2, 32], strides = [1, 1]} : vector<2x128xf32> to vector<2x32xf32>
    %372 = math.tanh %371 : vector<2x32xf32>
    %373 = vector.extract_strided_slice %333 {offsets = [0, 96], sizes = [2, 32], strides = [1, 1]} : vector<2x128xf32> to vector<2x32xf32>
    %374 = arith.negf %373 : vector<2x32xf32>
    %375 = math.exp %374 : vector<2x32xf32>
    %cst_103 = arith.constant 1.000000e+00 : f32
    %376 = vector.broadcast %cst_103 : f32 to vector<2x32xf32>
    %377 = arith.addf %376, %375 : vector<2x32xf32>
    %378 = arith.divf %376, %377 : vector<2x32xf32>
    %379 = arith.mulf %370, %327 : vector<2x32xf32>
    %380 = arith.mulf %364, %372 : vector<2x32xf32>
    %381 = arith.addf %379, %380 : vector<2x32xf32>
    %382 = math.tanh %381 : vector<2x32xf32>
    %383 = arith.mulf %378, %382 : vector<2x32xf32>
    %c3_i32 = arith.constant 3 : i32
    %384 = vector.broadcast %c3_i32 : i32 to vector<2x1xi32>
    %385 = arith.cmpi sgt, %80, %384 : vector<2x1xi32>
    %c4_i32 = arith.constant 4 : i32
    %386 = vector.broadcast %c4_i32 : i32 to vector<2x1xi32>
    %387 = arith.cmpi sgt, %80, %386 : vector<2x1xi32>
    %cst_104 = arith.constant 0.000000e+00 : f32
    %388 = vector.shape_cast %385 : vector<2x1xi1> to vector<2x1xi1>
    %389 = vector.broadcast %388 : vector<2x1xi1> to vector<2x32xi1>
    %390 = vector.broadcast %cst_104 : f32 to vector<2x32xf32>
    %391 = arith.select %389, %358, %390 : vector<2x32xi1>, vector<2x32xf32>
    %c6 = arith.constant 6 : index
    %c0_105 = arith.constant 0 : index
    %392 = vector.load %arg16[%c6, %c0_105] : memref<16x32xf32, #tpu.memory_space<vmem>>, vector<2x32xf32>
    tpu.vector_store %arg16[%c6, %c0_105], %391 {strides = array<i32>} : memref<16x32xf32, #tpu.memory_space<vmem>>, vector<2x32xf32>,
    %cst_106 = arith.constant 0.000000e+00 : f32
    %393 = vector.shape_cast %387 : vector<2x1xi1> to vector<2x1xi1>
    %394 = vector.broadcast %393 : vector<2x1xi1> to vector<2x32xi1>
    %395 = vector.broadcast %cst_106 : f32 to vector<2x32xf32>
    %396 = arith.select %394, %383, %395 : vector<2x32xi1>, vector<2x32xf32>
    %c8 = arith.constant 8 : index
    %c0_107 = arith.constant 0 : index
    %397 = vector.load %arg17[%c8, %c0_107] : memref<16x32xf32, #tpu.memory_space<vmem>>, vector<2x32xf32>
    tpu.vector_store %arg17[%c8, %c0_107], %396 {strides = array<i32>} : memref<16x32xf32, #tpu.memory_space<vmem>>, vector<2x32xf32>,
    %398 = vector.shape_cast %385 : vector<2x1xi1> to vector<2x1xi1>
    %399 = vector.broadcast %398 : vector<2x1xi1> to vector<2x32xi1>
    %400 = arith.select %399, %358, %318 : vector<2x32xi1>, vector<2x32xf32>
    %401 = vector.shape_cast %385 : vector<2x1xi1> to vector<2x1xi1>
    %402 = vector.broadcast %401 : vector<2x1xi1> to vector<2x32xi1>
    %403 = arith.select %402, %356, %321 : vector<2x32xi1>, vector<2x32xf32>
    %404 = vector.shape_cast %387 : vector<2x1xi1> to vector<2x1xi1>
    %405 = vector.broadcast %404 : vector<2x1xi1> to vector<2x32xi1>
    %406 = arith.select %405, %383, %324 : vector<2x32xi1>, vector<2x32xf32>
    %407 = vector.shape_cast %387 : vector<2x1xi1> to vector<2x1xi1>
    %408 = vector.broadcast %407 : vector<2x1xi1> to vector<2x32xi1>
    %409 = arith.select %408, %381, %327 : vector<2x32xi1>, vector<2x32xf32>
    %410 = vector.extract_strided_slice %77 {offsets = [8, 0], sizes = [2, 128], strides = [1, 1]} : vector<16x256xf32> to vector<2x128xf32>
    %cst_108 = arith.constant dense<0.000000e+00> : vector<2x128xf32>
    %411 = tpu.matmul %400, %78, %cst_108 {dimension_numbers = #tpu.dot_dimension_numbers<[1], [0], [0], [1], [0, 0, 1, 1], [], []>} : vector<2x32xf32>, vector<32x128xf32>, vector<2x128xf32> -> vector<2x128xf32>
    %412 = arith.addf %410, %411 : vector<2x128xf32>
    %413 = vector.extract_strided_slice %77 {offsets = [6, 128], sizes = [2, 128], strides = [1, 1]} : vector<16x256xf32> to vector<2x128xf32>
    %cst_109 = arith.constant dense<0.000000e+00> : vector<2x128xf32>
    %414 = tpu.matmul %406, %79, %cst_109 {dimension_numbers = #tpu.dot_dimension_numbers<[1], [0], [0], [1], [0, 0, 1, 1], [], []>} : vector<2x32xf32>, vector<32x128xf32>, vector<2x128xf32> -> vector<2x128xf32>
    %415 = arith.addf %413, %414 : vector<2x128xf32>
    %416 = vector.extract_strided_slice %412 {offsets = [0, 0], sizes = [2, 32], strides = [1, 1]} : vector<2x128xf32> to vector<2x32xf32>
    %417 = arith.negf %416 : vector<2x32xf32>
    %418 = math.exp %417 : vector<2x32xf32>
    %cst_110 = arith.constant 1.000000e+00 : f32
    %419 = vector.broadcast %cst_110 : f32 to vector<2x32xf32>
    %420 = arith.addf %419, %418 : vector<2x32xf32>
    %421 = arith.divf %419, %420 : vector<2x32xf32>
    %422 = vector.extract_strided_slice %412 {offsets = [0, 32], sizes = [2, 32], strides = [1, 1]} : vector<2x128xf32> to vector<2x32xf32>
    %423 = arith.negf %422 : vector<2x32xf32>
    %424 = math.exp %423 : vector<2x32xf32>
    %cst_111 = arith.constant 1.000000e+00 : f32
    %425 = vector.broadcast %cst_111 : f32 to vector<2x32xf32>
    %426 = arith.addf %425, %424 : vector<2x32xf32>
    %427 = arith.divf %425, %426 : vector<2x32xf32>
    %428 = vector.extract_strided_slice %412 {offsets = [0, 64], sizes = [2, 32], strides = [1, 1]} : vector<2x128xf32> to vector<2x32xf32>
    %429 = math.tanh %428 : vector<2x32xf32>
    %430 = vector.extract_strided_slice %412 {offsets = [0, 96], sizes = [2, 32], strides = [1, 1]} : vector<2x128xf32> to vector<2x32xf32>
    %431 = arith.negf %430 : vector<2x32xf32>
    %432 = math.exp %431 : vector<2x32xf32>
    %cst_112 = arith.constant 1.000000e+00 : f32
    %433 = vector.broadcast %cst_112 : f32 to vector<2x32xf32>
    %434 = arith.addf %433, %432 : vector<2x32xf32>
    %435 = arith.divf %433, %434 : vector<2x32xf32>
    %436 = arith.mulf %427, %403 : vector<2x32xf32>
    %437 = arith.mulf %421, %429 : vector<2x32xf32>
    %438 = arith.addf %436, %437 : vector<2x32xf32>
    %439 = math.tanh %438 : vector<2x32xf32>
    %440 = arith.mulf %435, %439 : vector<2x32xf32>
    %441 = vector.extract_strided_slice %415 {offsets = [0, 0], sizes = [2, 32], strides = [1, 1]} : vector<2x128xf32> to vector<2x32xf32>
    %442 = arith.negf %441 : vector<2x32xf32>
    %443 = math.exp %442 : vector<2x32xf32>
    %cst_113 = arith.constant 1.000000e+00 : f32
    %444 = vector.broadcast %cst_113 : f32 to vector<2x32xf32>
    %445 = arith.addf %444, %443 : vector<2x32xf32>
    %446 = arith.divf %444, %445 : vector<2x32xf32>
    %447 = vector.extract_strided_slice %415 {offsets = [0, 32], sizes = [2, 32], strides = [1, 1]} : vector<2x128xf32> to vector<2x32xf32>
    %448 = arith.negf %447 : vector<2x32xf32>
    %449 = math.exp %448 : vector<2x32xf32>
    %cst_114 = arith.constant 1.000000e+00 : f32
    %450 = vector.broadcast %cst_114 : f32 to vector<2x32xf32>
    %451 = arith.addf %450, %449 : vector<2x32xf32>
    %452 = arith.divf %450, %451 : vector<2x32xf32>
    %453 = vector.extract_strided_slice %415 {offsets = [0, 64], sizes = [2, 32], strides = [1, 1]} : vector<2x128xf32> to vector<2x32xf32>
    %454 = math.tanh %453 : vector<2x32xf32>
    %455 = vector.extract_strided_slice %415 {offsets = [0, 96], sizes = [2, 32], strides = [1, 1]} : vector<2x128xf32> to vector<2x32xf32>
    %456 = arith.negf %455 : vector<2x32xf32>
    %457 = math.exp %456 : vector<2x32xf32>
    %cst_115 = arith.constant 1.000000e+00 : f32
    %458 = vector.broadcast %cst_115 : f32 to vector<2x32xf32>
    %459 = arith.addf %458, %457 : vector<2x32xf32>
    %460 = arith.divf %458, %459 : vector<2x32xf32>
    %461 = arith.mulf %452, %409 : vector<2x32xf32>
    %462 = arith.mulf %446, %454 : vector<2x32xf32>
    %463 = arith.addf %461, %462 : vector<2x32xf32>
    %464 = math.tanh %463 : vector<2x32xf32>
    %465 = arith.mulf %460, %464 : vector<2x32xf32>
    %c4_i32_116 = arith.constant 4 : i32
    %466 = vector.broadcast %c4_i32_116 : i32 to vector<2x1xi32>
    %467 = arith.cmpi sgt, %80, %466 : vector<2x1xi32>
    %c3_i32_117 = arith.constant 3 : i32
    %468 = vector.broadcast %c3_i32_117 : i32 to vector<2x1xi32>
    %469 = arith.cmpi sgt, %80, %468 : vector<2x1xi32>
    %cst_118 = arith.constant 0.000000e+00 : f32
    %470 = vector.shape_cast %467 : vector<2x1xi1> to vector<2x1xi1>
    %471 = vector.broadcast %470 : vector<2x1xi1> to vector<2x32xi1>
    %472 = vector.broadcast %cst_118 : f32 to vector<2x32xf32>
    %473 = arith.select %471, %440, %472 : vector<2x32xi1>, vector<2x32xf32>
    %c8_119 = arith.constant 8 : index
    %c0_120 = arith.constant 0 : index
    %474 = vector.load %arg16[%c8_119, %c0_120] : memref<16x32xf32, #tpu.memory_space<vmem>>, vector<2x32xf32>
    tpu.vector_store %arg16[%c8_119, %c0_120], %473 {strides = array<i32>} : memref<16x32xf32, #tpu.memory_space<vmem>>, vector<2x32xf32>,
    %cst_121 = arith.constant 0.000000e+00 : f32
    %475 = vector.shape_cast %469 : vector<2x1xi1> to vector<2x1xi1>
    %476 = vector.broadcast %475 : vector<2x1xi1> to vector<2x32xi1>
    %477 = vector.broadcast %cst_121 : f32 to vector<2x32xf32>
    %478 = arith.select %476, %465, %477 : vector<2x32xi1>, vector<2x32xf32>
    %c6_122 = arith.constant 6 : index
    %c0_123 = arith.constant 0 : index
    %479 = vector.load %arg17[%c6_122, %c0_123] : memref<16x32xf32, #tpu.memory_space<vmem>>, vector<2x32xf32>
    tpu.vector_store %arg17[%c6_122, %c0_123], %478 {strides = array<i32>} : memref<16x32xf32, #tpu.memory_space<vmem>>, vector<2x32xf32>,
    %480 = vector.shape_cast %467 : vector<2x1xi1> to vector<2x1xi1>
    %481 = vector.broadcast %480 : vector<2x1xi1> to vector<2x32xi1>
    %482 = arith.select %481, %440, %400 : vector<2x32xi1>, vector<2x32xf32>
    %483 = vector.shape_cast %467 : vector<2x1xi1> to vector<2x1xi1>
    %484 = vector.broadcast %483 : vector<2x1xi1> to vector<2x32xi1>
    %485 = arith.select %484, %438, %403 : vector<2x32xi1>, vector<2x32xf32>
    %486 = vector.shape_cast %469 : vector<2x1xi1> to vector<2x1xi1>
    %487 = vector.broadcast %486 : vector<2x1xi1> to vector<2x32xi1>
    %488 = arith.select %487, %465, %406 : vector<2x32xi1>, vector<2x32xf32>
    %489 = vector.shape_cast %469 : vector<2x1xi1> to vector<2x1xi1>
    %490 = vector.broadcast %489 : vector<2x1xi1> to vector<2x32xi1>
    %491 = arith.select %490, %463, %409 : vector<2x32xi1>, vector<2x32xf32>
    %492 = vector.extract_strided_slice %77 {offsets = [10, 0], sizes = [2, 128], strides = [1, 1]} : vector<16x256xf32> to vector<2x128xf32>
    %cst_124 = arith.constant dense<0.000000e+00> : vector<2x128xf32>
    %493 = tpu.matmul %482, %78, %cst_124 {dimension_numbers = #tpu.dot_dimension_numbers<[1], [0], [0], [1], [0, 0, 1, 1], [], []>} : vector<2x32xf32>, vector<32x128xf32>, vector<2x128xf32> -> vector<2x128xf32>
    %494 = arith.addf %492, %493 : vector<2x128xf32>
    %495 = vector.extract_strided_slice %77 {offsets = [4, 128], sizes = [2, 128], strides = [1, 1]} : vector<16x256xf32> to vector<2x128xf32>
    %cst_125 = arith.constant dense<0.000000e+00> : vector<2x128xf32>
    %496 = tpu.matmul %488, %79, %cst_125 {dimension_numbers = #tpu.dot_dimension_numbers<[1], [0], [0], [1], [0, 0, 1, 1], [], []>} : vector<2x32xf32>, vector<32x128xf32>, vector<2x128xf32> -> vector<2x128xf32>
    %497 = arith.addf %495, %496 : vector<2x128xf32>
    %498 = vector.extract_strided_slice %494 {offsets = [0, 0], sizes = [2, 32], strides = [1, 1]} : vector<2x128xf32> to vector<2x32xf32>
    %499 = arith.negf %498 : vector<2x32xf32>
    %500 = math.exp %499 : vector<2x32xf32>
    %cst_126 = arith.constant 1.000000e+00 : f32
    %501 = vector.broadcast %cst_126 : f32 to vector<2x32xf32>
    %502 = arith.addf %501, %500 : vector<2x32xf32>
    %503 = arith.divf %501, %502 : vector<2x32xf32>
    %504 = vector.extract_strided_slice %494 {offsets = [0, 32], sizes = [2, 32], strides = [1, 1]} : vector<2x128xf32> to vector<2x32xf32>
    %505 = arith.negf %504 : vector<2x32xf32>
    %506 = math.exp %505 : vector<2x32xf32>
    %cst_127 = arith.constant 1.000000e+00 : f32
    %507 = vector.broadcast %cst_127 : f32 to vector<2x32xf32>
    %508 = arith.addf %507, %506 : vector<2x32xf32>
    %509 = arith.divf %507, %508 : vector<2x32xf32>
    %510 = vector.extract_strided_slice %494 {offsets = [0, 64], sizes = [2, 32], strides = [1, 1]} : vector<2x128xf32> to vector<2x32xf32>
    %511 = math.tanh %510 : vector<2x32xf32>
    %512 = vector.extract_strided_slice %494 {offsets = [0, 96], sizes = [2, 32], strides = [1, 1]} : vector<2x128xf32> to vector<2x32xf32>
    %513 = arith.negf %512 : vector<2x32xf32>
    %514 = math.exp %513 : vector<2x32xf32>
    %cst_128 = arith.constant 1.000000e+00 : f32
    %515 = vector.broadcast %cst_128 : f32 to vector<2x32xf32>
    %516 = arith.addf %515, %514 : vector<2x32xf32>
    %517 = arith.divf %515, %516 : vector<2x32xf32>
    %518 = arith.mulf %509, %485 : vector<2x32xf32>
    %519 = arith.mulf %503, %511 : vector<2x32xf32>
    %520 = arith.addf %518, %519 : vector<2x32xf32>
    %521 = math.tanh %520 : vector<2x32xf32>
    %522 = arith.mulf %517, %521 : vector<2x32xf32>
    %523 = vector.extract_strided_slice %497 {offsets = [0, 0], sizes = [2, 32], strides = [1, 1]} : vector<2x128xf32> to vector<2x32xf32>
    %524 = arith.negf %523 : vector<2x32xf32>
    %525 = math.exp %524 : vector<2x32xf32>
    %cst_129 = arith.constant 1.000000e+00 : f32
    %526 = vector.broadcast %cst_129 : f32 to vector<2x32xf32>
    %527 = arith.addf %526, %525 : vector<2x32xf32>
    %528 = arith.divf %526, %527 : vector<2x32xf32>
    %529 = vector.extract_strided_slice %497 {offsets = [0, 32], sizes = [2, 32], strides = [1, 1]} : vector<2x128xf32> to vector<2x32xf32>
    %530 = arith.negf %529 : vector<2x32xf32>
    %531 = math.exp %530 : vector<2x32xf32>
    %cst_130 = arith.constant 1.000000e+00 : f32
    %532 = vector.broadcast %cst_130 : f32 to vector<2x32xf32>
    %533 = arith.addf %532, %531 : vector<2x32xf32>
    %534 = arith.divf %532, %533 : vector<2x32xf32>
    %535 = vector.extract_strided_slice %497 {offsets = [0, 64], sizes = [2, 32], strides = [1, 1]} : vector<2x128xf32> to vector<2x32xf32>
    %536 = math.tanh %535 : vector<2x32xf32>
    %537 = vector.extract_strided_slice %497 {offsets = [0, 96], sizes = [2, 32], strides = [1, 1]} : vector<2x128xf32> to vector<2x32xf32>
    %538 = arith.negf %537 : vector<2x32xf32>
    %539 = math.exp %538 : vector<2x32xf32>
    %cst_131 = arith.constant 1.000000e+00 : f32
    %540 = vector.broadcast %cst_131 : f32 to vector<2x32xf32>
    %541 = arith.addf %540, %539 : vector<2x32xf32>
    %542 = arith.divf %540, %541 : vector<2x32xf32>
    %543 = arith.mulf %534, %491 : vector<2x32xf32>
    %544 = arith.mulf %528, %536 : vector<2x32xf32>
    %545 = arith.addf %543, %544 : vector<2x32xf32>
    %546 = math.tanh %545 : vector<2x32xf32>
    %547 = arith.mulf %542, %546 : vector<2x32xf32>
    %c5_i32_132 = arith.constant 5 : i32
    %548 = vector.broadcast %c5_i32_132 : i32 to vector<2x1xi32>
    %549 = arith.cmpi sgt, %80, %548 : vector<2x1xi32>
    %c2_i32_133 = arith.constant 2 : i32
    %550 = vector.broadcast %c2_i32_133 : i32 to vector<2x1xi32>
    %551 = arith.cmpi sgt, %80, %550 : vector<2x1xi32>
    %cst_134 = arith.constant 0.000000e+00 : f32
    %552 = vector.shape_cast %549 : vector<2x1xi1> to vector<2x1xi1>
    %553 = vector.broadcast %552 : vector<2x1xi1> to vector<2x32xi1>
    %554 = vector.broadcast %cst_134 : f32 to vector<2x32xf32>
    %555 = arith.select %553, %522, %554 : vector<2x32xi1>, vector<2x32xf32>
    %c10_135 = arith.constant 10 : index
    %c0_136 = arith.constant 0 : index
    %556 = vector.load %arg16[%c10_135, %c0_136] : memref<16x32xf32, #tpu.memory_space<vmem>>, vector<2x32xf32>
    tpu.vector_store %arg16[%c10_135, %c0_136], %555 {strides = array<i32>} : memref<16x32xf32, #tpu.memory_space<vmem>>, vector<2x32xf32>,
    %cst_137 = arith.constant 0.000000e+00 : f32
    %557 = vector.shape_cast %551 : vector<2x1xi1> to vector<2x1xi1>
    %558 = vector.broadcast %557 : vector<2x1xi1> to vector<2x32xi1>
    %559 = vector.broadcast %cst_137 : f32 to vector<2x32xf32>
    %560 = arith.select %558, %547, %559 : vector<2x32xi1>, vector<2x32xf32>
    %c4_138 = arith.constant 4 : index
    %c0_139 = arith.constant 0 : index
    %561 = vector.load %arg17[%c4_138, %c0_139] : memref<16x32xf32, #tpu.memory_space<vmem>>, vector<2x32xf32>
    tpu.vector_store %arg17[%c4_138, %c0_139], %560 {strides = array<i32>} : memref<16x32xf32, #tpu.memory_space<vmem>>, vector<2x32xf32>,
    %562 = vector.shape_cast %549 : vector<2x1xi1> to vector<2x1xi1>
    %563 = vector.broadcast %562 : vector<2x1xi1> to vector<2x32xi1>
    %564 = arith.select %563, %522, %482 : vector<2x32xi1>, vector<2x32xf32>
    %565 = vector.shape_cast %549 : vector<2x1xi1> to vector<2x1xi1>
    %566 = vector.broadcast %565 : vector<2x1xi1> to vector<2x32xi1>
    %567 = arith.select %566, %520, %485 : vector<2x32xi1>, vector<2x32xf32>
    %568 = vector.shape_cast %551 : vector<2x1xi1> to vector<2x1xi1>
    %569 = vector.broadcast %568 : vector<2x1xi1> to vector<2x32xi1>
    %570 = arith.select %569, %547, %488 : vector<2x32xi1>, vector<2x32xf32>
    %571 = vector.shape_cast %551 : vector<2x1xi1> to vector<2x1xi1>
    %572 = vector.broadcast %571 : vector<2x1xi1> to vector<2x32xi1>
    %573 = arith.select %572, %545, %491 : vector<2x32xi1>, vector<2x32xf32>
    %574 = vector.extract_strided_slice %77 {offsets = [12, 0], sizes = [2, 128], strides = [1, 1]} : vector<16x256xf32> to vector<2x128xf32>
    %cst_140 = arith.constant dense<0.000000e+00> : vector<2x128xf32>
    %575 = tpu.matmul %564, %78, %cst_140 {dimension_numbers = #tpu.dot_dimension_numbers<[1], [0], [0], [1], [0, 0, 1, 1], [], []>} : vector<2x32xf32>, vector<32x128xf32>, vector<2x128xf32> -> vector<2x128xf32>
    %576 = arith.addf %574, %575 : vector<2x128xf32>
    %577 = vector.extract_strided_slice %77 {offsets = [2, 128], sizes = [2, 128], strides = [1, 1]} : vector<16x256xf32> to vector<2x128xf32>
    %cst_141 = arith.constant dense<0.000000e+00> : vector<2x128xf32>
    %578 = tpu.matmul %570, %79, %cst_141 {dimension_numbers = #tpu.dot_dimension_numbers<[1], [0], [0], [1], [0, 0, 1, 1], [], []>} : vector<2x32xf32>, vector<32x128xf32>, vector<2x128xf32> -> vector<2x128xf32>
    %579 = arith.addf %577, %578 : vector<2x128xf32>
    %580 = vector.extract_strided_slice %576 {offsets = [0, 0], sizes = [2, 32], strides = [1, 1]} : vector<2x128xf32> to vector<2x32xf32>
    %581 = arith.negf %580 : vector<2x32xf32>
    %582 = math.exp %581 : vector<2x32xf32>
    %cst_142 = arith.constant 1.000000e+00 : f32
    %583 = vector.broadcast %cst_142 : f32 to vector<2x32xf32>
    %584 = arith.addf %583, %582 : vector<2x32xf32>
    %585 = arith.divf %583, %584 : vector<2x32xf32>
    %586 = vector.extract_strided_slice %576 {offsets = [0, 32], sizes = [2, 32], strides = [1, 1]} : vector<2x128xf32> to vector<2x32xf32>
    %587 = arith.negf %586 : vector<2x32xf32>
    %588 = math.exp %587 : vector<2x32xf32>
    %cst_143 = arith.constant 1.000000e+00 : f32
    %589 = vector.broadcast %cst_143 : f32 to vector<2x32xf32>
    %590 = arith.addf %589, %588 : vector<2x32xf32>
    %591 = arith.divf %589, %590 : vector<2x32xf32>
    %592 = vector.extract_strided_slice %576 {offsets = [0, 64], sizes = [2, 32], strides = [1, 1]} : vector<2x128xf32> to vector<2x32xf32>
    %593 = math.tanh %592 : vector<2x32xf32>
    %594 = vector.extract_strided_slice %576 {offsets = [0, 96], sizes = [2, 32], strides = [1, 1]} : vector<2x128xf32> to vector<2x32xf32>
    %595 = arith.negf %594 : vector<2x32xf32>
    %596 = math.exp %595 : vector<2x32xf32>
    %cst_144 = arith.constant 1.000000e+00 : f32
    %597 = vector.broadcast %cst_144 : f32 to vector<2x32xf32>
    %598 = arith.addf %597, %596 : vector<2x32xf32>
    %599 = arith.divf %597, %598 : vector<2x32xf32>
    %600 = arith.mulf %591, %567 : vector<2x32xf32>
    %601 = arith.mulf %585, %593 : vector<2x32xf32>
    %602 = arith.addf %600, %601 : vector<2x32xf32>
    %603 = math.tanh %602 : vector<2x32xf32>
    %604 = arith.mulf %599, %603 : vector<2x32xf32>
    %605 = vector.extract_strided_slice %579 {offsets = [0, 0], sizes = [2, 32], strides = [1, 1]} : vector<2x128xf32> to vector<2x32xf32>
    %606 = arith.negf %605 : vector<2x32xf32>
    %607 = math.exp %606 : vector<2x32xf32>
    %cst_145 = arith.constant 1.000000e+00 : f32
    %608 = vector.broadcast %cst_145 : f32 to vector<2x32xf32>
    %609 = arith.addf %608, %607 : vector<2x32xf32>
    %610 = arith.divf %608, %609 : vector<2x32xf32>
    %611 = vector.extract_strided_slice %579 {offsets = [0, 32], sizes = [2, 32], strides = [1, 1]} : vector<2x128xf32> to vector<2x32xf32>
    %612 = arith.negf %611 : vector<2x32xf32>
    %613 = math.exp %612 : vector<2x32xf32>
    %cst_146 = arith.constant 1.000000e+00 : f32
    %614 = vector.broadcast %cst_146 : f32 to vector<2x32xf32>
    %615 = arith.addf %614, %613 : vector<2x32xf32>
    %616 = arith.divf %614, %615 : vector<2x32xf32>
    %617 = vector.extract_strided_slice %579 {offsets = [0, 64], sizes = [2, 32], strides = [1, 1]} : vector<2x128xf32> to vector<2x32xf32>
    %618 = math.tanh %617 : vector<2x32xf32>
    %619 = vector.extract_strided_slice %579 {offsets = [0, 96], sizes = [2, 32], strides = [1, 1]} : vector<2x128xf32> to vector<2x32xf32>
    %620 = arith.negf %619 : vector<2x32xf32>
    %621 = math.exp %620 : vector<2x32xf32>
    %cst_147 = arith.constant 1.000000e+00 : f32
    %622 = vector.broadcast %cst_147 : f32 to vector<2x32xf32>
    %623 = arith.addf %622, %621 : vector<2x32xf32>
    %624 = arith.divf %622, %623 : vector<2x32xf32>
    %625 = arith.mulf %616, %573 : vector<2x32xf32>
    %626 = arith.mulf %610, %618 : vector<2x32xf32>
    %627 = arith.addf %625, %626 : vector<2x32xf32>
    %628 = math.tanh %627 : vector<2x32xf32>
    %629 = arith.mulf %624, %628 : vector<2x32xf32>
    %c6_i32_148 = arith.constant 6 : i32
    %630 = vector.broadcast %c6_i32_148 : i32 to vector<2x1xi32>
    %631 = arith.cmpi sgt, %80, %630 : vector<2x1xi32>
    %c1_i32_149 = arith.constant 1 : i32
    %632 = vector.broadcast %c1_i32_149 : i32 to vector<2x1xi32>
    %633 = arith.cmpi sgt, %80, %632 : vector<2x1xi32>
    %cst_150 = arith.constant 0.000000e+00 : f32
    %634 = vector.shape_cast %631 : vector<2x1xi1> to vector<2x1xi1>
    %635 = vector.broadcast %634 : vector<2x1xi1> to vector<2x32xi1>
    %636 = vector.broadcast %cst_150 : f32 to vector<2x32xf32>
    %637 = arith.select %635, %604, %636 : vector<2x32xi1>, vector<2x32xf32>
    %c12_151 = arith.constant 12 : index
    %c0_152 = arith.constant 0 : index
    %638 = vector.load %arg16[%c12_151, %c0_152] : memref<16x32xf32, #tpu.memory_space<vmem>>, vector<2x32xf32>
    tpu.vector_store %arg16[%c12_151, %c0_152], %637 {strides = array<i32>} : memref<16x32xf32, #tpu.memory_space<vmem>>, vector<2x32xf32>,
    %cst_153 = arith.constant 0.000000e+00 : f32
    %639 = vector.shape_cast %633 : vector<2x1xi1> to vector<2x1xi1>
    %640 = vector.broadcast %639 : vector<2x1xi1> to vector<2x32xi1>
    %641 = vector.broadcast %cst_153 : f32 to vector<2x32xf32>
    %642 = arith.select %640, %629, %641 : vector<2x32xi1>, vector<2x32xf32>
    %c2_154 = arith.constant 2 : index
    %c0_155 = arith.constant 0 : index
    %643 = vector.load %arg17[%c2_154, %c0_155] : memref<16x32xf32, #tpu.memory_space<vmem>>, vector<2x32xf32>
    tpu.vector_store %arg17[%c2_154, %c0_155], %642 {strides = array<i32>} : memref<16x32xf32, #tpu.memory_space<vmem>>, vector<2x32xf32>,
    %644 = vector.shape_cast %631 : vector<2x1xi1> to vector<2x1xi1>
    %645 = vector.broadcast %644 : vector<2x1xi1> to vector<2x32xi1>
    %646 = arith.select %645, %604, %564 : vector<2x32xi1>, vector<2x32xf32>
    %647 = vector.shape_cast %631 : vector<2x1xi1> to vector<2x1xi1>
    %648 = vector.broadcast %647 : vector<2x1xi1> to vector<2x32xi1>
    %649 = arith.select %648, %602, %567 : vector<2x32xi1>, vector<2x32xf32>
    %650 = vector.shape_cast %633 : vector<2x1xi1> to vector<2x1xi1>
    %651 = vector.broadcast %650 : vector<2x1xi1> to vector<2x32xi1>
    %652 = arith.select %651, %629, %570 : vector<2x32xi1>, vector<2x32xf32>
    %653 = vector.shape_cast %633 : vector<2x1xi1> to vector<2x1xi1>
    %654 = vector.broadcast %653 : vector<2x1xi1> to vector<2x32xi1>
    %655 = arith.select %654, %627, %573 : vector<2x32xi1>, vector<2x32xf32>
    %656 = vector.extract_strided_slice %77 {offsets = [14, 0], sizes = [2, 128], strides = [1, 1]} : vector<16x256xf32> to vector<2x128xf32>
    %cst_156 = arith.constant dense<0.000000e+00> : vector<2x128xf32>
    %657 = tpu.matmul %646, %78, %cst_156 {dimension_numbers = #tpu.dot_dimension_numbers<[1], [0], [0], [1], [0, 0, 1, 1], [], []>} : vector<2x32xf32>, vector<32x128xf32>, vector<2x128xf32> -> vector<2x128xf32>
    %658 = arith.addf %656, %657 : vector<2x128xf32>
    %659 = vector.extract_strided_slice %77 {offsets = [0, 128], sizes = [2, 128], strides = [1, 1]} : vector<16x256xf32> to vector<2x128xf32>
    %cst_157 = arith.constant dense<0.000000e+00> : vector<2x128xf32>
    %660 = tpu.matmul %652, %79, %cst_157 {dimension_numbers = #tpu.dot_dimension_numbers<[1], [0], [0], [1], [0, 0, 1, 1], [], []>} : vector<2x32xf32>, vector<32x128xf32>, vector<2x128xf32> -> vector<2x128xf32>
    %661 = arith.addf %659, %660 : vector<2x128xf32>
    %662 = vector.extract_strided_slice %658 {offsets = [0, 0], sizes = [2, 32], strides = [1, 1]} : vector<2x128xf32> to vector<2x32xf32>
    %663 = arith.negf %662 : vector<2x32xf32>
    %664 = math.exp %663 : vector<2x32xf32>
    %cst_158 = arith.constant 1.000000e+00 : f32
    %665 = vector.broadcast %cst_158 : f32 to vector<2x32xf32>
    %666 = arith.addf %665, %664 : vector<2x32xf32>
    %667 = arith.divf %665, %666 : vector<2x32xf32>
    %668 = vector.extract_strided_slice %658 {offsets = [0, 32], sizes = [2, 32], strides = [1, 1]} : vector<2x128xf32> to vector<2x32xf32>
    %669 = arith.negf %668 : vector<2x32xf32>
    %670 = math.exp %669 : vector<2x32xf32>
    %cst_159 = arith.constant 1.000000e+00 : f32
    %671 = vector.broadcast %cst_159 : f32 to vector<2x32xf32>
    %672 = arith.addf %671, %670 : vector<2x32xf32>
    %673 = arith.divf %671, %672 : vector<2x32xf32>
    %674 = vector.extract_strided_slice %658 {offsets = [0, 64], sizes = [2, 32], strides = [1, 1]} : vector<2x128xf32> to vector<2x32xf32>
    %675 = math.tanh %674 : vector<2x32xf32>
    %676 = vector.extract_strided_slice %658 {offsets = [0, 96], sizes = [2, 32], strides = [1, 1]} : vector<2x128xf32> to vector<2x32xf32>
    %677 = arith.negf %676 : vector<2x32xf32>
    %678 = math.exp %677 : vector<2x32xf32>
    %cst_160 = arith.constant 1.000000e+00 : f32
    %679 = vector.broadcast %cst_160 : f32 to vector<2x32xf32>
    %680 = arith.addf %679, %678 : vector<2x32xf32>
    %681 = arith.divf %679, %680 : vector<2x32xf32>
    %682 = arith.mulf %673, %649 : vector<2x32xf32>
    %683 = arith.mulf %667, %675 : vector<2x32xf32>
    %684 = arith.addf %682, %683 : vector<2x32xf32>
    %685 = math.tanh %684 : vector<2x32xf32>
    %686 = arith.mulf %681, %685 : vector<2x32xf32>
    %687 = vector.extract_strided_slice %661 {offsets = [0, 0], sizes = [2, 32], strides = [1, 1]} : vector<2x128xf32> to vector<2x32xf32>
    %688 = arith.negf %687 : vector<2x32xf32>
    %689 = math.exp %688 : vector<2x32xf32>
    %cst_161 = arith.constant 1.000000e+00 : f32
    %690 = vector.broadcast %cst_161 : f32 to vector<2x32xf32>
    %691 = arith.addf %690, %689 : vector<2x32xf32>
    %692 = arith.divf %690, %691 : vector<2x32xf32>
    %693 = vector.extract_strided_slice %661 {offsets = [0, 32], sizes = [2, 32], strides = [1, 1]} : vector<2x128xf32> to vector<2x32xf32>
    %694 = arith.negf %693 : vector<2x32xf32>
    %695 = math.exp %694 : vector<2x32xf32>
    %cst_162 = arith.constant 1.000000e+00 : f32
    %696 = vector.broadcast %cst_162 : f32 to vector<2x32xf32>
    %697 = arith.addf %696, %695 : vector<2x32xf32>
    %698 = arith.divf %696, %697 : vector<2x32xf32>
    %699 = vector.extract_strided_slice %661 {offsets = [0, 64], sizes = [2, 32], strides = [1, 1]} : vector<2x128xf32> to vector<2x32xf32>
    %700 = math.tanh %699 : vector<2x32xf32>
    %701 = vector.extract_strided_slice %661 {offsets = [0, 96], sizes = [2, 32], strides = [1, 1]} : vector<2x128xf32> to vector<2x32xf32>
    %702 = arith.negf %701 : vector<2x32xf32>
    %703 = math.exp %702 : vector<2x32xf32>
    %cst_163 = arith.constant 1.000000e+00 : f32
    %704 = vector.broadcast %cst_163 : f32 to vector<2x32xf32>
    %705 = arith.addf %704, %703 : vector<2x32xf32>
    %706 = arith.divf %704, %705 : vector<2x32xf32>
    %707 = arith.mulf %698, %655 : vector<2x32xf32>
    %708 = arith.mulf %692, %700 : vector<2x32xf32>
    %709 = arith.addf %707, %708 : vector<2x32xf32>
    %710 = math.tanh %709 : vector<2x32xf32>
    %711 = arith.mulf %706, %710 : vector<2x32xf32>
    %c7_i32_164 = arith.constant 7 : i32
    %712 = vector.broadcast %c7_i32_164 : i32 to vector<2x1xi32>
    %713 = arith.cmpi sgt, %80, %712 : vector<2x1xi32>
    %c0_i32_165 = arith.constant 0 : i32
    %714 = vector.broadcast %c0_i32_165 : i32 to vector<2x1xi32>
    %715 = arith.cmpi sgt, %80, %714 : vector<2x1xi32>
    %cst_166 = arith.constant 0.000000e+00 : f32
    %716 = vector.shape_cast %713 : vector<2x1xi1> to vector<2x1xi1>
    %717 = vector.broadcast %716 : vector<2x1xi1> to vector<2x32xi1>
    %718 = vector.broadcast %cst_166 : f32 to vector<2x32xf32>
    %719 = arith.select %717, %686, %718 : vector<2x32xi1>, vector<2x32xf32>
    %c14_167 = arith.constant 14 : index
    %c0_168 = arith.constant 0 : index
    %720 = vector.load %arg16[%c14_167, %c0_168] : memref<16x32xf32, #tpu.memory_space<vmem>>, vector<2x32xf32>
    tpu.vector_store %arg16[%c14_167, %c0_168], %719 {strides = array<i32>} : memref<16x32xf32, #tpu.memory_space<vmem>>, vector<2x32xf32>,
    %cst_169 = arith.constant 0.000000e+00 : f32
    %721 = vector.shape_cast %715 : vector<2x1xi1> to vector<2x1xi1>
    %722 = vector.broadcast %721 : vector<2x1xi1> to vector<2x32xi1>
    %723 = vector.broadcast %cst_169 : f32 to vector<2x32xf32>
    %724 = arith.select %722, %711, %723 : vector<2x32xi1>, vector<2x32xf32>
    %c0_170 = arith.constant 0 : index
    %c0_171 = arith.constant 0 : index
    %725 = vector.load %arg17[%c0_170, %c0_171] : memref<16x32xf32, #tpu.memory_space<vmem>>, vector<2x32xf32>
    tpu.vector_store %arg17[%c0_170, %c0_171], %724 {strides = array<i32>} : memref<16x32xf32, #tpu.memory_space<vmem>>, vector<2x32xf32>,
    %c0_172 = arith.constant 0 : index
    %c0_173 = arith.constant 0 : index
    %726 = vector.load %arg16[%c0_172, %c0_173] : memref<16x32xf32, #tpu.memory_space<vmem>>, vector<16x32xf32>
    %c0_174 = arith.constant 0 : index
    %c0_175 = arith.constant 0 : index
    %727 = vector.load %arg17[%c0_174, %c0_175] : memref<16x32xf32, #tpu.memory_space<vmem>>, vector<16x32xf32>
    %c0_176 = arith.constant 0 : index
    %c0_177 = arith.constant 0 : index
    %728 = vector.load %arg12[%c0_176, %c0_177] : memref<32x32xf32, #tpu.memory_space<vmem>>, vector<32x32xf32>
    %cst_178 = arith.constant dense<0.000000e+00> : vector<16x32xf32>
    %729 = tpu.matmul %726, %728, %cst_178 {dimension_numbers = #tpu.dot_dimension_numbers<[1], [0], [0], [1], [0, 0, 1, 1], [], []>} : vector<16x32xf32>, vector<32x32xf32>, vector<16x32xf32> -> vector<16x32xf32>
    %c0_179 = arith.constant 0 : index
    %c0_180 = arith.constant 0 : index
    %730 = vector.load %arg13[%c0_179, %c0_180] : memref<32x32xf32, #tpu.memory_space<vmem>>, vector<32x32xf32>
    %cst_181 = arith.constant dense<0.000000e+00> : vector<16x32xf32>
    %731 = tpu.matmul %727, %730, %cst_181 {dimension_numbers = #tpu.dot_dimension_numbers<[1], [0], [0], [1], [0, 0, 1, 1], [], []>} : vector<16x32xf32>, vector<32x32xf32>, vector<16x32xf32> -> vector<16x32xf32>
    %732 = arith.addf %729, %731 : vector<16x32xf32>
    %c0_182 = arith.constant 0 : index
    %c0_183 = arith.constant 0 : index
    %733 = vector.load %arg14[%c0_182, %c0_183] : memref<1x32xf32, #tpu.memory_space<vmem>>, vector<1x32xf32>
    %734 = vector.broadcast %733 : vector<1x32xf32> to vector<16x32xf32>
    %735 = arith.addf %732, %734 : vector<16x32xf32>
    %c0_184 = arith.constant 0 : index
    %c0_185 = arith.constant 0 : index
    %736 = vector.load %arg15[%c0_184, %c0_185] : memref<16x32xf32, #tpu.memory_space<vmem>>, vector<16x32xf32>
    tpu.vector_store %arg15[%c0_184, %c0_185], %735 {strides = array<i32>} : memref<16x32xf32, #tpu.memory_space<vmem>>, vector<16x32xf32>,
    return
  }
}

</mosaic_0001>

<bundles_post_ra>
// kernel: token_encoder_forward.1
= control target key start
LH: loop header
LB: loop body
LE: loop exit
PB: predicated region body
PF: predicated region fallthrough
CT: control target
= control target key end

     0   :  { %vm65_vm0 = vcmask 392192   ;;  %vm149_vm1 = vcmask 1041408   ;;  %s3496_s26 = smov 32   ;;  %vm156_vm2 = vcmask 1045504   ;;  %vm175_vm3 = vcmask 261120   ;;  %s4475_s2 = inlined_call_operand.vmem [shape: f32[48,32], index: 2, kind: input, shape index: {}]   ;;  %s4476_s0 = inlined_call_operand.vmem [shape: f32[16,48], index: 0, kind: input, shape index: {}]   ;;  %s4477_s4 = inlined_call_operand.vmem [shape: f32[3,96,32], index: 4, kind: input, shape index: {}]   ;;  %s4478_s3 = inlined_call_operand.vmem [shape: f32[1,32], index: 3, kind: input, shape index: {}]   ;;  %s4479_s5 = inlined_call_operand.vmem [shape: f32[3,1,32], index: 5, kind: input, shape index: {}]   ;;  %s4480_s6 = inlined_call_operand.vmem [shape: f32[3,1,32], index: 6, kind: input, shape index: {}]   ;;  %s4481_s7 = inlined_call_operand.vmem [shape: f32[3,1,32], index: 7, kind: input, shape index: {}]   ;;  %s4482_s8 = inlined_call_operand.vmem [shape: f32[32,256], index: 8, kind: input, shape index: {}]   ;;  %s4483_s11 = inlined_call_operand.vmem [shape: f32[32,128], index: 11, kind: input, shape index: {}]   ;;  %s4484_s10 = inlined_call_operand.vmem [shape: f32[32,128], index: 10, kind: input, shape index: {}]   ;;  %s4485_s9 = inlined_call_operand.vmem [shape: f32[1,256], index: 9, kind: input, shape index: {}]   ;;  %s4486_s1 = inlined_call_operand.vmem [shape: s32[2,1], index: 1, kind: input, shape index: {}]   ;;  %s4487_s13 = inlined_call_operand.vmem [shape: f32[32,32], index: 13, kind: input, shape index: {}]   ;;  %s4488_s12 = inlined_call_operand.vmem [shape: f32[32,32], index: 12, kind: input, shape index: {}]   ;;  %s4489_s14 = inlined_call_operand.vmem [shape: f32[1,32], index: 14, kind: input, shape index: {}]   ;;  %s4490_s15 = inlined_call_operand.vmem [shape: f32[16,32], index: 15, kind: output, shape index: {}]  }
   0x1   :  { %v57_v0 = vld [vmem:[%s4475_s2 + $0x28] sm:$0xff]  ;;  %v56_v1 = vld [vmem:[%s4475_s2 + $0x20] sm:$0xff]  ;;  %v55_v2 = vld [vmem:[%s4475_s2 + $0x18] sm:$0xff]  ;;  %vm178_vm4 = vcmask 523264   ;;  %vm200_vm5 = vcmask 785408   ;;  %vm3499_vm6 = vmmov 0  }
   0x2   :  { %3058 = vmatprep.subr.mxu0 %v57_v0  ;;  %v50_v3 = vld [vmem:[%s4476_s0] sm:$0xff]  ;;  %v54_v4 = vld [vmem:[%s4475_s2 + $0x10] sm:$0xff]  ;;  %v53_v5 = vld [vmem:[%s4475_s2 + $0x8] sm:$0xff]  ;;  %vm930_vm10 = vcmask 254976  }
   0x3   :  { %3059 = vmatpush3.msra.mxu0 %v57_v0  ;;  %3070 = vmatprep.mubr.msk.f32.mxu0 %vm65_vm0, %v50_v3  ;;  %v52_v6 = vld [vmem:[%s4475_s2] sm:$0xff]  ;;  %v51_v7 = vld [vmem:[%s4476_s0 + $0x8] sm:$0xff]  ;;  %v192_v8 = vld [vmem:[%s4477_s4 + $0x58] sm:$0xff] }
   0x4   :  { %3060 = vmatprep.subr.mxu0 %v56_v1  ;;  %v191_v9 = vld [vmem:[%s4477_s4 + $0x50] sm:$0xff]  ;;  %3073 = vmatprep.subr.mxu1 %v192_v8  ;;  %v190_v10 = vld [vmem:[%s4477_s4 + $0x48] sm:$0xff]  ;;  %v189_v11 = vld [vmem:[%s4477_s4 + $0x40] sm:$0xff] }
   0x5   :  { %3061 = vmatpush3.msra.mxu0 %v56_v1  ;;  %3074 = vmatpush3.msra.mxu1 %v192_v8  ;;  %v188_v12 = vld [vmem:[%s4477_s4 + $0x38] sm:$0xff]  ;;  %v187_v13 = vld [vmem:[%s4477_s4 + $0x30] sm:$0xff]  ;;  %v186_v14 = vld [vmem:[%s4477_s4 + $0x28] sm:$0xff] }
   0x6   :  { %3062 = vmatprep.subr.mxu0 %v55_v2  ;;  %3075 = vmatprep.subr.mxu1 %v191_v9  ;;  %v185_v15 = vld [vmem:[%s4477_s4 + $0x20] sm:$0xff]  ;;  %v184_v16 = vld [vmem:[%s4477_s4 + $0x18] sm:$0xff]  ;;  %v183_v17 = vld [vmem:[%s4477_s4 + $0x10] sm:$0xff] }
   0x7   :  { %3063 = vmatpush3.msra.mxu0 %v55_v2  ;;  %3076 = vmatpush3.msra.mxu1 %v191_v9  ;;  %v182_v18 = vld [vmem:[%s4477_s4 + $0x8] sm:$0xff]  ;;  %v181_v19 = vld [vmem:[%s4477_s4] sm:$0xff]  ;;  %v2850_v41 = vld [vmem:[%s4477_s4 + $0xb8] sm:$0xff] }
   0x8   :  { %3064 = vmatprep.subr.mxu0 %v54_v4  ;;  %3077 = vmatprep.subr.mxu1 %v190_v10  ;;  %v2831_v20 = vld [vmem:[%s4478_s3] ss:$0 sm:$0xff]  ;;  %s3497_s3 = smov 64   ;;  %v2849_v42 = vld [vmem:[%s4477_s4 + $0xb0] sm:$0xff]  ;;  %v2848_v43 = vld [vmem:[%s4477_s4 + $0xa8] sm:$0xff] }
   0x9   :  { %3065 = vmatpush3.msra.mxu0 %v54_v4  ;;  %3078 = vmatpush3.msra.mxu1 %v190_v10  ;;  %v2847_v44 = vld [vmem:[%s4477_s4 + $0xa0] sm:$0xff]  ;;  %v2846_v45 = vld [vmem:[%s4477_s4 + $0x98] sm:$0xff]  ;;  %v2845_v46 = vld [vmem:[%s4477_s4 + $0x90] sm:$0xff] }
   0xa   :  { %3066 = vmatprep.subr.mxu0 %v53_v5  ;;  %3079 = vmatprep.subr.mxu1 %v189_v11  ;;  %v2844_v47 = vld [vmem:[%s4477_s4 + $0x88] sm:$0xff]  ;;  %v2843_v48 = vld [vmem:[%s4477_s4 + $0x80] sm:$0xff]  ;;  %v2842_v49 = vld [vmem:[%s4477_s4 + $0x78] sm:$0xff] }
   0xb   :  { %3067 = vmatpush3.msra.mxu0 %v53_v5  ;;  %3080 = vmatpush3.msra.mxu1 %v189_v11  ;;  %v2841_v50 = vld [vmem:[%s4477_s4 + $0x70] sm:$0xff]  ;;  %v2834_v51 = vld [vmem:[%s4479_s5] ss:$0 sm:$0xff]  ;;  %v2840_v52 = vld [vmem:[%s4477_s4 + $0x68] sm:$0xff] }
   0xc   :  { %3068 = vmatprep.subr.mxu0 %v52_v6  ;;  %3081 = vmatprep.subr.mxu1 %v188_v12  ;;  %v2837_v54 = vld [vmem:[%s4480_s6] ss:$0 sm:$0xff] }
   0xd   :  { %3069 = vmatpush3.msra.mxu0 %v52_v6  ;;  %3082 = vmatpush3.msra.mxu1 %v188_v12  ;;  %v2839_v56 = vld [vmem:[%s4477_s4 + $0x60] sm:$0xff] }
   0xe   :  { %3071 = vmatmul.mubr.msk.f32.vlgmr.msra.gmra.mxu0 %vm65_vm0, %v51_v7  ;;  %3083 = vmatprep.subr.mxu1 %v187_v13  ;;  %v2838_v58 = vld [vmem:[%s4481_s7] ss:$0 sm:$0xff] }
   0xf   :  { %3084 = vmatpush3.msra.mxu1 %v187_v13  ;;  %3100 = vmatprep.subr.mxu0 %v2850_v41 }
  0x10   :  { %3085 = vmatprep.subr.mxu1 %v186_v14  ;;  %3101 = vmatpush3.msra.mxu0 %v2850_v41 }
  0x11   :  { %3086 = vmatpush3.msra.mxu1 %v186_v14  ;;  %3102 = vmatprep.subr.mxu0 %v2849_v42 }
  0x12   :  { %3087 = vmatprep.subr.mxu1 %v185_v15  ;;  %3103 = vmatpush3.msra.mxu0 %v2849_v42 }
  0x13   :  { %3088 = vmatpush3.msra.mxu1 %v185_v15  ;;  %3104 = vmatprep.subr.mxu0 %v2848_v43 }
  0x14   :  { %3089 = vmatprep.subr.mxu1 %v184_v16  ;;  %3105 = vmatpush3.msra.mxu0 %v2848_v43 }
  0x15   :  { %3090 = vmatpush3.msra.mxu1 %v184_v16  ;;  %3106 = vmatprep.subr.mxu0 %v2847_v44 }
  0x16   :  { %3091 = vmatprep.subr.mxu1 %v183_v17  ;;  %3107 = vmatpush3.msra.mxu0 %v2847_v44 }
  0x17   :  { %3092 = vmatpush3.msra.mxu1 %v183_v17  ;;  %3108 = vmatprep.subr.mxu0 %v2846_v45 }
  0x18   :  { %3093 = vmatprep.subr.mxu1 %v182_v18  ;;  %3109 = vmatpush3.msra.mxu0 %v2846_v45 }
  0x19   :  { %3094 = vmatpush3.msra.mxu1 %v182_v18  ;;  %3110 = vmatprep.subr.mxu0 %v2845_v46  ;;  %v2870_v18 = vld [vmem:[%s4477_s4 + $0x118] sm:$0xff] }
  0x1a   :  { %3095 = vmatprep.subr.mxu1 %v181_v19  ;;  %3111 = vmatpush3.msra.mxu0 %v2845_v46 }
  0x1b   :  { %3096 = vmatpush3.msra.mxu1 %v181_v19  ;;  %3112 = vmatprep.subr.mxu0 %v2844_v47  ;;  %v2869_v19 = vld [vmem:[%s4477_s4 + $0x110] sm:$0xff] }
  0x1c   :  { %3113 = vmatpush3.msra.mxu0 %v2844_v47  ;;  %3127 = vmatprep.subr.mxu1 %v2870_v18 }
  0x1d   :  { %3114 = vmatprep.subr.mxu0 %v2843_v48 }
  0x1e   :  { %3115 = vmatpush3.msra.mxu0 %v2843_v48 }
  0x1f   :  { %3116 = vmatprep.subr.mxu0 %v2842_v49 }
  0x20   :  { %3117 = vmatpush3.msra.mxu0 %v2842_v49 }
  0x21   :  { %3118 = vmatprep.subr.mxu0 %v2841_v50 }
  0x22   :  { %3119 = vmatpush3.msra.mxu0 %v2841_v50 }
  0x23   :  { %3120 = vmatprep.subr.mxu0 %v2840_v52 }
  0x24   :  { %3121 = vmatpush3.msra.mxu0 %v2840_v52 }
  0x25   :  { %3122 = vmatprep.subr.mxu0 %v2839_v56 }
  0x26   :  { %3123 = vmatpush3.msra.mxu0 %v2839_v56 }
  0xce   :  { %v3072_v21 = vpop.f32.mrf.mxu0 }
  0xcf   :  { %v144_v22 = vadd.f32 %v3072_v21, %v2831_v20  ;;  %v2867_v21 = vld [vmem:[%s4477_s4 + $0x100] sm:$0xff] }
  0xd0   :  { %v138_v23 = vpop.f32.mrf.mxu0 }
  0xd1   :  { %v139_v24 = vadd.f32 %v2831_v20, %v138_v23  ;;  %v151_v25 = vrot.slane %v144_v22, 6  ;;  %v158_v28 = vrot.slane %v144_v22, 2  ;;  %v2868_v20 = vld [vmem:[%s4477_s4 + $0x108] sm:$0xff]  ;;  %v2865_v23 = vld [vmem:[%s4477_s4 + $0xf0] sm:$0xff] }
  0xd3   :  { %v150_v26 = vrot.slane %v139_v24, 6  ;;  %162 = vrot.lane.b32.xlu0 %v139_v24, %s3496_s26  ;;  %v157_v27 = vrot.slane %v139_v24, 2  ;;  %v161_v31 = vsel %vm156_vm2, %v158_v28, 0.0  ;;  %v2864_v24 = vld [vmem:[%s4477_s4 + $0xe8] sm:$0xff] }
  0xd5   :  { %v159_v29 = vsel %vm156_vm2, %v157_v27, %v158_v28  ;;  %v152_v30 = vsel %vm149_vm1, %v150_v26, %v151_v25  ;;  %v155_v33 = vsel %vm149_vm1, 0.0, %v150_v26  ;;  %v2863_v25 = vld [vmem:[%s4477_s4 + $0xe0] sm:$0xff]  ;;  %v2862_v26 = vld [vmem:[%s4477_s4 + $0xd8] sm:$0xff]  ;;  %v2861_v27 = vld [vmem:[%s4477_s4 + $0xd0] sm:$0xff] }
  0xd6   :  { %169 = vrot.lane.b32.xlu1 %v159_v29, %s3497_s3  ;;  %v2852_v28 = vld [vmem:[%s4479_s5 + $0x1] ss:$0 sm:$0xff]  ;;  %v2860_v29 = vld [vmem:[%s4477_s4 + $0xc8] sm:$0xff] }
  0xd7   :  { %164 = vrot.lane.b32.xlu0 %v144_v22, %s3496_s26  ;;  %v2866_v22 = vld [vmem:[%s4477_s4 + $0xf8] sm:$0xff] }
  0xda   :  { %171 = vrot.lane.b32.xlu1 %v161_v31, %s3497_s3  ;;  %v2856_v31 = vld [vmem:[%s4480_s6 + $0x1] ss:$0 sm:$0xff] }
 0x145   :  { %v163_v32 = vpop.permute.xlu0 %162 }
 0x146   :  { %v176_v34 = vsel %vm175_vm3, %v155_v33, %v163_v32  ;;  %v2859_v33 = vld [vmem:[%s4477_s4 + $0xc0] sm:$0xff] }
 0x148   :  { %v170_v35 = vpop.permute.xlu1 %169 }
 0x149   :  { %v165_v36 = vpop.permute.xlu0 %164  ;;  %v179_v37 = vsel %vm178_vm4, %v176_v34, %v170_v35  ;;  %v2858_v35 = vld [vmem:[%s4481_s7 + $0x1] ss:$0 sm:$0xff] }
 0x14a   :  { %3097 = vmatprep.mubr.msk.f32.mxu1 %vm200_vm5, %v179_v37  ;;  %v177_v38 = vsel %vm175_vm3, %v152_v30, %v165_v36 }
 0x14c   :  { %v172_v39 = vpop.permute.xlu1 %171 }
 0x14d   :  { %v180_v40 = vsel %vm178_vm4, %v177_v38, %v172_v39 }
 0x14e   :  { %3098 = vmatmul.mubr.msk.f32.vlgmr.msra.gmra.mxu1 %vm200_vm5, %v180_v40 }
 0x14f   :  { %3128 = vmatpush3.msra.mxu1 %v2870_v18 }
 0x150   :  { %3129 = vmatprep.subr.mxu1 %v2869_v19 }
 0x151   :  { %3130 = vmatpush3.msra.mxu1 %v2869_v19 }
 0x152   :  { %3131 = vmatprep.subr.mxu1 %v2868_v20 }
 0x153   :  { %3132 = vmatpush3.msra.mxu1 %v2868_v20  ;;  %v3859_v20 = vld [vmem:[%s4484_s10 + $0x18] sm:$0xff] }
 0x154   :  { %3133 = vmatprep.subr.mxu1 %v2867_v21 }
 0x155   :  { %3134 = vmatpush3.msra.mxu1 %v2867_v21  ;;  %v3865_v21 = vld [vmem:[%s4484_s10 + $0x10] sm:$0xff] }
 0x156   :  { %3135 = vmatprep.subr.mxu1 %v2866_v22 }
 0x157   :  { %3136 = vmatpush3.msra.mxu1 %v2866_v22 }
 0x158   :  { %3137 = vmatprep.subr.mxu1 %v2865_v23 }
 0x159   :  { %3138 = vmatpush3.msra.mxu1 %v2865_v23  ;;  %v3873_v23 = vld [vmem:[%s4484_s10 + $0x8] sm:$0xff] }
 0x15a   :  { %3139 = vmatprep.subr.mxu1 %v2864_v24 }
 0x15b   :  { %3140 = vmatpush3.msra.mxu1 %v2864_v24  ;;  %v3881_v24 = vld [vmem:[%s4484_s10] sm:$0xff] }
 0x15c   :  { %3141 = vmatprep.subr.mxu1 %v2863_v25 }
 0x15d   :  { %3142 = vmatpush3.msra.mxu1 %v2863_v25 }
 0x15e   :  { %3143 = vmatprep.subr.mxu1 %v2862_v26 }
 0x15f   :  { %3144 = vmatpush3.msra.mxu1 %v2862_v26 }
 0x160   :  { %3145 = vmatprep.subr.mxu1 %v2861_v27 }
 0x161   :  { %3146 = vmatpush3.msra.mxu1 %v2861_v27  ;;  %v620_v27 = vlaneseq }
 0x162   :  { %3147 = vmatprep.subr.mxu1 %v2860_v29 }
 0x163   :  { %3148 = vmatpush3.msra.mxu1 %v2860_v29 }
 0x164   :  { %3149 = vmatprep.subr.mxu1 %v2859_v33 }
 0x165   :  { %3150 = vmatpush3.msra.mxu1 %v2859_v33 }
 0x20e   :  { %v3099_v53 = vpop.f32.mrf.mxu1 }
 0x20f   :  { %v279_v55 = vadd.f32 %v3099_v53, %v2834_v51 }
 0x210   :  { %v273_v57 = vpop.f32.mrf.mxu1 }
 0x211   :  { %v290_v59 = vmul.f32 %v2837_v54, %v279_v55  ;;  %v274_v60 = vadd.f32 %v2834_v51, %v273_v57 }
 0x213   :  { %v289_v61 = vmul.f32 %v2837_v54, %v274_v60  ;;  %v299_v62 = vadd.f32 %v2838_v58, %v290_v59  ;;  %v617_v59 = vld [vmem:[%s4482_s8 + $0x38] sm:$0xff]  ;;  %v616_v60 = vld [vmem:[%s4482_s8 + $0x30] sm:$0xff] }
 0x214   :  { %660 = vmatprep.subr.mxu0 %v617_v59 }
 0x215   :  { %v301_v63 = vmax.f32 %v299_v62, 0.0  ;;  %v298_v0 = vadd.f32 %v2838_v58, %v289_v61  ;;  %v615_v61 = vld [vmem:[%s4482_s8 + $0x28] sm:$0xff]  ;;  %v614_v62 = vld [vmem:[%s4482_s8 + $0x20] sm:$0xff] }
 0x217   :  { %317 = vrot.lane.b32.xlu1 %v301_v63, %s3496_s26  ;;  %v300_v1 = vmax.f32 %v298_v0, 0.0  ;;  %v311_v2 = vrot.slane %v301_v63, 2  ;;  %v305_v6 = vrot.slane %v301_v63, 6  ;;  %v613_v63 = vld [vmem:[%s4482_s8 + $0x18] sm:$0xff]  ;;  %v612_v0 = vld [vmem:[%s4482_s8 + $0x10] sm:$0xff] }
 0x219   :  { %315 = vrot.lane.b32.xlu0 %v300_v1, %s3496_s26  ;;  %v314_v3 = vsel %vm156_vm2, %v311_v2, 0.0  ;;  %v310_v4 = vrot.slane %v300_v1, 2  ;;  %v304_v5 = vrot.slane %v300_v1, 6  ;;  %v611_v1 = vld [vmem:[%s4482_s8 + $0x8] sm:$0xff] }
 0x21b   :  { %324 = vrot.lane.b32.xlu1 %v314_v3, %s3497_s3  ;;  %v312_v7 = vsel %vm156_vm2, %v310_v4, %v311_v2  ;;  %v306_v8 = vsel %vm149_vm1, %v304_v5, %v305_v6  ;;  %v309_v11 = vsel %vm149_vm1, 0.0, %v304_v5  ;;  %v610_v2 = vld [vmem:[%s4482_s8] sm:$0xff]  ;;  %v3498_v3 = vmov 0.0   ;;  %v3807_v4 = vld [vmem:[%s4483_s11 + $0x18] sm:$0xff]  ;;  %v3815_v5 = vld [vmem:[%s4483_s11 + $0x10] sm:$0xff] }
 0x21c   :  { %3165 = vmatprep.subr.mxu1 %v3498_v3  ;;  %v3822_v6 = vld [vmem:[%s4483_s11 + $0x8] sm:$0xff] }
 0x21d   :  { %322 = vrot.lane.b32.xlu0 %v312_v7, %s3497_s3  ;;  %v3829_v7 = vld [vmem:[%s4483_s11] sm:$0xff] }
 0x289   :  { %v318_v9 = vpop.permute.xlu1 %317 }
 0x28a   :  { %v329_v15 = vsel %vm175_vm3, %v306_v8, %v318_v9  ;;  %v2872_v8 = vld [vmem:[%s4479_s5 + $0x2] ss:$0 sm:$0xff] }
 0x28b   :  { %v316_v10 = vpop.permute.xlu0 %315 }
 0x28c   :  { %v328_v13 = vsel %vm175_vm3, %v309_v11, %v316_v10  ;;  %v2876_v11 = vld [vmem:[%s4480_s6 + $0x2] ss:$0 sm:$0xff] }
 0x28d   :  { %v325_v12 = vpop.permute.xlu1 %324 }
 0x28e   :  { %v331_v17 = vsel %vm178_vm4, %v329_v15, %v325_v12 }
 0x28f   :  { %v323_v14 = vpop.permute.xlu0 %322 }
 0x290   :  { %v330_v16 = vsel %vm178_vm4, %v328_v13, %v323_v14 }
 0x291   :  { %3124 = vmatprep.mubr.msk.f32.mxu0 %vm200_vm5, %v330_v16  ;;  %v2878_v16 = vld [vmem:[%s4481_s7 + $0x2] ss:$0 sm:$0xff] }
 0x292   :  { %3125 = vmatmul.mubr.msk.f32.vlgmr.msra.gmra.mxu0 %vm200_vm5, %v331_v17 }
 0x293   :  { %661 = vmatpush1.msra.mxu0 %v616_v60  ;;  %700 = vmatprep.mubr.f32.mxu0 %v3498_v3 }
 0x294   :  { %662 = vmatprep.subr.mxu0 %v615_v61 }
 0x295   :  { %663 = vmatpush1.msra.mxu0 %v614_v62 }
 0x296   :  { %664 = vmatprep.subr.mxu0 %v613_v63 }
 0x297   :  { %665 = vmatpush1.msra.mxu0 %v612_v0 }
 0x298   :  { %666 = vmatprep.subr.mxu0 %v611_v1 }
 0x299   :  { %667 = vmatpush1.msra.mxu0 %v610_v2 }
 0x29a   :  { %3154 = vmatprep.subr.mxu0 %v3498_v3 }
 0x352   :  { %v3126_v30 = vpop.f32.mrf.mxu0 }
 0x353   :  { %v431_v32 = vadd.f32 %v3126_v30, %v2852_v28  ;;  %v618_v30 = vld [vmem:[%s4485_s9] sm:$0x3] }
 0x354   :  { %v425_v34 = vpop.f32.mrf.mxu0 }
 0x355   :  { %v443_v36 = vmul.f32 %v2856_v31, %v431_v32  ;;  %v426_v37 = vadd.f32 %v2852_v28, %v425_v34  ;;  %v621_v28 = vshrl.u32 %v620_v27, 7 }
 0x357   :  { %v442_v38 = vmul.f32 %v2856_v31, %v426_v37  ;;  %v453_v39 = vadd.f32 %v2858_v35, %v443_v36  ;;  %v626_v29 = vsub.s32 1, %v621_v28  ;;  %v622_v31 = vsub.s32 0, %v621_v28 }
 0x359   :  { %v455_v40 = vmax.f32 %v453_v39, 0.0  ;;  %v452_v41 = vadd.f32 %v2858_v35, %v442_v38  ;;  %v627_v32 = vrot.slane %v618_v30, %v626_v29  ;;  %v623_v35 = vrot.slane %v618_v30, %v622_v31 }
 0x35b   :  { %471 = vrot.lane.b32.xlu1 %v455_v40, %s3496_s26  ;;  %v454_v42 = vmax.f32 %v452_v41, 0.0  ;;  %v465_v43 = vrot.slane %v455_v40, 2  ;;  %v459_v47 = vrot.slane %v455_v40, 6 }
 0x35d   :  { %469 = vrot.lane.b32.xlu0 %v454_v42, %s3496_s26  ;;  %v468_v44 = vsel %vm156_vm2, %v465_v43, 0.0  ;;  %v464_v45 = vrot.slane %v454_v42, 2  ;;  %v458_v46 = vrot.slane %v454_v42, 6 }
 0x35f   :  { %478 = vrot.lane.b32.xlu1 %v468_v44, %s3497_s3  ;;  %v466_v48 = vsel %vm156_vm2, %v464_v45, %v465_v43  ;;  %v460_v49 = vsel %vm149_vm1, %v458_v46, %v459_v47  ;;  %v463_v52 = vsel %vm149_vm1, 0.0, %v458_v46  ;;  %v3500_v47 = vmov 0  }
 0x360   :  { %3358 = vset.pattern.permute.xlu0 %v3500_v47  ;;  %3359 = vset.pattern.permute.xlu1 %v3500_v47 }
 0x361   :  { %476 = vrot.lane.b32.xlu0 %v466_v48, %s3497_s3 }
 0x3cd   :  { %v472_v50 = vpop.permute.xlu1 %471 }
 0x3ce   :  { %v483_v56 = vsel %vm175_vm3, %v460_v49, %v472_v50 }
 0x3cf   :  { %v470_v51 = vpop.permute.xlu0 %469 }
 0x3d0   :  { %v482_v54 = vsel %vm175_vm3, %v463_v52, %v470_v51 }
 0x3d1   :  { %v479_v53 = vpop.permute.xlu1 %478 }
 0x3d2   :  { %v485_v58 = vsel %vm178_vm4, %v483_v56, %v479_v53  ;;  %v3920_v56 = vld [vmem:[%s4486_s1] sm:$0x3]  ;;  %s3501_s1 = smov 96  }
 0x3d3   :  { %v477_v55 = vpop.permute.xlu0 %476  ;;  %vm918_vm7 = vcmp.gt.s32.totalorder %v3920_v56, 0  ;;  %vm919_vm8 = vcmp.gt.s32.totalorder %v3920_v56, 7  ;;  %vm1160_vm12 = vcmp.gt.s32.totalorder %v3920_v56, 1  ;;  %vm1161_vm13 = vcmp.gt.s32.totalorder %v3920_v56, 6 }
 0x3d4   :  { %v484_v57 = vsel %vm178_vm4, %v482_v54, %v477_v55  ;;  %v920_v63 = vsel %vm918_vm7, 1, %v3500_v47  ;;  %v932_v0 = vsel %vm919_vm8, 1, %v3500_v47  ;;  %vm1415_vm0 = vcmp.gt.s32.totalorder %v3920_v56, 2 }
 0x3d5   :  { %3151 = vmatprep.mubr.msk.f32.mxu1 %vm200_vm5, %v484_v57  ;;  %vm1416_vm1 = vcmp.gt.s32.totalorder %v3920_v56, 5  ;;  %vm1663_vm7 = vcmp.gt.s32.totalorder %v3920_v56, 3 }
 0x3d6   :  { %3152 = vmatmul.mubr.msk.f32.vlgmr.msra.gmra.mxu1 %vm200_vm5, %v485_v58  ;;  %vm1664_vm5 = vcmp.gt.s32.totalorder %v3920_v56, 4 }
 0x3d7   :  { %3166 = vmatpush3.msra.mxu1 %v3807_v4  ;;  %3173 = vmatprep.mubr.msk.f32.mxu1 %vm3499_vm6, %v3498_v3 }
 0x3d8   :  { %3167 = vmatprep.subr.mxu1 %v3498_v3 }
 0x3d9   :  { %3168 = vmatpush3.msra.mxu1 %v3815_v5 }
 0x3da   :  { %3169 = vmatprep.subr.mxu1 %v3498_v3 }
 0x3db   :  { %3170 = vmatpush3.msra.mxu1 %v3822_v6 }
 0x3dc   :  { %3171 = vmatprep.subr.mxu1 %v3498_v3 }
 0x3dd   :  { %3172 = vmatpush3.msra.mxu1 %v3829_v7 }
 0x3de   :  { %3174 = vmatmul.mubr.f32.vlgmr.msra.gmra.mxu1 %v3498_v3  ;;  %3187 = vmatprep.subr.mxu1 %v3498_v3 }
 0x3df   :  { %3188 = vmatpush3.msra.mxu1 %v3807_v4  ;;  %3195 = vmatprep.mubr.msk.f32.mxu1 %vm3499_vm6, %v3498_v3 }
 0x3e0   :  { %3189 = vmatprep.subr.mxu1 %v3498_v3 }
 0x3e1   :  { %3190 = vmatpush3.msra.mxu1 %v3815_v5 }
 0x3e2   :  { %3191 = vmatprep.subr.mxu1 %v3498_v3 }
 0x3e3   :  { %3192 = vmatpush3.msra.mxu1 %v3822_v6 }
 0x3e4   :  { %3193 = vmatprep.subr.mxu1 %v3498_v3 }
 0x3e5   :  { %3194 = vmatpush3.msra.mxu1 %v3829_v7 }
 0x3e6   :  { %3209 = vmatprep.subr.mxu1 %v3498_v3 }
 0x496   :  { %v3153_v9 = vpop.f32.mrf.mxu1 }
 0x497   :  { %v585_v10 = vadd.f32 %v3153_v9, %v2872_v8 }
 0x498   :  { %v579_v12 = vpop.f32.mrf.mxu1 }
 0x499   :  { %v580_v13 = vadd.f32 %v2872_v8, %v579_v12  ;;  %v597_v14 = vmul.f32 %v2876_v11, %v585_v10 }
 0x49b   :  { %v596_v15 = vmul.f32 %v2876_v11, %v580_v13  ;;  %v607_v18 = vadd.f32 %v2878_v16, %v597_v14 }
 0x49d   :  { %v606_v17 = vadd.f32 %v2878_v16, %v596_v15  ;;  %v609_v22 = vmax.f32 %v607_v18, 0.0 }
 0x49e   :  { %v862_v25 = vpop.f32.mrf.mxu1 }
 0x49f   :  { %v608_v19 = vmax.f32 %v606_v17, 0.0  ;;  %v867_v39 = vrot.slane %v862_v25, 2 }
 0x4a0   :  { %v3175_v26 = vpop.f32.mrf.mxu1 }
 0x4a1   :  { %2879 = vmatmul.mubr.msk.f32.vlgmr.msra.gmra.mxu0 %vm175_vm3, %v608_v19 }
 0x4a2   :  { %3155 = vmatpush3.msra.mxu0 %v3859_v20  ;;  %706 = vmatprep.mubr.f32.mxu0 %v3498_v3 }
 0x4a3   :  { %3156 = vmatprep.subr.mxu0 %v3498_v3 }
 0x4a4   :  { %3157 = vmatpush3.msra.mxu0 %v3865_v21 }
 0x4a5   :  { %3158 = vmatprep.subr.mxu0 %v3498_v3  ;;  %2880 = vmatmul.mubr.msk.f32.gmra.mxu0 %vm175_vm3, %v609_v22 }
 0x4a6   :  { %3159 = vmatpush3.msra.mxu0 %v3873_v23  ;;  %3162 = vmatprep.mubr.msk.f32.mxu0 %vm3499_vm6, %v3498_v3 }
 0x4a7   :  { %3160 = vmatprep.subr.mxu0 %v3498_v3 }
 0x4a8   :  { %3161 = vmatpush3.msra.mxu0 %v3881_v24 }
 0x4a9   :  { %3163 = vmatmul.mubr.f32.vlgmr.msra.gmra.mxu0 %v3498_v3  ;;  %3176 = vmatprep.subr.mxu0 %v3498_v3 }
 0x4aa   :  { %3177 = vmatpush3.msra.mxu0 %v3859_v20  ;;  %3184 = vmatprep.mubr.msk.f32.mxu0 %vm3499_vm6, %v3498_v3 }
 0x4ab   :  { %3178 = vmatprep.subr.mxu0 %v3498_v3 }
 0x4ac   :  { %3179 = vmatpush3.msra.mxu0 %v3865_v21 }
 0x4ad   :  { %3180 = vmatprep.subr.mxu0 %v3498_v3 }
 0x4ae   :  { %3181 = vmatpush3.msra.mxu0 %v3873_v23 }
 0x4af   :  { %3182 = vmatprep.subr.mxu0 %v3498_v3 }
 0x4b0   :  { %3183 = vmatpush3.msra.mxu0 %v3881_v24 }
 0x4b1   :  { %3198 = vmatprep.subr.mxu0 %v3498_v3 }
 0x561   :  { %v702_v33 = vpop.f32.mrf.mxu0 }
 0x562   :  { %v3907_v41 = vadd.f32 %v702_v33, %v623_v35 }
 0x563   :  { %v704_v34 = vpop.f32.mrf.mxu0 }
 0x564   :  { %v3903_v36 = vadd.f32 %v704_v34, %v627_v32 }
 0x565   :  { %v708_v37 = vpop.f32.mrf.mxu0 }
 0x566   :  { %v3905_v38 = vadd.f32 %v708_v37, %v623_v35 }
 0x567   :  { %v710_v40 = vpop.f32.mrf.mxu0 }
 0x568   :  { %v3909_v42 = vadd.f32 %v710_v40, %v627_v32 }
 0x569   :  { %v791_v43 = vpop.f32.mrf.mxu0 }
 0x56a   :  { %v869_v44 = vadd.f32 %v867_v39, %v3909_v42  ;;  %v795_v45 = vadd.f32 %v791_v43, %v3907_v41 }
 0x56b   :  { %v3164_v46 = vpop.f32.mrf.mxu0 }
 0x56c   :  { %3360 = vtanh.f32 %v869_v44  ;;  %v2882_v50 = vmul.f32 -1.442695, %v869_v44  ;;  %v2881_v51 = vmul.f32 -1.442695, %v795_v45 }
 0x56d   :  { %3362 = vtanh.f32 %v795_v45 }
 0x56e   :  { %3364 = vpow2.f32 %v2882_v50 }
 0x56f   :  { %3366 = vpow2.f32 %v2881_v51 }
 0x579   :  { %v3361_v48 = vpop.eup %3360 }
 0x57a   :  { %v3363_v49 = vpop.eup %3362  ;;  %903 = vrot.lane.b32.xlu1 %v3361_v48, %s3497_s3 }
 0x57b   :  { %879 = vrot.lane.b32.xlu0 %v3363_v49, %s3497_s3  ;;  %v3365_v52 = vpop.eup %3364 }
 0x57c   :  { %v3367_v53 = vpop.eup %3366  ;;  %v897_v54 = vadd.f32 1.0, %v3365_v52 }
 0x57d   :  { %v873_v55 = vadd.f32 1.0, %v3367_v53 }
 0x57e   :  { %3368 = vrcp.f32 %v897_v54 }
 0x57f   :  { %3370 = vrcp.f32 %v873_v55 }
 0x58b   :  { %v3369_v57 = vpop.eup %3368 }
 0x58c   :  { %v3371_v59 = vpop.eup %3370  ;;  %v901_v9 = vmul.f32 0.0, %v3369_v57 }
 0x58d   :  { %v877_v1 = vmul.f32 0.0, %v3371_v59 }
 0x5ec   :  { %v904_v58 = vpop.permute.xlu1 %903 }
 0x5ed   :  { %v906_v60 = vmul.f32 %v3369_v57, %v904_v58  ;;  %v880_v61 = vpop.permute.xlu0 %879 }
 0x5ee   :  { %v882_v62 = vmul.f32 %v3371_v59, %v880_v61 }
 0x5ef   :  { %908 = vrot.lane.b32.xlu1 %v906_v60, %s3496_s26 }
 0x5f0   :  { %884 = vrot.lane.b32.xlu0 %v882_v62, %s3496_s26 }
 0x5f4   :  { %922 = vperm.xlu0 %3358, %v920_v63  }
 0x5f8   :  { %934 = vperm.xlu0 %3358, %v932_v0  }
 0x661   :  { %v909_v2 = vpop.permute.xlu1 %908 }
 0x662   :  { %v885_v8 = vpop.permute.xlu0 %884  ;;  %v911_v11 = vadd.f32 %v909_v2, %v901_v9 }
 0x663   :  { %v3928_v10 = vadd.f32 %v885_v8, %v877_v1 }
 0x664   :  { %v946_v22 = vrot.slane %v911_v11, 6 }
 0x665   :  { %3372 = vtanh.f32 %v3928_v10 }
 0x666   :  { %3374 = vtanh.f32 %v911_v11 }
 0x66f   :  { %v3933_v14 = vpop.permute.xlu0 %922 }
 0x670   :  { %vm924_vm9 = vcmp.eq.s32.totalorder %v3933_v14, 1 }
 0x671   :  { %v944_v61 = vsel %vm924_vm9, %v3928_v10, 0.0 }
 0x672   :  { %v3373_v12 = vpop.eup %3372  ;;  %v1112_v62 = vrot.slane %v944_v61, 6 }
 0x673   :  { %890 = vrot.lane.b32.xlu1 %v3373_v12, %s3497_s3  ;;  %v3375_v13 = vpop.eup %3374  ;;  %v3943_v27 = vpop.permute.xlu0 %934 }
 0x674   :  { %vm936_vm11 = vcmp.eq.s32.totalorder %v3943_v27, 1 }
 0x677   :  { %914 = vrot.lane.b32.xlu1 %v3375_v13, %s3497_s3  ;;  %v1162_v13 = vsel %vm1160_vm12, 1, %v3500_v47 }
 0x6e5   :  { %v891_v15 = vpop.permute.xlu1 %890 }
 0x6e6   :  { %v893_v16 = vmul.f32 %v3371_v59, %v891_v15  ;;  %v1174_v15 = vsel %vm1161_vm13, 1, %v3500_v47 }
 0x6e8   :  { %v925_v17 = vsel %vm924_vm9, %v893_v16, 0.0 }
 0x6e9   :  { %927 = vrot.lane.b32.xlu1 %v925_v17, %s3496_s26  ;;  %v915_v18 = vpop.permute.xlu1 %914 }
 0x6ea   :  { %v917_v19 = vmul.f32 %v3369_v57, %v915_v18 }
 0x6ec   :  { %v938_v25 = vrot.slane %v917_v19, 6 }
 0x6ed   :  { %947 = vrot.lane.b32.xlu1 %v946_v22, %s3501_s1 }
 0x6ee   :  { %939 = vrot.lane.b32.xlu0 %v938_v25, %s3496_s26 }
 0x75b   :  { %v3941_v26 = vpop.permute.xlu1 %927 }
 0x75c   :  { %931 = vst.msk [vmem:[#allocation2] sm:$0x3] %vm930_vm10, %v3941_v26  ;;  %3185 = vmatmul.mubr.msk.f32.vlgmr.msra.gmra.mxu0 %vm175_vm3, %v3941_v26 }
 0x75d   :  { %3199 = vmatpush3.msra.mxu0 %v3859_v20  ;;  %3206 = vmatprep.mubr.msk.f32.mxu0 %vm3499_vm6, %v3498_v3 }
 0x75e   :  { %3200 = vmatprep.subr.mxu0 %v3498_v3 }
 0x75f   :  { %3201 = vmatpush3.msra.mxu0 %v3865_v21  ;;  %v948_v43 = vpop.permute.xlu1 %947 }
 0x760   :  { %v940_v28 = vpop.permute.xlu0 %939  ;;  %3202 = vmatprep.subr.mxu0 %v3498_v3  ;;  %v3983_v45 = vsel %vm936_vm11, %v948_v43, 0.0 }
 0x761   :  { %v3958_v29 = vsel %vm936_vm11, %v940_v28, 0.0  ;;  %3203 = vmatpush3.msra.mxu0 %v3873_v23  ;;  %v1139_v46 = vrot.slane %v3983_v45, 4 }
 0x762   :  { %943 = vst.msk [vmem:[#allocation3 + $0xe] sm:$0x3] %vm930_vm10, %v3958_v29  ;;  %3196 = vmatmul.mubr.msk.f32.vlgmr.msra.gmra.mxu1 %vm175_vm3, %v3958_v29  ;;  %3204 = vmatprep.subr.mxu0 %v3498_v3 }
 0x763   :  { %3205 = vmatpush3.msra.mxu0 %v3881_v24  ;;  %3210 = vmatpush3.msra.mxu1 %v3807_v4 }
 0x764   :  { %3211 = vmatprep.subr.mxu1 %v3498_v3  ;;  %3217 = vmatprep.mubr.msk.f32.mxu1 %vm3499_vm6, %v3498_v3 }
 0x765   :  { %3212 = vmatpush3.msra.mxu1 %v3815_v5  ;;  %3220 = vmatprep.subr.mxu0 %v3498_v3 }
 0x766   :  { %3213 = vmatprep.subr.mxu1 %v3498_v3 }
 0x767   :  { %3214 = vmatpush3.msra.mxu1 %v3822_v6 }
 0x768   :  { %3215 = vmatprep.subr.mxu1 %v3498_v3 }
 0x769   :  { %3216 = vmatpush3.msra.mxu1 %v3829_v7 }
 0x76a   :  { %3231 = vmatprep.subr.mxu1 %v3498_v3 }
 0x81c   :  { %v1019_v30 = vpop.f32.mrf.mxu0 }
 0x81d   :  { %v1024_v31 = vrot.slane %v1019_v30, 6 }
 0x81e   :  { %v3186_v32 = vpop.f32.mrf.mxu0 }
 0x81f   :  { %v1026_v33 = vadd.f32 %v1024_v31, %v3907_v41 }
 0x821   :  { %3376 = vtanh.f32 %v1026_v33  ;;  %v2885_v48 = vmul.f32 -1.442695, %v1026_v33 }
 0x822   :  { %v1096_v34 = vpop.f32.mrf.mxu1 }
 0x823   :  { %v1101_v35 = vrot.slane %v1096_v34, 4 }
 0x824   :  { %v3197_v37 = vpop.f32.mrf.mxu1 }
 0x825   :  { %v1103_v39 = vadd.f32 %v1101_v35, %v3909_v42 }
 0x827   :  { %3378 = vtanh.f32 %v1103_v39  ;;  %v2886_v49 = vmul.f32 -1.442695, %v1103_v39 }
 0x828   :  { %3380 = vpow2.f32 %v2885_v48 }
 0x829   :  { %3382 = vpow2.f32 %v2886_v49 }
 0x82e   :  { %v3377_v40 = vpop.eup %3376 }
 0x82f   :  { %1116 = vrot.lane.b32.xlu0 %v3377_v40, %s3497_s3 }
 0x834   :  { %v3379_v44 = vpop.eup %3378 }
 0x835   :  { %1145 = vrot.lane.b32.xlu1 %v3379_v44, %s3497_s3  ;;  %v3381_v50 = vpop.eup %3380 }
 0x836   :  { %v1107_v51 = vadd.f32 1.0, %v3381_v50  ;;  %v3383_v52 = vpop.eup %3382 }
 0x837   :  { %v1134_v53 = vadd.f32 1.0, %v3383_v52 }
 0x838   :  { %3384 = vrcp.f32 %v1107_v51 }
 0x839   :  { %1140 = vrot.lane.b32.xlu1 %v1139_v46, %s3496_s26  ;;  %3386 = vrcp.f32 %v1134_v53 }
 0x845   :  { %v3385_v54 = vpop.eup %3384 }
 0x846   :  { %v3387_v58 = vpop.eup %3386  ;;  %v1114_v63 = vmul.f32 %v3385_v54, %v1112_v62 }
 0x8a1   :  { %v1117_v55 = vpop.permute.xlu0 %1116 }
 0x8a2   :  { %v1119_v57 = vmul.f32 %v3385_v54, %v1117_v55 }
 0x8a4   :  { %1121 = vrot.lane.b32.xlu0 %v1119_v57, %s3496_s26 }
 0x8a7   :  { %v1146_v59 = vpop.permute.xlu1 %1145 }
 0x8a8   :  { %v1148_v60 = vmul.f32 %v3387_v58, %v1146_v59 }
 0x8aa   :  { %1150 = vrot.lane.b32.xlu0 %v1148_v60, %s3496_s26 }
 0x8ab   :  { %v1141_v2 = vpop.permute.xlu1 %1140 }
 0x8ac   :  { %v1143_v8 = vmul.f32 %v3387_v58, %v1141_v2 }
 0x916   :  { %v1122_v0 = vpop.permute.xlu0 %1121 }
 0x917   :  { %v1124_v1 = vadd.f32 %v1122_v0, %v1114_v63 }
 0x919   :  { %3388 = vtanh.f32 %v1124_v1  ;;  %v1188_v22 = vrot.slane %v1124_v1, 2 }
 0x91c   :  { %v1151_v9 = vpop.permute.xlu0 %1150 }
 0x91d   :  { %v1153_v11 = vadd.f32 %v1151_v9, %v1143_v8 }
 0x91f   :  { %3390 = vtanh.f32 %v1153_v11  ;;  %v1198_v30 = vrot.slane %v1153_v11, 4 }
 0x926   :  { %v3389_v12 = vpop.eup %3388 }
 0x927   :  { %1127 = vrot.lane.b32.xlu1 %v3389_v12, %s3497_s3 }
 0x92b   :  { %1164 = vperm.xlu1 %3359, %v1162_v13  }
 0x92c   :  { %v3391_v10 = vpop.eup %3390 }
 0x92d   :  { %1156 = vrot.lane.b32.xlu0 %v3391_v10, %s3497_s3 }
 0x931   :  { %1176 = vperm.xlu0 %3358, %v1174_v15  }
 0x999   :  { %v1128_v16 = vpop.permute.xlu1 %1127 }
 0x99a   :  { %v1130_v17 = vmul.f32 %v3385_v54, %v1128_v16 }
 0x99c   :  { %v1168_v18 = vrot.slane %v1130_v17, 2 }
 0x99e   :  { %1169 = vrot.lane.b32.xlu1 %v1168_v18, %s3496_s26 }
 0x99f   :  { %v1157_v19 = vpop.permute.xlu0 %1156 }
 0x9a0   :  { %v1159_v25 = vmul.f32 %v3387_v58, %v1157_v19 }
 0x9a2   :  { %v1180_v28 = vrot.slane %v1159_v25, 4  ;;  %1189 = vrot.lane.b32.xlu1 %v1188_v22, %s3501_s1 }
 0x9a4   :  { %1181 = vrot.lane.b32.xlu0 %v1180_v28, %s3496_s26 }
 0x9a6   :  { %1199 = vrot.lane.b32.xlu1 %v1198_v30, %s3501_s1  ;;  %v4004_v31 = vpop.permute.xlu1 %1164  ;;  %v1417_v30 = vsel %vm1415_vm0, 1, %v3500_v47 }
 0x9a7   :  { %vm1166_vm14 = vcmp.eq.s32.totalorder %v4004_v31, 1 }
 0x9a8   :  { %1192 = vrot.lane.b32.xlu0 %v944_v61, %s3501_s1 }
 0x9ac   :  { %v4014_v35 = vpop.permute.xlu0 %1176 }
 0x9ad   :  { %vm1178_vm15 = vcmp.eq.s32.totalorder %v4014_v35, 1 }
 0xa10   :  { %v1170_v32 = vpop.permute.xlu1 %1169 }
 0xa11   :  { %v1172_v33 = vsel %vm1166_vm14, %v1170_v32, 0.0  ;;  %v4012_v34 = vsel %vm1166_vm14, %v1170_v32, %v3941_v26 }
 0xa12   :  { %1173 = vst.msk [vmem:[#allocation2 + $0x2] sm:$0x3] %vm930_vm10, %v1172_v33  ;;  %3207 = vmatmul.mubr.msk.f32.vlgmr.msra.gmra.mxu0 %vm175_vm3, %v4012_v34  ;;  %v1429_v33 = vsel %vm1416_vm1, 1, %v3500_v47 }
 0xa13   :  { %3221 = vmatpush3.msra.mxu0 %v3859_v20  ;;  %3228 = vmatprep.mubr.msk.f32.mxu0 %vm3499_vm6, %v3498_v3 }
 0xa14   :  { %3222 = vmatprep.subr.mxu0 %v3498_v3  ;;  %v1190_v51 = vpop.permute.xlu1 %1189 }
 0xa15   :  { %3223 = vmatpush3.msra.mxu0 %v3865_v21 }
 0xa16   :  { %v1182_v26 = vpop.permute.xlu0 %1181  ;;  %3224 = vmatprep.subr.mxu0 %v3498_v3 }
 0xa17   :  { %v1184_v37 = vsel %vm1178_vm15, %v1182_v26, 0.0  ;;  %v4031_v39 = vsel %vm1178_vm15, %v1182_v26, %v3958_v29  ;;  %3225 = vmatpush3.msra.mxu0 %v3873_v23 }
 0xa18   :  { %1185 = vst.msk [vmem:[#allocation3 + $0xc] sm:$0x3] %vm930_vm10, %v1184_v37  ;;  %3218 = vmatmul.mubr.msk.f32.vlgmr.msra.gmra.mxu1 %vm175_vm3, %v4031_v39  ;;  %3226 = vmatprep.subr.mxu0 %v3498_v3  ;;  %v1200_v55 = vpop.permute.xlu1 %1199 }
 0xa19   :  { %3227 = vmatpush3.msra.mxu0 %v3881_v24  ;;  %3232 = vmatpush3.msra.mxu1 %v3807_v4  ;;  %v4061_v58 = vsel %vm1178_vm15, %v1200_v55, %v3983_v45 }
 0xa1a   :  { %3233 = vmatprep.subr.mxu1 %v3498_v3  ;;  %3239 = vmatprep.mubr.msk.f32.mxu1 %vm3499_vm6, %v3498_v3  ;;  %v1193_v52 = vpop.permute.xlu0 %1192  ;;  %v1394_v60 = vrot.slane %v4061_v58, 6 }
 0xa1b   :  { %3234 = vmatpush3.msra.mxu1 %v3815_v5  ;;  %3242 = vmatprep.subr.mxu0 %v3498_v3  ;;  %v4054_v54 = vsel %vm1166_vm14, %v1190_v51, %v1193_v52 }
 0xa1c   :  { %3235 = vmatprep.subr.mxu1 %v3498_v3  ;;  %v1365_v57 = vrot.slane %v4054_v54, 4 }
 0xa1d   :  { %3236 = vmatpush3.msra.mxu1 %v3822_v6 }
 0xa1e   :  { %3237 = vmatprep.subr.mxu1 %v3498_v3 }
 0xa1f   :  { %3238 = vmatpush3.msra.mxu1 %v3829_v7 }
 0xa20   :  { %3253 = vmatprep.subr.mxu1 %v3498_v3 }
 0xad2   :  { %v1272_v29 = vpop.f32.mrf.mxu0 }
 0xad3   :  { %v1277_v40 = vrot.slane %v1272_v29, 4 }
 0xad4   :  { %v3208_v43 = vpop.f32.mrf.mxu0 }
 0xad5   :  { %v1279_v44 = vadd.f32 %v1277_v40, %v3907_v41 }
 0xad7   :  { %3392 = vtanh.f32 %v1279_v44  ;;  %v2889_v61 = vmul.f32 -1.442695, %v1279_v44 }
 0xad8   :  { %v1349_v46 = vpop.f32.mrf.mxu1 }
 0xad9   :  { %v1354_v48 = vrot.slane %v1349_v46, 6 }
 0xada   :  { %v3219_v49 = vpop.f32.mrf.mxu1 }
 0xadb   :  { %v1356_v50 = vadd.f32 %v1354_v48, %v3909_v42 }
 0xadd   :  { %3394 = vtanh.f32 %v1356_v50  ;;  %v2890_v62 = vmul.f32 -1.442695, %v1356_v50 }
 0xade   :  { %3396 = vpow2.f32 %v2889_v61 }
 0xadf   :  { %3398 = vpow2.f32 %v2890_v62 }
 0xae4   :  { %v3393_v53 = vpop.eup %3392 }
 0xae5   :  { %1371 = vrot.lane.b32.xlu0 %v3393_v53, %s3497_s3 }
 0xae9   :  { %1366 = vrot.lane.b32.xlu0 %v1365_v57, %s3496_s26 }
 0xaea   :  { %v3395_v59 = vpop.eup %3394 }
 0xaeb   :  { %1400 = vrot.lane.b32.xlu1 %v3395_v59, %s3497_s3  ;;  %v3397_v63 = vpop.eup %3396 }
 0xaec   :  { %v1360_v0 = vadd.f32 1.0, %v3397_v63  ;;  %v3399_v1 = vpop.eup %3398 }
 0xaed   :  { %1395 = vrot.lane.b32.xlu0 %v1394_v60, %s3496_s26  ;;  %v1389_v2 = vadd.f32 1.0, %v3399_v1 }
 0xaee   :  { %3400 = vrcp.f32 %v1360_v0 }
 0xaef   :  { %3402 = vrcp.f32 %v1389_v2 }
 0xafb   :  { %v3401_v45 = vpop.eup %3400 }
 0xafc   :  { %v3403_v11 = vpop.eup %3402 }
 0xb57   :  { %v1372_v8 = vpop.permute.xlu0 %1371 }
 0xb58   :  { %v1374_v9 = vmul.f32 %v3401_v45, %v1372_v8 }
 0xb5a   :  { %1376 = vrot.lane.b32.xlu1 %v1374_v9, %s3496_s26 }
 0xb5b   :  { %v1367_v10 = vpop.permute.xlu0 %1366 }
 0xb5c   :  { %v1369_v15 = vmul.f32 %v3401_v45, %v1367_v10 }
 0xb5d   :  { %v1401_v12 = vpop.permute.xlu1 %1400 }
 0xb5e   :  { %v1403_v13 = vmul.f32 %v3403_v11, %v1401_v12 }
 0xb5f   :  { %v1396_v18 = vpop.permute.xlu0 %1395 }
 0xb60   :  { %1405 = vrot.lane.b32.xlu1 %v1403_v13, %s3496_s26  ;;  %v1398_v19 = vmul.f32 %v3403_v11, %v1396_v18 }
 0xbcc   :  { %v1377_v16 = vpop.permute.xlu1 %1376 }
 0xbcd   :  { %v1379_v17 = vadd.f32 %v1377_v16, %v1369_v15 }
 0xbcf   :  { %3404 = vtanh.f32 %v1379_v17  ;;  %v1443_v43 = vrot.slane %v1379_v17, 4 }
 0xbd2   :  { %v1406_v22 = vpop.permute.xlu1 %1405 }
 0xbd3   :  { %v1408_v25 = vadd.f32 %v1406_v22, %v1398_v19  ;;  %v1677_v22 = vsel %vm1664_vm5, 1, %v3500_v47 }
 0xbd5   :  { %3406 = vtanh.f32 %v1408_v25  ;;  %v1450_v48 = vrot.slane %v1408_v25, 2 }
 0xbdc   :  { %v3405_v28 = vpop.eup %3404 }
 0xbdd   :  { %1382 = vrot.lane.b32.xlu0 %v3405_v28, %s3497_s3 }
 0xbe1   :  { %1419 = vperm.xlu0 %3358, %v1417_v30  }
 0xbe2   :  { %v3407_v32 = vpop.eup %3406 }
 0xbe3   :  { %1411 = vrot.lane.b32.xlu1 %v3407_v32, %s3497_s3 }
 0xbe7   :  { %1431 = vperm.xlu1 %3359, %v1429_v33  }
 0xc4f   :  { %v1383_v26 = vpop.permute.xlu0 %1382 }
 0xc50   :  { %v1385_v37 = vmul.f32 %v3401_v45, %v1383_v26 }
 0xc52   :  { %v1423_v29 = vrot.slane %v1385_v37, 4 }
 0xc54   :  { %1424 = vrot.lane.b32.xlu0 %v1423_v29, %s3496_s26 }
 0xc55   :  { %v1412_v40 = vpop.permute.xlu1 %1411 }
 0xc56   :  { %v1414_v44 = vmul.f32 %v3403_v11, %v1412_v40 }
 0xc58   :  { %v1435_v46 = vrot.slane %v1414_v44, 2  ;;  %1444 = vrot.lane.b32.xlu0 %v1443_v43, %s3501_s1 }
 0xc5a   :  { %1436 = vrot.lane.b32.xlu1 %v1435_v46, %s3496_s26  ;;  %v1665_v46 = vsel %vm1663_vm7, 1, %v3500_v47 }
 0xc5c   :  { %v4079_v49 = vpop.permute.xlu0 %1419 }
 0xc5d   :  { %vm1421_vm2 = vcmp.eq.s32.totalorder %v4079_v49, 1 }
 0xc5e   :  { %1451 = vrot.lane.b32.xlu1 %v1450_v48, %s3501_s1 }
 0xc62   :  { %v4089_v53 = vpop.permute.xlu1 %1431 }
 0xc63   :  { %vm1433_vm4 = vcmp.eq.s32.totalorder %v4089_v53, 1 }
 0xcc6   :  { %v1425_v50 = vpop.permute.xlu0 %1424 }
 0xcc7   :  { %v1427_v51 = vsel %vm1421_vm2, %v1425_v50, 0.0  ;;  %v4087_v52 = vsel %vm1421_vm2, %v1425_v50, %v4012_v34 }
 0xcc8   :  { %1428 = vst.msk [vmem:[#allocation2 + $0x4] sm:$0x3] %vm930_vm10, %v1427_v51  ;;  %3229 = vmatmul.mubr.msk.f32.vlgmr.msra.gmra.mxu0 %vm175_vm3, %v4087_v52 }
 0xcc9   :  { %3243 = vmatpush3.msra.mxu0 %v3859_v20  ;;  %3250 = vmatprep.mubr.msk.f32.mxu0 %vm3499_vm6, %v3498_v3 }
 0xcca   :  { %3244 = vmatprep.subr.mxu0 %v3498_v3  ;;  %v1445_v1 = vpop.permute.xlu0 %1444 }
 0xccb   :  { %3245 = vmatpush3.msra.mxu0 %v3865_v21  ;;  %v4130_v45 = vsel %vm1421_vm2, %v1445_v1, %v4054_v54 }
 0xccc   :  { %v1437_v34 = vpop.permute.xlu1 %1436  ;;  %3246 = vmatprep.subr.mxu0 %v3498_v3  ;;  %v1614_v8 = vrot.slane %v4130_v45, 2 }
 0xccd   :  { %v1439_v55 = vsel %vm1433_vm4, %v1437_v34, 0.0  ;;  %v4106_v57 = vsel %vm1433_vm4, %v1437_v34, %v4031_v39  ;;  %3247 = vmatpush3.msra.mxu0 %v3873_v23 }
 0xcce   :  { %1440 = vst.msk [vmem:[#allocation3 + $0xa] sm:$0x3] %vm930_vm10, %v1439_v55  ;;  %3240 = vmatmul.mubr.msk.f32.vlgmr.msra.gmra.mxu1 %vm175_vm3, %v4106_v57  ;;  %3248 = vmatprep.subr.mxu0 %v3498_v3 }
 0xccf   :  { %3254 = vmatpush3.msra.mxu1 %v3807_v4  ;;  %3249 = vmatpush3.msra.mxu0 %v3881_v24 }
 0xcd0   :  { %3255 = vmatprep.subr.mxu1 %v3498_v3  ;;  %3261 = vmatprep.mubr.msk.f32.mxu1 %vm3499_vm6, %v3498_v3  ;;  %v1452_v11 = vpop.permute.xlu1 %1451 }
 0xcd1   :  { %3256 = vmatpush3.msra.mxu1 %v3815_v5  ;;  %3264 = vmatprep.subr.mxu0 %v3498_v3 }
 0xcd2   :  { %3257 = vmatprep.subr.mxu1 %v3498_v3 }
 0xcd3   :  { %3258 = vmatpush3.msra.mxu1 %v3822_v6 }
 0xcd4   :  { %3259 = vmatprep.subr.mxu1 %v3498_v3 }
 0xcd5   :  { %3260 = vmatpush3.msra.mxu1 %v3829_v7 }
 0xcd6   :  { %3275 = vmatprep.subr.mxu1 %v3498_v3 }
 0xd88   :  { %v1524_v39 = vpop.f32.mrf.mxu0 }
 0xd89   :  { %v1529_v59 = vrot.slane %v1524_v39, 2 }
 0xd8a   :  { %v3230_v60 = vpop.f32.mrf.mxu0 }
 0xd8b   :  { %v1531_v61 = vadd.f32 %v1529_v59, %v3907_v41  ;;  %v1454_v41 = vsel %vm1433_vm4, %v1452_v11, %v4061_v58 }
 0xd8d   :  { %3408 = vtanh.f32 %v1531_v61 }
 0xd8e   :  { %v1601_v62 = vpop.f32.mrf.mxu1 }
 0xd8f   :  { %v1605_v63 = vadd.f32 %v1601_v62, %v3909_v42  ;;  %v2893_v42 = vmul.f32 -1.442695, %v1531_v61 }
 0xd90   :  { %v3241_v0 = vpop.f32.mrf.mxu1 }
 0xd91   :  { %3410 = vtanh.f32 %v1605_v63  ;;  %v2894_v54 = vmul.f32 -1.442695, %v1605_v63 }
 0xd92   :  { %3412 = vpow2.f32 %v2893_v42 }
 0xd93   :  { %3414 = vpow2.f32 %v2894_v54 }
 0xd9a   :  { %v3409_v2 = vpop.eup %3408 }
 0xd9b   :  { %1620 = vrot.lane.b32.xlu0 %v3409_v2, %s3497_s3 }
 0xd9e   :  { %v3411_v9 = vpop.eup %3410 }
 0xd9f   :  { %1615 = vrot.lane.b32.xlu0 %v1614_v8, %s3496_s26  ;;  %1648 = vrot.lane.b32.xlu1 %v3411_v9, %s3497_s3  ;;  %v3413_v12 = vpop.eup %3412 }
 0xda0   :  { %v1609_v13 = vadd.f32 1.0, %v3413_v12  ;;  %v3415_v10 = vpop.eup %3414 }
 0xda1   :  { %v1638_v15 = vadd.f32 1.0, %v3415_v10 }
 0xda2   :  { %3416 = vrcp.f32 %v1609_v13 }
 0xda3   :  { %1643 = vrot.lane.b32.xlu1 %v1454_v41, %s3496_s26  ;;  %3418 = vrcp.f32 %v1638_v15 }
 0xdaf   :  { %v3417_v16 = vpop.eup %3416 }
 0xdb0   :  { %v3419_v58 = vpop.eup %3418 }
 0xe0d   :  { %v1621_v17 = vpop.permute.xlu0 %1620 }
 0xe0e   :  { %v1623_v18 = vmul.f32 %v3417_v16, %v1621_v17 }
 0xe10   :  { %1625 = vrot.lane.b32.xlu0 %v1623_v18, %s3496_s26 }
 0xe11   :  { %v1649_v19 = vpop.permute.xlu1 %1648  ;;  %v1616_v28 = vpop.permute.xlu0 %1615 }
 0xe12   :  { %v1651_v25 = vmul.f32 %v3419_v58, %v1649_v19  ;;  %v1618_v30 = vmul.f32 %v3417_v16, %v1616_v28 }
 0xe14   :  { %1679 = vperm.xlu0 %3358, %v1677_v22   ;;  %1653 = vrot.lane.b32.xlu1 %v1651_v25, %s3496_s26 }
 0xe15   :  { %v4144_v32 = vpop.permute.xlu1 %1643 }
 0xe16   :  { %v1646_v37 = vmul.f32 %v3419_v58, %v4144_v32 }
 0xe82   :  { %v1626_v33 = vpop.permute.xlu0 %1625 }
 0xe83   :  { %v1628_v26 = vadd.f32 %v1626_v33, %v1618_v30 }
 0xe85   :  { %3420 = vtanh.f32 %v1628_v26  ;;  %v1690_v59 = vrot.slane %v1628_v26, 6 }
 0xe86   :  { %v1654_v29 = vpop.permute.xlu1 %1653 }
 0xe87   :  { %v4147_v40 = vadd.f32 %v1654_v29, %v1646_v37 }
 0xe89   :  { %3422 = vtanh.f32 %v4147_v40 }
 0xe8f   :  { %v4156_v48 = vpop.permute.xlu0 %1679 }
 0xe90   :  { %vm1681_vm8 = vcmp.eq.s32.totalorder %v4156_v48, 1 }
 0xe91   :  { %v1699_v19 = vsel %vm1681_vm8, %v4147_v40, %v4144_v32 }
 0xe92   :  { %v3421_v43 = vpop.eup %3420  ;;  %v1889_v30 = vrot.slane %v1699_v19, 2 }
 0xe93   :  { %1631 = vrot.lane.b32.xlu1 %v3421_v43, %s3497_s3 }
 0xe96   :  { %v3423_v44 = vpop.eup %3422 }
 0xe97   :  { %1695 = vrot.lane.b32.xlu1 %v4106_v57, %s3501_s1  ;;  %1659 = vrot.lane.b32.xlu0 %v3423_v44, %s3497_s3 }
 0xe9b   :  { %1667 = vperm.xlu0 %3358, %v1665_v46  }
 0xf05   :  { %v1632_v50 = vpop.permute.xlu1 %1631 }
 0xf06   :  { %v1634_v51 = vmul.f32 %v3417_v16, %v1632_v50 }
 0xf08   :  { %v1671_v34 = vrot.slane %v1634_v51, 6 }
 0xf09   :  { %v1660_v55 = vpop.permute.xlu0 %1659  ;;  %v1696_v56 = vpop.permute.xlu1 %1695 }
 0xf0a   :  { %v4158_v39 = vmul.f32 %v3419_v58, %v1660_v55  ;;  %1672 = vrot.lane.b32.xlu1 %v1671_v34, %s3496_s26 }
 0xf0c   :  { %v1698_v57 = vsel %vm1681_vm8, %v4158_v39, %v1696_v56 }
 0xf0d   :  { %1775 = vrot.lane.b32.xlu0 %v1698_v57, %s3496_s26 }
 0xf0e   :  { %1691 = vrot.lane.b32.xlu1 %v1690_v59, %s3501_s1 }
 0xf16   :  { %v4167_v47 = vpop.permute.xlu0 %1667 }
 0xf17   :  { %vm1669_vm12 = vcmp.eq.s32.totalorder %v4167_v47, 1 }
 0xf7c   :  { %v1673_v60 = vpop.permute.xlu1 %1672 }
 0xf7d   :  { %v1675_v61 = vsel %vm1669_vm12, %v1673_v60, 0.0  ;;  %v4175_v62 = vsel %vm1669_vm12, %v1673_v60, %v4087_v52 }
 0xf7e   :  { %1676 = vst.msk [vmem:[#allocation2 + $0x6] sm:$0x3] %vm930_vm10, %v1675_v61  ;;  %3251 = vmatmul.mubr.msk.f32.vlgmr.msra.gmra.mxu0 %vm175_vm3, %v4175_v62  ;;  %v4255_v61 = vld [vmem:[%s4484_s10 + $0x10] sm:$0xff] }
 0xf7f   :  { %v4180_v63 = vpop.permute.xlu0 %1775  ;;  %3265 = vmatpush3.msra.mxu0 %v3859_v20  ;;  %3272 = vmatprep.mubr.msk.f32.mxu0 %vm3499_vm6, %v3498_v3 }
 0xf80   :  { %3262 = vmatmul.mubr.msk.f32.vlgmr.msra.gmra.mxu1 %vm175_vm3, %v4180_v63  ;;  %3266 = vmatprep.subr.mxu0 %v3498_v3  ;;  %v1692_v8 = vpop.permute.xlu1 %1691 }
 0xf81   :  { %3267 = vmatpush3.msra.mxu0 %v3865_v21  ;;  %3276 = vmatpush3.msra.mxu1 %v3807_v4  ;;  %v1694_v9 = vsel %vm1669_vm12, %v1692_v8, %v4130_v45 }
 0xf82   :  { %3268 = vmatprep.subr.mxu0 %v3498_v3  ;;  %3277 = vmatprep.subr.mxu1 %v3498_v3 }
 0xf83   :  { %3269 = vmatpush3.msra.mxu0 %v3873_v23  ;;  %3278 = vmatpush3.msra.mxu1 %v3815_v5 }
 0xf84   :  { %3270 = vmatprep.subr.mxu0 %v3498_v3  ;;  %3279 = vmatprep.subr.mxu1 %v3498_v3 }
 0xf85   :  { %3271 = vmatpush3.msra.mxu0 %v3881_v24  ;;  %3280 = vmatpush3.msra.mxu1 %v3822_v6 }
 0xf86   :  { %3281 = vmatprep.subr.mxu1 %v3498_v3  ;;  %3283 = vmatprep.mubr.msk.f32.mxu1 %vm3499_vm6, %v3498_v3 }
 0xf87   :  { %3282 = vmatpush3.msra.mxu1 %v3829_v7  ;;  %3286 = vmatprep.subr.mxu0 %v3498_v3 }
 0xf88   :  { %3297 = vmatprep.subr.mxu1 %v3498_v3 }
0x103e   :  { %v1769_v4 = vpop.f32.mrf.mxu0 }
0x103f   :  { %v1773_v5 = vadd.f32 %v1769_v4, %v3905_v38 }
0x1040   :  { %v3252_v21 = vpop.f32.mrf.mxu0  ;;  %v1845_v52 = vpop.f32.mrf.mxu1 }
0x1041   :  { %3424 = vtanh.f32 %v1773_v5  ;;  %v1850_v0 = vrot.slane %v1845_v52, 2  ;;  %v2897_v11 = vmul.f32 -1.442695, %v1773_v5 }
0x1042   :  { %v3263_v1 = vpop.f32.mrf.mxu1 }
0x1043   :  { %v1852_v6 = vadd.f32 %v1850_v0, %v3903_v36 }
0x1045   :  { %3426 = vtanh.f32 %v1852_v6  ;;  %v2898_v41 = vmul.f32 -1.442695, %v1852_v6 }
0x1046   :  { %3428 = vpow2.f32 %v2897_v11 }
0x1047   :  { %3430 = vpow2.f32 %v2898_v41 }
0x104e   :  { %v3425_v2 = vpop.eup %3424 }
0x104f   :  { %1866 = vrot.lane.b32.xlu0 %v3425_v2, %s3497_s3 }
0x1052   :  { %v3427_v7 = vpop.eup %3426 }
0x1053   :  { %1893 = vrot.lane.b32.xlu1 %v3427_v7, %s3497_s3  ;;  %1861 = vrot.lane.b32.xlu0 %v1694_v9, %s3496_s26  ;;  %v3429_v42 = vpop.eup %3428 }
0x1054   :  { %v1856_v54 = vadd.f32 1.0, %v3429_v42  ;;  %v3431_v12 = vpop.eup %3430 }
0x1055   :  { %v1884_v13 = vadd.f32 1.0, %v3431_v12 }
0x1056   :  { %3432 = vrcp.f32 %v1856_v54 }
0x1057   :  { %3434 = vrcp.f32 %v1884_v13 }
0x1063   :  { %v3433_v10 = vpop.eup %3432 }
0x1064   :  { %v3435_v45 = vpop.eup %3434 }
0x1065   :  { %v1891_v33 = vmul.f32 %v3435_v45, %v1889_v30 }
0x10c1   :  { %v1867_v15 = vpop.permute.xlu0 %1866 }
0x10c2   :  { %v1869_v16 = vmul.f32 %v3433_v10, %v1867_v15 }
0x10c4   :  { %1871 = vrot.lane.b32.xlu1 %v1869_v16, %s3496_s26 }
0x10c5   :  { %v1894_v17 = vpop.permute.xlu1 %1893  ;;  %v4214_v58 = vpop.permute.xlu0 %1861 }
0x10c6   :  { %v1896_v18 = vmul.f32 %v3435_v45, %v1894_v17  ;;  %v1864_v22 = vmul.f32 %v3433_v10, %v4214_v58 }
0x10c8   :  { %1898 = vrot.lane.b32.xlu0 %v1896_v18, %s3496_s26 }
0x1136   :  { %v1872_v25 = vpop.permute.xlu1 %1871 }
0x1137   :  { %v4221_v28 = vadd.f32 %v1872_v25, %v1864_v22 }
0x1139   :  { %3436 = vtanh.f32 %v4221_v28  ;;  %v1925_v22 = vsel %vm1681_vm8, %v4221_v28, %v4214_v58 }
0x113a   :  { %v1899_v26 = vpop.permute.xlu0 %1898  ;;  %v2101_v25 = vrot.slane %v1925_v22, 6 }
0x113b   :  { %v1901_v37 = vadd.f32 %v1899_v26, %v1891_v33 }
0x113d   :  { %3438 = vtanh.f32 %v1901_v37  ;;  %v1929_v55 = vrot.slane %v1901_v37, 6 }
0x1146   :  { %v3437_v29 = vpop.eup %3436 }
0x1147   :  { %1877 = vrot.lane.b32.xlu1 %v3437_v29, %s3497_s3 }
0x114a   :  { %v3439_v43 = vpop.eup %3438 }
0x114b   :  { %1904 = vrot.lane.b32.xlu0 %v3439_v43, %s3497_s3  ;;  %1921 = vrot.lane.b32.xlu1 %v4175_v62, %s3501_s1  ;;  %v4275_v62 = vld [vmem:[%s4483_s11 + $0x10] sm:$0xff] }
0x11b9   :  { %v1878_v32 = vpop.permute.xlu1 %1877 }
0x11ba   :  { %v4228_v40 = vmul.f32 %v3433_v10, %v1878_v32 }
0x11bd   :  { %v1905_v44 = vpop.permute.xlu0 %1904  ;;  %v1922_v46 = vpop.permute.xlu1 %1921 }
0x11be   :  { %v1907_v50 = vmul.f32 %v3435_v45, %v1905_v44  ;;  %v1924_v51 = vsel %vm1681_vm8, %v4228_v40, %v1922_v46 }
0x11bf   :  { %1938 = vrot.lane.b32.xlu0 %v1924_v51, %s3496_s26 }
0x11c0   :  { %v1915_v34 = vrot.slane %v1907_v50, 6 }
0x11c2   :  { %1916 = vrot.lane.b32.xlu1 %v1915_v34, %s3496_s26 }
0x11c3   :  { %1930 = vrot.lane.b32.xlu0 %v1929_v55, %s3501_s1 }
0x11c6   :  { %1933 = vrot.lane.b32.xlu1 %v1699_v19, %s3501_s1 }
0x1231   :  { %v4237_v56 = vpop.permute.xlu0 %1938 }
0x1232   :  { %3273 = vmatmul.mubr.msk.f32.vlgmr.msra.gmra.mxu0 %vm175_vm3, %v4237_v56 }
0x1233   :  { %3287 = vmatpush3.msra.mxu0 %v3859_v20  ;;  %3294 = vmatprep.mubr.msk.f32.mxu0 %vm3499_vm6, %v3498_v3  ;;  %v4266_v20 = vld [vmem:[%s4483_s11 + $0x18] sm:$0xff] }
0x1234   :  { %v1917_v59 = vpop.permute.xlu1 %1916  ;;  %3288 = vmatprep.subr.mxu0 %v3498_v3 }
0x1235   :  { %v1919_v57 = vsel %vm1669_vm12, %v1917_v59, 0.0  ;;  %v4250_v60 = vsel %vm1669_vm12, %v1917_v59, %v4180_v63  ;;  %3289 = vmatpush3.msra.mxu0 %v4255_v61  ;;  %v1931_v7 = vpop.permute.xlu0 %1930 }
0x1236   :  { %1920 = vst.msk [vmem:[#allocation3 + $0x6] sm:$0x3] %vm930_vm10, %v1919_v57  ;;  %3284 = vmatmul.mubr.msk.f32.vlgmr.msra.gmra.mxu1 %vm175_vm3, %v4250_v60  ;;  %3290 = vmatprep.subr.mxu0 %v3498_v3 }
0x1237   :  { %3291 = vmatpush3.msra.mxu0 %v3873_v23  ;;  %3298 = vmatpush3.msra.mxu1 %v4266_v20  ;;  %v4284_v23 = vld [vmem:[%s4483_s11 + $0x8] sm:$0xff] }
0x1238   :  { %3292 = vmatprep.subr.mxu0 %v3498_v3  ;;  %3299 = vmatprep.subr.mxu1 %v3498_v3  ;;  %v1934_v8 = vpop.permute.xlu1 %1933 }
0x1239   :  { %3293 = vmatpush3.msra.mxu0 %v3881_v24  ;;  %3300 = vmatpush3.msra.mxu1 %v4275_v62  ;;  %v4292_v24 = vld [vmem:[%s4483_s11] sm:$0xff]  ;;  %v4301_v11 = vsel %vm1669_vm12, %v1931_v7, %v1934_v8 }
0x123a   :  { %3301 = vmatprep.subr.mxu1 %v3498_v3  ;;  %3305 = vmatprep.mubr.msk.f32.mxu1 %vm3499_vm6, %v3498_v3  ;;  %v2128_v41 = vrot.slane %v4301_v11, 4 }
0x123b   :  { %3302 = vmatpush3.msra.mxu1 %v4284_v23  ;;  %3308 = vmatprep.subr.mxu0 %v3498_v3 }
0x123c   :  { %3303 = vmatprep.subr.mxu1 %v3498_v3 }
0x123d   :  { %3304 = vmatpush3.msra.mxu1 %v4292_v24 }
0x123e   :  { %3319 = vmatprep.subr.mxu1 %v3498_v3 }
0x12f2   :  { %v2008_v63 = vpop.f32.mrf.mxu0 }
0x12f3   :  { %v2013_v4 = vrot.slane %v2008_v63, 6 }
0x12f4   :  { %v3274_v5 = vpop.f32.mrf.mxu0 }
0x12f5   :  { %v2015_v21 = vadd.f32 %v2013_v4, %v3905_v38 }
0x12f6   :  { %v2085_v52 = vpop.f32.mrf.mxu1 }
0x12f7   :  { %3440 = vtanh.f32 %v2015_v21  ;;  %v2090_v0 = vrot.slane %v2085_v52, 4  ;;  %v2901_v42 = vmul.f32 -1.442695, %v2015_v21  ;;  %v3493_v21 = vld [vmem:[%s4484_s10 + $0x18] sm:$0xff] }
0x12f8   :  { %v3285_v1 = vpop.f32.mrf.mxu1 }
0x12f9   :  { %v2092_v6 = vadd.f32 %v2090_v0, %v3903_v36  ;;  %v3494_v1 = vld [vmem:[%s4484_s10 + $0x8] sm:$0xff] }
0x12fb   :  { %3442 = vtanh.f32 %v2092_v6  ;;  %v2902_v54 = vmul.f32 -1.442695, %v2092_v6 }
0x12fc   :  { %3444 = vpow2.f32 %v2901_v42 }
0x12fd   :  { %3446 = vpow2.f32 %v2902_v54 }
0x1304   :  { %v3441_v2 = vpop.eup %3440 }
0x1305   :  { %2105 = vrot.lane.b32.xlu0 %v3441_v2, %s3497_s3 }
0x1308   :  { %v3443_v9 = vpop.eup %3442 }
0x1309   :  { %2134 = vrot.lane.b32.xlu1 %v3443_v9, %s3497_s3  ;;  %v3445_v12 = vpop.eup %3444 }
0x130a   :  { %v2096_v13 = vadd.f32 1.0, %v3445_v12  ;;  %v3447_v10 = vpop.eup %3446 }
0x130b   :  { %v2123_v15 = vadd.f32 1.0, %v3447_v10 }
0x130c   :  { %3448 = vrcp.f32 %v2096_v13 }
0x130d   :  { %2129 = vrot.lane.b32.xlu1 %v2128_v41, %s3496_s26  ;;  %3450 = vrcp.f32 %v2123_v15 }
0x1319   :  { %v3449_v16 = vpop.eup %3448 }
0x131a   :  { %v3451_v17 = vpop.eup %3450  ;;  %v2103_v30 = vmul.f32 %v3449_v16, %v2101_v25 }
0x1377   :  { %v2106_v47 = vpop.permute.xlu0 %2105 }
0x1378   :  { %v2108_v45 = vmul.f32 %v3449_v16, %v2106_v47 }
0x137a   :  { %2110 = vrot.lane.b32.xlu0 %v2108_v45, %s3496_s26 }
0x137b   :  { %v2135_v18 = vpop.permute.xlu1 %2134 }
0x137c   :  { %v2137_v19 = vmul.f32 %v3451_v17, %v2135_v18 }
0x137e   :  { %2139 = vrot.lane.b32.xlu0 %v2137_v19, %s3496_s26 }
0x137f   :  { %v2130_v33 = vpop.permute.xlu1 %2129 }
0x1380   :  { %v2132_v29 = vmul.f32 %v3451_v17, %v2130_v33 }
0x13ec   :  { %v2111_v26 = vpop.permute.xlu0 %2110 }
0x13ed   :  { %v2113_v37 = vadd.f32 %v2111_v26, %v2103_v30 }
0x13ef   :  { %3452 = vtanh.f32 %v2113_v37  ;;  %v2166_v55 = vrot.slane %v2113_v37, 2 }
0x13f0   :  { %v2140_v43 = vpop.permute.xlu0 %2139 }
0x13f1   :  { %v2142_v32 = vadd.f32 %v2140_v43, %v2132_v29 }
0x13f3   :  { %3454 = vtanh.f32 %v2142_v32  ;;  %v2176_v57 = vrot.slane %v2142_v32, 4 }
0x13fc   :  { %v3453_v44 = vpop.eup %3452 }
0x13fd   :  { %2116 = vrot.lane.b32.xlu1 %v3453_v44, %s3497_s3 }
0x1400   :  { %v3455_v46 = vpop.eup %3454 }
0x1401   :  { %2145 = vrot.lane.b32.xlu0 %v3455_v46, %s3497_s3 }
0x146f   :  { %v2117_v50 = vpop.permute.xlu1 %2116 }
0x1470   :  { %v2119_v51 = vmul.f32 %v3449_v16, %v2117_v50 }
0x1472   :  { %v2150_v34 = vrot.slane %v2119_v51, 2 }
0x1473   :  { %v2146_v58 = vpop.permute.xlu0 %2145 }
0x1474   :  { %v2148_v28 = vmul.f32 %v3451_v17, %v2146_v58  ;;  %2151 = vrot.lane.b32.xlu1 %v2150_v34, %s3496_s26 }
0x1476   :  { %v2157_v59 = vrot.slane %v2148_v28, 4 }
0x1478   :  { %2158 = vrot.lane.b32.xlu0 %v2157_v59, %s3496_s26  ;;  %2167 = vrot.lane.b32.xlu1 %v2166_v55, %s3501_s1 }
0x147c   :  { %2170 = vrot.lane.b32.xlu0 %v1925_v22, %s3501_s1  ;;  %2177 = vrot.lane.b32.xlu1 %v2176_v57, %s3501_s1 }
0x14e6   :  { %v2152_v63 = vpop.permute.xlu1 %2151 }
0x14e7   :  { %v2154_v4 = vsel %vm1433_vm4, %v2152_v63, 0.0  ;;  %v4324_v5 = vsel %vm1433_vm4, %v2152_v63, %v4237_v56 }
0x14e8   :  { %2155 = vst.msk [vmem:[#allocation2 + $0xa] sm:$0x3] %vm930_vm10, %v2154_v4  ;;  %3295 = vmatmul.mubr.msk.f32.vlgmr.msra.gmra.mxu0 %vm175_vm3, %v4324_v5 }
0x14e9   :  { %3309 = vmatpush3.msra.mxu0 %v3493_v21  ;;  %3316 = vmatprep.mubr.msk.f32.mxu0 %vm3499_vm6, %v3498_v3 }
0x14ea   :  { %v2159_v52 = vpop.permute.xlu0 %2158  ;;  %3310 = vmatprep.subr.mxu0 %v3498_v3  ;;  %v2168_v41 = vpop.permute.xlu1 %2167 }
0x14eb   :  { %v2161_v56 = vsel %vm1421_vm2, %v2159_v52, 0.0  ;;  %v4340_v0 = vsel %vm1421_vm2, %v2159_v52, %v4250_v60  ;;  %3311 = vmatpush3.msra.mxu0 %v4255_v61  ;;  %v3495_v60 = vld [vmem:[%s4484_s10] sm:$0xff] }
0x14ec   :  { %2162 = vst.msk [vmem:[#allocation3 + $0x4] sm:$0x3] %vm930_vm10, %v2161_v56  ;;  %3306 = vmatmul.mubr.msk.f32.vlgmr.msra.gmra.mxu1 %vm175_vm3, %v4340_v0  ;;  %3312 = vmatprep.subr.mxu0 %v3498_v3 }
0x14ed   :  { %3313 = vmatpush3.msra.mxu0 %v3494_v1  ;;  %3320 = vmatpush3.msra.mxu1 %v4266_v20 }
0x14ee   :  { %3314 = vmatprep.subr.mxu0 %v3498_v3  ;;  %3321 = vmatprep.subr.mxu1 %v3498_v3  ;;  %v2171_v42 = vpop.permute.xlu0 %2170 }
0x14ef   :  { %3315 = vmatpush3.msra.mxu0 %v3495_v60  ;;  %3322 = vmatpush3.msra.mxu1 %v4275_v62 }
0x14f0   :  { %3323 = vmatprep.subr.mxu1 %v3498_v3  ;;  %3327 = vmatprep.mubr.msk.f32.mxu1 %vm3499_vm6, %v3498_v3 }
0x14f1   :  { %3324 = vmatpush3.msra.mxu1 %v4284_v23  ;;  %v2178_v23 = vpop.permute.xlu1 %2177 }
0x14f2   :  { %3325 = vmatprep.subr.mxu1 %v3498_v3  ;;  %v4367_v3 = vsel %vm1433_vm4, %v2168_v41, %v2171_v42  ;;  %v4374_v13 = vsel %vm1421_vm2, %v2178_v23, %v4301_v11 }
0x14f3   :  { %3326 = vmatpush3.msra.mxu1 %v4292_v24  ;;  %v2343_v24 = vrot.slane %v4367_v3, 4  ;;  %v2372_v10 = vrot.slane %v4374_v13, 6 }
0x15a8   :  { %v2250_v61 = vpop.f32.mrf.mxu0 }
0x15a9   :  { %v2255_v20 = vrot.slane %v2250_v61, 4  ;;  %v2642_v61 = vld [vmem:[#allocation2] sm:$0xff] }
0x15aa   :  { %v3296_v6 = vpop.f32.mrf.mxu0 }
0x15ab   :  { %v2257_v2 = vadd.f32 %v2255_v20, %v3905_v38 }
0x15ac   :  { %v2327_v8 = vpop.f32.mrf.mxu1 }
0x15ad   :  { %3456 = vtanh.f32 %v2257_v2  ;;  %v2332_v7 = vrot.slane %v2327_v8, 6  ;;  %v2905_v53 = vmul.f32 -1.442695, %v2257_v2 }
0x15ae   :  { %v3307_v62 = vpop.f32.mrf.mxu1 }
0x15af   :  { %v2334_v9 = vadd.f32 %v2332_v7, %v3903_v36 }
0x15b1   :  { %3458 = vtanh.f32 %v2334_v9  ;;  %v2906_v15 = vmul.f32 -1.442695, %v2334_v9 }
0x15b2   :  { %3460 = vpow2.f32 %v2905_v53 }
0x15b3   :  { %3462 = vpow2.f32 %v2906_v15 }
0x15ba   :  { %v3457_v54 = vpop.eup %3456 }
0x15bb   :  { %2349 = vrot.lane.b32.xlu0 %v3457_v54, %s3497_s3 }
0x15be   :  { %v3459_v12 = vpop.eup %3458 }
0x15bf   :  { %2378 = vrot.lane.b32.xlu1 %v3459_v12, %s3497_s3  ;;  %2344 = vrot.lane.b32.xlu0 %v2343_v24, %s3496_s26  ;;  %v3461_v16 = vpop.eup %3460 }
0x15c0   :  { %v2338_v47 = vadd.f32 1.0, %v3461_v16  ;;  %v3463_v45 = vpop.eup %3462 }
0x15c1   :  { %v2367_v17 = vadd.f32 1.0, %v3463_v45 }
0x15c2   :  { %3464 = vrcp.f32 %v2338_v47 }
0x15c3   :  { %2373 = vrot.lane.b32.xlu0 %v2372_v10, %s3496_s26  ;;  %3466 = vrcp.f32 %v2367_v17 }
0x15cf   :  { %v3465_v49 = vpop.eup %3464 }
0x15d0   :  { %v3467_v19 = vpop.eup %3466 }
0x162d   :  { %v2350_v11 = vpop.permute.xlu0 %2349 }
0x162e   :  { %v2352_v18 = vmul.f32 %v3465_v49, %v2350_v11 }
0x1630   :  { %2354 = vrot.lane.b32.xlu1 %v2352_v18, %s3496_s26 }
0x1631   :  { %v2379_v22 = vpop.permute.xlu1 %2378  ;;  %v2345_v30 = vpop.permute.xlu0 %2344 }
0x1632   :  { %v2381_v25 = vmul.f32 %v3467_v19, %v2379_v22  ;;  %v2347_v33 = vmul.f32 %v3465_v49, %v2345_v30 }
0x1634   :  { %2383 = vrot.lane.b32.xlu1 %v2381_v25, %s3496_s26 }
0x1635   :  { %v2374_v26 = vpop.permute.xlu0 %2373 }
0x1636   :  { %v2376_v43 = vmul.f32 %v3467_v19, %v2374_v26  ;;  %v2653_v26 = vld [vmem:[%s4487_s13 + $0x18] sm:$0xff] }
0x1637   :  { %3330 = vmatprep.subr.mxu0 %v2653_v26 }
0x16a2   :  { %v2355_v37 = vpop.permute.xlu1 %2354 }
0x16a3   :  { %v2357_v29 = vadd.f32 %v2355_v37, %v2347_v33  ;;  %v2649_v37 = vld [vmem:[%s4488_s12 + $0x18] sm:$0xff] }
0x16a4   :  { %3341 = vmatprep.subr.mxu1 %v2649_v37 }
0x16a5   :  { %3468 = vtanh.f32 %v2357_v29  ;;  %v2409_v59 = vrot.slane %v2357_v29, 4  ;;  %v2652_v29 = vld [vmem:[%s4487_s13 + $0x10] sm:$0xff] }
0x16a6   :  { %v2384_v32 = vpop.permute.xlu1 %2383 }
0x16a7   :  { %v2386_v44 = vadd.f32 %v2384_v32, %v2376_v43  ;;  %v2648_v43 = vld [vmem:[%s4488_s12 + $0x10] sm:$0xff]  ;;  %v2651_v32 = vld [vmem:[%s4487_s13 + $0x8] sm:$0xff] }
0x16a9   :  { %3470 = vtanh.f32 %v2386_v44  ;;  %v2416_v63 = vrot.slane %v2386_v44, 2 }
0x16b2   :  { %v3469_v46 = vpop.eup %3468 }
0x16b3   :  { %2360 = vrot.lane.b32.xlu0 %v3469_v46, %s3497_s3 }
0x16b6   :  { %v3471_v50 = vpop.eup %3470 }
0x16b7   :  { %2389 = vrot.lane.b32.xlu1 %v3471_v50, %s3497_s3  ;;  %v2647_v50 = vld [vmem:[%s4488_s12 + $0x8] sm:$0xff] }
0x1725   :  { %v2361_v51 = vpop.permute.xlu0 %2360 }
0x1726   :  { %v2363_v34 = vmul.f32 %v3465_v49, %v2361_v51  ;;  %v2650_v51 = vld [vmem:[%s4487_s13] sm:$0xff] }
0x1728   :  { %v2394_v58 = vrot.slane %v2363_v34, 4  ;;  %v2646_v34 = vld [vmem:[%s4488_s12] sm:$0xff] }
0x1729   :  { %v2390_v28 = vpop.permute.xlu1 %2389 }
0x172a   :  { %v2392_v55 = vmul.f32 %v3467_v19, %v2390_v28  ;;  %2395 = vrot.lane.b32.xlu0 %v2394_v58, %s3496_s26 }
0x172c   :  { %v2401_v57 = vrot.slane %v2392_v55, 2 }
0x172e   :  { %2410 = vrot.lane.b32.xlu0 %v2409_v59, %s3501_s1  ;;  %2402 = vrot.lane.b32.xlu1 %v2401_v57, %s3496_s26  ;;  %v1682_v57 = vsel %vm1681_vm8, %v4158_v39, 0.0 }
0x1732   :  { %2417 = vrot.lane.b32.xlu1 %v2416_v63, %s3501_s1  ;;  %v1908_v63 = vsel %vm1681_vm8, %v4228_v40, 0.0 }
0x179c   :  { %v2396_v4 = vpop.permute.xlu0 %2395 }
0x179d   :  { %v2398_v21 = vsel %vm1178_vm15, %v2396_v4, 0.0  ;;  %v2407_v52 = vsel %vm1178_vm15, %v2396_v4, %v4324_v5 }
0x179e   :  { %2399 = vst.msk [vmem:[#allocation2 + $0xc] sm:$0x3] %vm930_vm10, %v2398_v21  ;;  %3317 = vmatmul.mubr.msk.f32.vlgmr.msra.gmra.mxu0 %vm175_vm3, %v2407_v52 }
0x179f   :  { %3331 = vmatpush3.msra.mxu0 %v2653_v26 }
0x17a0   :  { %v2403_v56 = vpop.permute.xlu1 %2402  ;;  %v2411_v9 = vpop.permute.xlu0 %2410  ;;  %3332 = vmatprep.subr.mxu0 %v2652_v29 }
0x17a1   :  { %v2405_v1 = vsel %vm1166_vm14, %v2403_v56, 0.0  ;;  %v2414_v60 = vsel %vm1166_vm14, %v2403_v56, %v4340_v0  ;;  %v2413_v41 = vsel %vm1178_vm15, %v2411_v9, %v4367_v3  ;;  %3333 = vmatpush3.msra.mxu0 %v2652_v29 }
0x17a2   :  { %2406 = vst.msk [vmem:[#allocation3 + $0x2] sm:$0x3] %vm930_vm10, %v2405_v1  ;;  %3328 = vmatmul.mubr.msk.f32.vlgmr.msra.gmra.mxu1 %vm175_vm3, %v2414_v60  ;;  %v2580_v54 = vrot.slane %v2413_v41, 2  ;;  %3334 = vmatprep.subr.mxu0 %v2651_v32  ;;  %v2915_v60 = vld [vmem:[%s4489_s14] ss:$0 sm:$0xff] }
0x17a3   :  { %3349 = vmatprep.mubr.msk.f32.mxu1 %vm175_vm3, %v2642_v61  ;;  %3342 = vmatpush3.msra.mxu1 %v2649_v37 }
0x17a4   :  { %v2418_v23 = vpop.permute.xlu1 %2417  ;;  %3343 = vmatprep.subr.mxu1 %v2648_v43  ;;  %3335 = vmatpush3.msra.mxu0 %v2651_v32 }
0x17a5   :  { %3344 = vmatpush3.msra.mxu1 %v2648_v43  ;;  %3336 = vmatprep.subr.mxu0 %v2650_v51 }
0x17a6   :  { %3345 = vmatprep.subr.mxu1 %v2647_v50  ;;  %3337 = vmatpush3.msra.mxu0 %v2650_v51 }
0x17a7   :  { %3346 = vmatpush3.msra.mxu1 %v2647_v50 }
0x17a8   :  { %3347 = vmatprep.subr.mxu1 %v2646_v34 }
0x17a9   :  { %3348 = vmatpush3.msra.mxu1 %v2646_v34 }
0x185e   :  { %v2490_v5 = vpop.f32.mrf.mxu0 }
0x185f   :  { %v2495_v20 = vrot.slane %v2490_v5, 2 }
0x1860   :  { %v3318_v6 = vpop.f32.mrf.mxu0 }
0x1861   :  { %v2497_v2 = vadd.f32 %v2495_v20, %v3905_v38 }
0x1862   :  { %v2567_v8 = vpop.f32.mrf.mxu1 }
0x1863   :  { %3472 = vtanh.f32 %v2497_v2  ;;  %v2571_v7 = vadd.f32 %v2567_v8, %v3903_v36  ;;  %v2420_v36 = vsel %vm1166_vm14, %v2418_v23, %v4374_v13  ;;  %v2909_v38 = vmul.f32 -1.442695, %v2497_v2 }
0x1864   :  { %v3329_v62 = vpop.f32.mrf.mxu1 }
0x1865   :  { %3474 = vtanh.f32 %v2571_v7  ;;  %v2910_v24 = vmul.f32 -1.442695, %v2571_v7 }
0x1866   :  { %3476 = vpow2.f32 %v2909_v38 }
0x1867   :  { %3478 = vpow2.f32 %v2910_v24 }
0x1870   :  { %v3473_v0 = vpop.eup %3472 }
0x1871   :  { %2586 = vrot.lane.b32.xlu0 %v3473_v0, %s3497_s3 }
0x1872   :  { %v3475_v42 = vpop.eup %3474 }
0x1873   :  { %2614 = vrot.lane.b32.xlu1 %v3475_v42, %s3497_s3  ;;  %v3477_v35 = vpop.eup %3476 }
0x1874   :  { %v3479_v3 = vpop.eup %3478  ;;  %v2575_v12 = vadd.f32 1.0, %v3477_v35 }
0x1875   :  { %2581 = vrot.lane.b32.xlu0 %v2580_v54, %s3496_s26  ;;  %v2604_v10 = vadd.f32 1.0, %v3479_v3 }
0x1876   :  { %3480 = vrcp.f32 %v2575_v12 }
0x1877   :  { %2609 = vrot.lane.b32.xlu1 %v2420_v36, %s3496_s26  ;;  %3482 = vrcp.f32 %v2604_v10 }
0x1883   :  { %v3481_v53 = vpop.eup %3480 }
0x1884   :  { %v3483_v47 = vpop.eup %3482 }
0x18e3   :  { %v2587_v15 = vpop.permute.xlu0 %2586 }
0x18e4   :  { %v2589_v16 = vmul.f32 %v3481_v53, %v2587_v15 }
0x18e5   :  { %v2615_v45 = vpop.permute.xlu1 %2614 }
0x18e6   :  { %2591 = vrot.lane.b32.xlu0 %v2589_v16, %s3496_s26  ;;  %v2617_v31 = vmul.f32 %v3483_v47, %v2615_v45 }
0x18e7   :  { %v2582_v13 = vpop.permute.xlu0 %2581 }
0x18e8   :  { %2619 = vrot.lane.b32.xlu1 %v2617_v31, %s3496_s26  ;;  %v2584_v17 = vmul.f32 %v3481_v53, %v2582_v13 }
0x18e9   :  { %v2610_v49 = vpop.permute.xlu1 %2609 }
0x18ea   :  { %v2612_v19 = vmul.f32 %v3483_v47, %v2610_v49 }
0x1958   :  { %v2592_v11 = vpop.permute.xlu0 %2591 }
0x1959   :  { %v2594_v18 = vadd.f32 %v2592_v11, %v2584_v17 }
0x195a   :  { %v2620_v22 = vpop.permute.xlu1 %2619 }
0x195b   :  { %3484 = vtanh.f32 %v2594_v18  ;;  %v2622_v25 = vadd.f32 %v2620_v22, %v2612_v19 }
0x195d   :  { %3486 = vtanh.f32 %v2622_v25 }
0x1968   :  { %v3485_v30 = vpop.eup %3484 }
0x1969   :  { %2597 = vrot.lane.b32.xlu0 %v3485_v30, %s3497_s3 }
0x196a   :  { %v3487_v33 = vpop.eup %3486 }
0x196b   :  { %2625 = vrot.lane.b32.xlu1 %v3487_v33, %s3497_s3 }
0x19db   :  { %v2598_v44 = vpop.permute.xlu0 %2597 }
0x19dc   :  { %v2600_v46 = vmul.f32 %v3481_v53, %v2598_v44 }
0x19dd   :  { %v2626_v28 = vpop.permute.xlu1 %2625 }
0x19de   :  { %v2630_v58 = vrot.slane %v2600_v46, 6  ;;  %v2628_v55 = vmul.f32 %v3483_v47, %v2626_v28 }
0x19e0   :  { %2631 = vrot.lane.b32.xlu0 %v2630_v58, %s3496_s26  ;;  %v2636_v59 = vsel %vm924_vm9, %v2628_v55, 0.0 }
0x19e1   :  { %2638 = vrot.lane.b32.xlu1 %v2636_v59, %s3496_s26 }
0x19e4   :  { %1684 = vrot.lane.b32.xlu0 %v1682_v57, %s3496_s26 }
0x19e5   :  { %1910 = vrot.lane.b32.xlu1 %v1908_v63, %s3496_s26 }
0x1a52   :  { %v2632_v4 = vpop.permute.xlu0 %2631 }
0x1a53   :  { %v2634_v21 = vsel %vm936_vm11, %v2632_v4, 0.0  ;;  %v2639_v14 = vpop.permute.xlu1 %2638 }
0x1a54   :  { %2635 = vst.msk [vmem:[#allocation2 + $0xe] sm:$0x3] %vm930_vm10, %v2634_v21  ;;  %2641 = vst.msk [vmem:[#allocation3] sm:$0x3] %vm930_vm10, %v2639_v14 }
0x1a56   :  { %v1685_v52 = vpop.permute.xlu0 %1684 }
0x1a57   :  { %1687 = vst.msk [vmem:[#allocation3 + $0x8] sm:$0x3] %vm930_vm10, %v1685_v52  ;;  %v1911_v39 = vpop.permute.xlu1 %1910 }
0x1a58   :  { %1913 = vst.msk [vmem:[#allocation2 + $0x8] sm:$0x3] %vm930_vm10, %v1911_v39 }
0x1a5b   :  { %v2644_v56 = vld [vmem:[#allocation3] sm:$0xff] }
0x1a5c   :  { %3338 = vmatprep.mubr.msk.f32.mxu0 %vm175_vm3, %v2644_v56 }
0x1a5e   :  { %v2645_v48 = vld [vmem:[#allocation3 + $0x8] sm:$0xff] }
0x1a5f   :  { %3339 = vmatmul.mubr.msk.f32.vlgmr.msra.gmra.mxu0 %vm175_vm3, %v2645_v48  ;;  %v2643_v40 = vld [vmem:[#allocation2 + $0x8] sm:$0xff] }
0x1a60   :  { %3350 = vmatmul.mubr.msk.f32.vlgmr.msra.gmra.mxu1 %vm175_vm3, %v2643_v40 }
0x1b1f   :  { %v3340_v27 = vpop.f32.mrf.mxu0 }
0x1b20   :  { %v3351_v1 = vpop.f32.mrf.mxu1 }
0x1b21   :  { %v2726_v61 = vpop.f32.mrf.mxu0  ;;  %v2813_v5 = vadd.f32 %v3351_v1, %v3340_v27 }
0x1b22   :  { %v2807_v20 = vpop.f32.mrf.mxu1 }
0x1b23   :  { %v2824_v6 = vadd.f32 %v2915_v60, %v2813_v5  ;;  %v2808_v2 = vadd.f32 %v2807_v20, %v2726_v61 }
0x1b25   :  { %2826 = vst.msk [vmem:[%s4490_s15 + $0x8] sm:$0xff] %vm175_vm3, %v2824_v6  ;;  %v2823_v8 = vadd.f32 %v2915_v60, %v2808_v2 }
0x1b27   :  { %2825 = vst.msk [vmem:[%s4490_s15] sm:$0xff] %vm175_vm3, %v2823_v8 }

</bundles_post_ra>
